<compile_context>
chip_gen: v7x
topology: tpu7x:2x2x1
jax: 0.10.0
libtpu: 0.0.40
codegen_flags: <defaults>
</compile_context>

<pallas_src>
import functools

import numpy as np
import jax
import jax.numpy as jnp
from jax.experimental import pallas as pl
from jax.experimental.pallas import tpu as pltpu

LEAK = 0.3
BN_EPS = 1e-5
NOISE_DIM = 62
OUT_PAD = 128 - 2 * NOISE_DIM          # pad 124 -> 128 lanes

_VMEM_SPEC = pl.BlockSpec(memory_space=pltpu.MemorySpace.VMEM)


def _leaky(y):
    return jnp.where(y > 0, y, LEAK * y)


# ------------------------------ fused kernel ------------------------------
def _encoder_kernel(col0g_ref, w0bd_ref, w1f_ref, g1_ref, be1_ref,
                    w2_hbm_ref, g2_ref, be2_ref, w3_ref, b3_ref,
                    o_ref, w2_vmem, y1_scr, dma_sem, *, batch, n_pos):
    f32 = jnp.float32
    bf16 = jnp.bfloat16

    # Kick off the (largest) layer-2 weight transfer so the HBM->VMEM DMA
    # overlaps the layer-0/1 compute.
    w2_copy = pltpu.make_async_copy(w2_hbm_ref, w2_vmem, dma_sem)
    w2_copy.start()

    # ---- layer0 fused with layer1's im2col --------------------------------
    # col0g rows are ordered (oh1, ow1, b); columns (tap, patch-feat+valid).
    # The block-diagonal augmented weight produces, per row, all 16 taps'
    # LeakyReLU(conv0) activations side by side; padded taps come out exactly
    # zero (validity channel 0 kills both the patch and the conv0 bias).
    p0 = jnp.dot(col0g_ref[...], w0bd_ref[...], preferred_element_type=f32)
    patches = _leaky(p0).astype(bf16)                 # (n_pos*B, 16*32)

    # ---- layer1: Conv2d(32,128,4,2,1) as ONE K=512 matmul + BN2d + LeakyReLU
    y1 = jnp.dot(patches, w1f_ref[...], preferred_element_type=f32)   # (n_pos*B, 128)
    m1 = jnp.mean(y1, axis=0, keepdims=True)          # batch stats over B*H1*W1
    d1 = y1 - m1
    v1 = jnp.mean(d1 * d1, axis=0, keepdims=True)     # biased, centered
    y1 = d1 * jax.lax.rsqrt(v1 + BN_EPS) * g1_ref[...] + be1_ref[...]
    y1_scr[...] = _leaky(y1)                          # rows ordered (p, b)

    # ---- layer2: Linear(128*H1*W1, 512) as ONE K=2048 matmul ----------------
    # Relayout (p, b)-rows -> one 2048-wide row per sample; PyTorch's (c, h, w)
    # flatten order is honoured by the host-side pre-permutation of w2.
    x2 = jnp.concatenate(
        [y1_scr[p * batch:(p + 1) * batch, :] for p in range(n_pos)], axis=1)
    w2_copy.wait()
    y2 = jnp.dot(x2.astype(bf16), w2_vmem[...], preferred_element_type=f32)  # (B, 512)
    m2 = jnp.mean(y2, axis=0, keepdims=True)
    d2 = y2 - m2
    v2 = jnp.mean(d2 * d2, axis=0, keepdims=True)
    y2 = d2 * jax.lax.rsqrt(v2 + BN_EPS) * g2_ref[...] + be2_ref[...]
    y2 = _leaky(y2).astype(bf16)

    # ---- layer3: Linear(512, 124), padded to 128 lanes for a full-lane store
    y3 = jnp.dot(y2, w3_ref[...], preferred_element_type=f32) + b3_ref[...]
    o_ref[...] = y3.astype(o_ref.dtype)


# ------------------------------ forward wrapper -----------------------------
def encoder_vae_forward(x_nchw, packed, image_size):
    """x_nchw: (B, 1, S, S) with S % 4 == 0 -> (B, 2*62)."""
    B = x_nchw.shape[0]
    H0 = image_size // 2
    H1 = image_size // 4
    n_pos = H1 * H1
    M1 = n_pos * B

    # layer-0 im2col: per layer-0 output position, its 4x4 input patch
    # (features ordered (c=1, kh0, kw0); zero padding of the image included).
    col0 = jax.lax.conv_general_dilated_patches(
        x_nchw, filter_shape=(4, 4), window_strides=(2, 2),
        padding=((1, 1), (1, 1)))                          # (B, 16, H0, H0)
    # validity channel: 1 on every real layer-0 position.
    col0v = jnp.concatenate(
        [col0, jnp.ones((B, 1, H0, H0), col0.dtype)], axis=1)   # (B, 17, H0, H0)
    # layer-1 im2col of (patches + validity): per layer-1 output position and
    # filter tap, the layer-0 input patch feeding it (all-zero where the tap
    # lands in layer-1's zero padding).  Feature order is (c0, kh1, kw1).
    col0g = jax.lax.conv_general_dilated_patches(
        col0v, filter_shape=(4, 4), window_strides=(2, 2),
        padding=((1, 1), (1, 1)))                          # (B, 17*16, H1, H1)
    col0g = col0g.reshape(B, 17, 16, H1, H1)               # (b, c0, t1, oh1, ow1)
    col0g = col0g.transpose(3, 4, 0, 2, 1).reshape(M1, 16 * 17)  # rows (p, b), cols (t1, c0)
    col0g = col0g.astype(jnp.bfloat16)

    kernel = functools.partial(_encoder_kernel, batch=B, n_pos=n_pos)
    out = pl.pallas_call(
        kernel,
        out_shape=jax.ShapeDtypeStruct((B, 128), jnp.float32),
        in_specs=[_VMEM_SPEC, _VMEM_SPEC, _VMEM_SPEC, _VMEM_SPEC, _VMEM_SPEC,
                  pl.BlockSpec(memory_space=pl.ANY),       # w2 stays in HBM; DMA'd manually
                  _VMEM_SPEC, _VMEM_SPEC, _VMEM_SPEC, _VMEM_SPEC],
        out_specs=_VMEM_SPEC,
        scratch_shapes=[pltpu.VMEM((n_pos * 128, 512), jnp.bfloat16),  # w2 landing buffer
                        pltpu.VMEM((M1, 128), jnp.float32),            # y1 relayout scratch
                        pltpu.SemaphoreType.DMA],
    )(col0g, packed["w0bd"], packed["w1f"], packed["g1"], packed["be1"],
      packed["w2f"], packed["g2"], packed["be2"], packed["w3p"], packed["b3p"])

    return out[:, :2 * NOISE_DIM]


# ------------------------- one-time parameter packing -----------------------
def pack_params(params, image_size):
    """Re-layout PyTorch-convention parameters for the fused kernel (run once,
    outside jit).  b1/b2 are intentionally dropped: BatchNorm cancels them.
    All matmul weights are stored as bf16; BN affine params stay f32."""
    H1 = image_size // 4
    n_pos = H1 * H1
    bf = jnp.bfloat16

    # layer0: (32,1,4,4) -> (16,32) with rows (kh0,kw0); append bias as row 16;
    # tile as a 16-block block-diagonal so one matmul emits all 16 conv1 taps.
    w0m = np.asarray(params["w0"], np.float32).reshape(32, 16).T        # (16, 32)
    w0a = np.concatenate(
        [w0m, np.asarray(params["b0"], np.float32).reshape(1, 32)], axis=0)  # (17, 32)
    w0bd = np.zeros((16 * 17, 16 * 32), np.float32)
    for t in range(16):
        w0bd[t * 17:(t + 1) * 17, t * 32:(t + 1) * 32] = w0a

    # layer1: (128,32,4,4) -> rows ordered (kh1, kw1, cin), cols = cout.
    w1f = np.transpose(np.asarray(params["w1"], np.float32),
                       (2, 3, 1, 0)).reshape(16 * 32, 128)

    # layer2: PyTorch flatten order is (c, h, w) = row index c*n_pos + p;
    # kernel builds columns ordered (p, c), so permute rows to (p, c).
    w2f = (np.asarray(params["w2"], np.float32)
           .reshape(128, n_pos, 512).transpose(1, 0, 2).reshape(n_pos * 128, 512))

    # layer3: pad the 124-wide output dim to 128 lanes.
    w3p = np.pad(np.asarray(params["w3"], np.float32), ((0, 0), (0, OUT_PAD)))
    b3p = np.pad(np.asarray(params["b3"], np.float32), (0, OUT_PAD)).reshape(1, -1)

    return {
        "w0bd": jnp.asarray(w0bd, bf),
        "w1f": jnp.asarray(w1f, bf),
        "g1": jnp.asarray(params["g1"], jnp.float32).reshape(1, -1),
        "be1": jnp.asarray(params["beta1"], jnp.float32).reshape(1, -1),
        "w2f": jnp.asarray(w2f, bf),
        "g2": jnp.asarray(params["g2"], jnp.float32).reshape(1, -1),
        "be2": jnp.asarray(params["beta2"], jnp.float32).reshape(1, -1),
        "w3p": jnp.asarray(w3p, bf),
        "b3p": jnp.asarray(b3p, jnp.float32),
    }


# ---------------------------- deterministic init ----------------------------
def init_params(key, image_size):
    """Matches the PyTorch module's init: N(0, 0.02) weights, zero biases,
    BatchNorm gamma=1 / beta=0.  (b1/b2 exist in the module but are zero AND
    cancelled by the following BatchNorm, so the kernel never consumes them.)"""
    feat_in = 128 * (image_size // 4) * (image_size // 4)
    ks = jax.random.split(key, 4)
    std = 0.02
    return {
        "w0": std * jax.random.normal(ks[0], (32, 1, 4, 4), jnp.float32),
        "b0": jnp.zeros((32,), jnp.float32),
        "w1": std * jax.random.normal(ks[1], (128, 32, 4, 4), jnp.float32),
        "b1": jnp.zeros((128,), jnp.float32),
        "g1": jnp.ones((128,), jnp.float32),
        "beta1": jnp.zeros((128,), jnp.float32),
        "w2": std * jax.random.normal(ks[2], (feat_in, 512), jnp.float32),
        "b2": jnp.zeros((512,), jnp.float32),
        "g2": jnp.ones((512,), jnp.float32),
        "beta2": jnp.zeros((512,), jnp.float32),
        "w3": std * jax.random.normal(ks[3], (512, 2 * NOISE_DIM), jnp.float32),
        "b3": jnp.zeros((2 * NOISE_DIM,), jnp.float32),
    }


if __name__ == "__main__":
    IMAGE_SIZE = 16      # input_ImageSize (divisible by 4)
    BATCH = 2

    key = jax.random.PRNGKey(0)
    k_x, k_p = jax.random.split(key)
    x = jax.random.normal(k_x, (BATCH, 1, IMAGE_SIZE, IMAGE_SIZE), jnp.float32)
    params = init_params(k_p, IMAGE_SIZE)
    packed = pack_params(params, IMAGE_SIZE)

    fwd = jax.jit(functools.partial(encoder_vae_forward, image_size=IMAGE_SIZE))
    out = jax.block_until_ready(fwd(x, packed))

    assert out.shape == (BATCH, 2 * NOISE_DIM), out.shape
    assert bool(jnp.all(jnp.isfinite(out)))
    # TODO(synk): BatchNorm running-mean/var buffer updates (a training-mode
    # side effect of the PyTorch module) are not materialized, only the output.
    print("KERNEL_OK")
</pallas_src>

<mosaic_0001>
module attributes {stable_mosaic.version = 11 : i64} {
  func.func @_encoder_kernel(%arg0: memref<32x272xbf16, #tpu.memory_space<vmem>>, %arg1: memref<272x512xbf16, #tpu.memory_space<vmem>>, %arg2: memref<512x128xbf16, #tpu.memory_space<vmem>>, %arg3: memref<1x128xf32, #tpu.memory_space<vmem>>, %arg4: memref<1x128xf32, #tpu.memory_space<vmem>>, %arg5: memref<2048x512xbf16, #tpu.memory_space<any>>, %arg6: memref<1x512xf32, #tpu.memory_space<vmem>>, %arg7: memref<1x512xf32, #tpu.memory_space<vmem>>, %arg8: memref<512x128xbf16, #tpu.memory_space<vmem>>, %arg9: memref<1x128xf32, #tpu.memory_space<vmem>>, %arg10: memref<2x128xf32, #tpu.memory_space<vmem>>, %arg11: memref<2048x512xbf16, #tpu.memory_space<vmem>>, %arg12: memref<32x128xf32, #tpu.memory_space<vmem>>, %arg13: memref<!tpu.dma_semaphore, #tpu.memory_space<semaphore_mem>>) attributes {dimension_semantics = [], scalar_prefetch = 0 : i64, scratch_operands = 3 : i64, tpu.core_type = #tpu.core_type<tc>} {
    tpu.enqueue_dma source(%arg5 : memref<2048x512xbf16, #tpu.memory_space<any>>) target(%arg11 : memref<2048x512xbf16, #tpu.memory_space<vmem>>) target_semaphore(%arg13 : memref<!tpu.dma_semaphore, #tpu.memory_space<semaphore_mem>>)
    %c0 = arith.constant 0 : index
    %c0_0 = arith.constant 0 : index
    %0 = vector.load %arg0[%c0, %c0_0] : memref<32x272xbf16, #tpu.memory_space<vmem>>, vector<32x272xbf16>
    %c0_1 = arith.constant 0 : index
    %c0_2 = arith.constant 0 : index
    %1 = vector.load %arg1[%c0_1, %c0_2] : memref<272x512xbf16, #tpu.memory_space<vmem>>, vector<272x512xbf16>
    %cst = arith.constant dense<0.000000e+00> : vector<32x512xf32>
    %2 = tpu.matmul %0, %1, %cst {dimension_numbers = #tpu.dot_dimension_numbers<[1], [0], [0], [1], [0, 0, 1, 1], [], []>} : vector<32x272xbf16>, vector<272x512xbf16>, vector<32x512xf32> -> vector<32x512xf32>
    %cst_3 = arith.constant 0.000000e+00 : f32
    %3 = vector.broadcast %cst_3 : f32 to vector<32x512xf32>
    %4 = arith.cmpf ogt, %2, %3 : vector<32x512xf32>
    %cst_4 = arith.constant 3.000000e-01 : f32
    %5 = vector.broadcast %cst_4 : f32 to vector<32x512xf32>
    %6 = arith.mulf %5, %2 : vector<32x512xf32>
    %7 = arith.select %4, %2, %6 : vector<32x512xi1>, vector<32x512xf32>
    %8 = arith.truncf %7 : vector<32x512xf32> to vector<32x512xbf16>
    %c0_5 = arith.constant 0 : index
    %c0_6 = arith.constant 0 : index
    %9 = vector.load %arg2[%c0_5, %c0_6] : memref<512x128xbf16, #tpu.memory_space<vmem>>, vector<512x128xbf16>
    %cst_7 = arith.constant dense<0.000000e+00> : vector<32x128xf32>
    %10 = tpu.matmul %8, %9, %cst_7 {dimension_numbers = #tpu.dot_dimension_numbers<[1], [0], [0], [1], [0, 0, 1, 1], [], []>} : vector<32x512xbf16>, vector<512x128xbf16>, vector<32x128xf32> -> vector<32x128xf32>
    %cst_8 = arith.constant dense<0.000000e+00> : vector<128xf32>
    %11 = vector.multi_reduction <add>, %10, %cst_8 [0] : vector<32x128xf32> to vector<128xf32>
    %12 = vector.shape_cast %11 : vector<128xf32> to vector<1x128xf32>
    %cst_9 = arith.constant 3.200000e+01 : f32
    %13 = vector.broadcast %cst_9 : f32 to vector<1x128xf32>
    %14 = arith.divf %12, %13 : vector<1x128xf32>
    %15 = vector.broadcast %14 : vector<1x128xf32> to vector<32x128xf32>
    %16 = arith.subf %10, %15 : vector<32x128xf32>
    %17 = arith.mulf %16, %16 : vector<32x128xf32>
    %cst_10 = arith.constant dense<0.000000e+00> : vector<128xf32>
    %18 = vector.multi_reduction <add>, %17, %cst_10 [0] : vector<32x128xf32> to vector<128xf32>
    %19 = vector.shape_cast %18 : vector<128xf32> to vector<1x128xf32>
    %cst_11 = arith.constant 3.200000e+01 : f32
    %20 = vector.broadcast %cst_11 : f32 to vector<1x128xf32>
    %21 = arith.divf %19, %20 : vector<1x128xf32>
    %cst_12 = arith.constant 9.99999974E-6 : f32
    %22 = vector.broadcast %cst_12 : f32 to vector<1x128xf32>
    %23 = arith.addf %21, %22 : vector<1x128xf32>
    %24 = math.rsqrt %23 : vector<1x128xf32>
    %25 = vector.broadcast %24 : vector<1x128xf32> to vector<32x128xf32>
    %26 = arith.mulf %16, %25 : vector<32x128xf32>
    %c0_13 = arith.constant 0 : index
    %c0_14 = arith.constant 0 : index
    %27 = vector.load %arg3[%c0_13, %c0_14] : memref<1x128xf32, #tpu.memory_space<vmem>>, vector<1x128xf32>
    %28 = vector.broadcast %27 : vector<1x128xf32> to vector<32x128xf32>
    %29 = arith.mulf %26, %28 : vector<32x128xf32>
    %c0_15 = arith.constant 0 : index
    %c0_16 = arith.constant 0 : index
    %30 = vector.load %arg4[%c0_15, %c0_16] : memref<1x128xf32, #tpu.memory_space<vmem>>, vector<1x128xf32>
    %31 = vector.broadcast %30 : vector<1x128xf32> to vector<32x128xf32>
    %32 = arith.addf %29, %31 : vector<32x128xf32>
    %cst_17 = arith.constant 0.000000e+00 : f32
    %33 = vector.broadcast %cst_17 : f32 to vector<32x128xf32>
    %34 = arith.cmpf ogt, %32, %33 : vector<32x128xf32>
    %cst_18 = arith.constant 3.000000e-01 : f32
    %35 = vector.broadcast %cst_18 : f32 to vector<32x128xf32>
    %36 = arith.mulf %35, %32 : vector<32x128xf32>
    %37 = arith.select %34, %32, %36 : vector<32x128xi1>, vector<32x128xf32>
    %c0_19 = arith.constant 0 : index
    %c0_20 = arith.constant 0 : index
    %38 = vector.load %arg12[%c0_19, %c0_20] : memref<32x128xf32, #tpu.memory_space<vmem>>, vector<32x128xf32>
    tpu.vector_store %arg12[%c0_19, %c0_20], %37 {strides = array<i32>} : memref<32x128xf32, #tpu.memory_space<vmem>>, vector<32x128xf32>,
    %c0_21 = arith.constant 0 : index
    %c0_22 = arith.constant 0 : index
    %39 = vector.load %arg12[%c0_21, %c0_22] : memref<32x128xf32, #tpu.memory_space<vmem>>, vector<2x128xf32>
    %c2 = arith.constant 2 : index
    %c0_23 = arith.constant 0 : index
    %40 = vector.load %arg12[%c2, %c0_23] : memref<32x128xf32, #tpu.memory_space<vmem>>, vector<2x128xf32>
    %c4 = arith.constant 4 : index
    %c0_24 = arith.constant 0 : index
    %41 = vector.load %arg12[%c4, %c0_24] : memref<32x128xf32, #tpu.memory_space<vmem>>, vector<2x128xf32>
    %c6 = arith.constant 6 : index
    %c0_25 = arith.constant 0 : index
    %42 = vector.load %arg12[%c6, %c0_25] : memref<32x128xf32, #tpu.memory_space<vmem>>, vector<2x128xf32>
    %c8 = arith.constant 8 : index
    %c0_26 = arith.constant 0 : index
    %43 = vector.load %arg12[%c8, %c0_26] : memref<32x128xf32, #tpu.memory_space<vmem>>, vector<2x128xf32>
    %c10 = arith.constant 10 : index
    %c0_27 = arith.constant 0 : index
    %44 = vector.load %arg12[%c10, %c0_27] : memref<32x128xf32, #tpu.memory_space<vmem>>, vector<2x128xf32>
    %c12 = arith.constant 12 : index
    %c0_28 = arith.constant 0 : index
    %45 = vector.load %arg12[%c12, %c0_28] : memref<32x128xf32, #tpu.memory_space<vmem>>, vector<2x128xf32>
    %c14 = arith.constant 14 : index
    %c0_29 = arith.constant 0 : index
    %46 = vector.load %arg12[%c14, %c0_29] : memref<32x128xf32, #tpu.memory_space<vmem>>, vector<2x128xf32>
    %c16 = arith.constant 16 : index
    %c0_30 = arith.constant 0 : index
    %47 = vector.load %arg12[%c16, %c0_30] : memref<32x128xf32, #tpu.memory_space<vmem>>, vector<2x128xf32>
    %c18 = arith.constant 18 : index
    %c0_31 = arith.constant 0 : index
    %48 = vector.load %arg12[%c18, %c0_31] : memref<32x128xf32, #tpu.memory_space<vmem>>, vector<2x128xf32>
    %c20 = arith.constant 20 : index
    %c0_32 = arith.constant 0 : index
    %49 = vector.load %arg12[%c20, %c0_32] : memref<32x128xf32, #tpu.memory_space<vmem>>, vector<2x128xf32>
    %c22 = arith.constant 22 : index
    %c0_33 = arith.constant 0 : index
    %50 = vector.load %arg12[%c22, %c0_33] : memref<32x128xf32, #tpu.memory_space<vmem>>, vector<2x128xf32>
    %c24 = arith.constant 24 : index
    %c0_34 = arith.constant 0 : index
    %51 = vector.load %arg12[%c24, %c0_34] : memref<32x128xf32, #tpu.memory_space<vmem>>, vector<2x128xf32>
    %c26 = arith.constant 26 : index
    %c0_35 = arith.constant 0 : index
    %52 = vector.load %arg12[%c26, %c0_35] : memref<32x128xf32, #tpu.memory_space<vmem>>, vector<2x128xf32>
    %c28 = arith.constant 28 : index
    %c0_36 = arith.constant 0 : index
    %53 = vector.load %arg12[%c28, %c0_36] : memref<32x128xf32, #tpu.memory_space<vmem>>, vector<2x128xf32>
    %c30 = arith.constant 30 : index
    %c0_37 = arith.constant 0 : index
    %54 = vector.load %arg12[%c30, %c0_37] : memref<32x128xf32, #tpu.memory_space<vmem>>, vector<2x128xf32>
    %55 = tpu.concatenate %39, %40, %41, %42, %43, %44, %45, %46, %47, %48, %49, %50, %51, %52, %53, %54 in 1 : vector<2x128xf32>, vector<2x128xf32>, vector<2x128xf32>, vector<2x128xf32>, vector<2x128xf32>, vector<2x128xf32>, vector<2x128xf32>, vector<2x128xf32>, vector<2x128xf32>, vector<2x128xf32>, vector<2x128xf32>, vector<2x128xf32>, vector<2x128xf32>, vector<2x128xf32>, vector<2x128xf32>, vector<2x128xf32> -> vector<2x2048xf32>
    tpu.wait_dma2 semaphore(%arg13 : memref<!tpu.dma_semaphore, #tpu.memory_space<semaphore_mem>>) src(%arg5 : memref<2048x512xbf16, #tpu.memory_space<any>>) dst(%arg11 : memref<2048x512xbf16, #tpu.memory_space<vmem>>)
    %56 = arith.truncf %55 : vector<2x2048xf32> to vector<2x2048xbf16>
    %c0_38 = arith.constant 0 : index
    %c0_39 = arith.constant 0 : index
    %57 = vector.load %arg11[%c0_38, %c0_39] : memref<2048x512xbf16, #tpu.memory_space<vmem>>, vector<2048x512xbf16>
    %cst_40 = arith.constant dense<0.000000e+00> : vector<2x512xf32>
    %58 = tpu.matmul %56, %57, %cst_40 {dimension_numbers = #tpu.dot_dimension_numbers<[1], [0], [0], [1], [0, 0, 1, 1], [], []>} : vector<2x2048xbf16>, vector<2048x512xbf16>, vector<2x512xf32> -> vector<2x512xf32>
    %cst_41 = arith.constant dense<0.000000e+00> : vector<512xf32>
    %59 = vector.multi_reduction <add>, %58, %cst_41 [0] : vector<2x512xf32> to vector<512xf32>
    %60 = vector.shape_cast %59 : vector<512xf32> to vector<1x512xf32>
    %cst_42 = arith.constant 2.000000e+00 : f32
    %61 = vector.broadcast %cst_42 : f32 to vector<1x512xf32>
    %62 = arith.divf %60, %61 : vector<1x512xf32>
    %63 = vector.broadcast %62 : vector<1x512xf32> to vector<2x512xf32>
    %64 = arith.subf %58, %63 : vector<2x512xf32>
    %65 = arith.mulf %64, %64 : vector<2x512xf32>
    %cst_43 = arith.constant dense<0.000000e+00> : vector<512xf32>
    %66 = vector.multi_reduction <add>, %65, %cst_43 [0] : vector<2x512xf32> to vector<512xf32>
    %67 = vector.shape_cast %66 : vector<512xf32> to vector<1x512xf32>
    %cst_44 = arith.constant 2.000000e+00 : f32
    %68 = vector.broadcast %cst_44 : f32 to vector<1x512xf32>
    %69 = arith.divf %67, %68 : vector<1x512xf32>
    %cst_45 = arith.constant 9.99999974E-6 : f32
    %70 = vector.broadcast %cst_45 : f32 to vector<1x512xf32>
    %71 = arith.addf %69, %70 : vector<1x512xf32>
    %72 = math.rsqrt %71 : vector<1x512xf32>
    %73 = vector.broadcast %72 : vector<1x512xf32> to vector<2x512xf32>
    %74 = arith.mulf %64, %73 : vector<2x512xf32>
    %c0_46 = arith.constant 0 : index
    %c0_47 = arith.constant 0 : index
    %75 = vector.load %arg6[%c0_46, %c0_47] : memref<1x512xf32, #tpu.memory_space<vmem>>, vector<1x512xf32>
    %76 = vector.broadcast %75 : vector<1x512xf32> to vector<2x512xf32>
    %77 = arith.mulf %74, %76 : vector<2x512xf32>
    %c0_48 = arith.constant 0 : index
    %c0_49 = arith.constant 0 : index
    %78 = vector.load %arg7[%c0_48, %c0_49] : memref<1x512xf32, #tpu.memory_space<vmem>>, vector<1x512xf32>
    %79 = vector.broadcast %78 : vector<1x512xf32> to vector<2x512xf32>
    %80 = arith.addf %77, %79 : vector<2x512xf32>
    %cst_50 = arith.constant 0.000000e+00 : f32
    %81 = vector.broadcast %cst_50 : f32 to vector<2x512xf32>
    %82 = arith.cmpf ogt, %80, %81 : vector<2x512xf32>
    %cst_51 = arith.constant 3.000000e-01 : f32
    %83 = vector.broadcast %cst_51 : f32 to vector<2x512xf32>
    %84 = arith.mulf %83, %80 : vector<2x512xf32>
    %85 = arith.select %82, %80, %84 : vector<2x512xi1>, vector<2x512xf32>
    %86 = arith.truncf %85 : vector<2x512xf32> to vector<2x512xbf16>
    %c0_52 = arith.constant 0 : index
    %c0_53 = arith.constant 0 : index
    %87 = vector.load %arg8[%c0_52, %c0_53] : memref<512x128xbf16, #tpu.memory_space<vmem>>, vector<512x128xbf16>
    %cst_54 = arith.constant dense<0.000000e+00> : vector<2x128xf32>
    %88 = tpu.matmul %86, %87, %cst_54 {dimension_numbers = #tpu.dot_dimension_numbers<[1], [0], [0], [1], [0, 0, 1, 1], [], []>} : vector<2x512xbf16>, vector<512x128xbf16>, vector<2x128xf32> -> vector<2x128xf32>
    %c0_55 = arith.constant 0 : index
    %c0_56 = arith.constant 0 : index
    %89 = vector.load %arg9[%c0_55, %c0_56] : memref<1x128xf32, #tpu.memory_space<vmem>>, vector<1x128xf32>
    %90 = vector.broadcast %89 : vector<1x128xf32> to vector<2x128xf32>
    %91 = arith.addf %88, %90 : vector<2x128xf32>
    %c0_57 = arith.constant 0 : index
    %c0_58 = arith.constant 0 : index
    %92 = vector.load %arg10[%c0_57, %c0_58] : memref<2x128xf32, #tpu.memory_space<vmem>>, vector<2x128xf32>
    tpu.vector_store %arg10[%c0_57, %c0_58], %91 {strides = array<i32>} : memref<2x128xf32, #tpu.memory_space<vmem>>, vector<2x128xf32>,
    return
  }
}

</mosaic_0001>

<bundles_post_ra>
// kernel: encoder_vae_forward.1
= control target key start
LH: loop header
LB: loop body
LE: loop exit
PB: predicated region body
PF: predicated region fallthrough
CT: control target
= control target key end

     0   :  { %15 = vsyncpa [#allocation6], 0  ;;  %s9426_s0 = inlined_call_operand.vmem [shape: bf16[32,272], index: 0, kind: input, shape index: {}]   ;;  %s9427_s1 = inlined_call_operand.hbm [shape: bf16[272,512], index: 1, kind: input, shape index: {}]   ;;  %s9428_s2 = inlined_call_operand.vmem [shape: bf16[512,128], index: 2, kind: input, shape index: {}]   ;;  %s9429_s3 = inlined_call_operand.vmem [shape: f32[1,128], index: 3, kind: input, shape index: {}]   ;;  %s9430_s4 = inlined_call_operand.hbm [shape: f32[1,128], index: 4, kind: input, shape index: {}]   ;;  %s9431_s5 = inlined_call_operand.vmem [shape: bf16[2048,512], index: 5, kind: input, shape index: {}]   ;;  %s9432_s6 = inlined_call_operand.vmem [shape: f32[1,512], index: 6, kind: input, shape index: {}]   ;;  %s9433_s7 = inlined_call_operand.hbm [shape: f32[1,512], index: 7, kind: input, shape index: {}]   ;;  %s9434_s8 = inlined_call_operand.hbm [shape: bf16[512,128], index: 8, kind: input, shape index: {}]   ;;  %s9435_s9 = inlined_call_operand.hbm [shape: f32[1,128], index: 9, kind: input, shape index: {}]   ;;  %s9436_s10 = inlined_call_operand.hbm [shape: f32[2,128], index: 10, kind: output, shape index: {}]  }
   0x1   :  { %16 = vsyncpa [#allocation9], 0 }
   0x2   :  { %17 = vsyncpa [#allocation12], 0 }
   0x3   :  { %18 = vsyncpa [#allocation7], 0  ;;  %s8010_s13 = smov [#allocation8]   ;;  %s8011_s15 = smov [#allocation11]  }
   0x4   :  { %s43_s14 = sshll.u32 %s8010_s13, 4  ;;  %s64_s16 = sshll.u32 %s8011_s15, 4  ;;  %s44_s14 = int_to_ptr.vmem [resolvable:$true] %s43_s14  ;;  %s8076_s16 = int_to_ptr.vmem [resolvable:$true] %s64_s16 }
   0x5   :  { %s7836_s19 = scalar_lea.hbm %s9430_s4, 16 }
   0x6   :  { %p7837_p0 = scmp.ne.s32.totalorder %s9430_s4, %s7836_s19  ;;  %p7840_p1 = scmp.lt.u32.totalorder %s7836_s19, %s9430_s4 }
   0x8   :  { %p7842_p2 = pnand %p7840_p1, %p7837_p0 }
   0xa   :  { %7845 = shalt.err (!%p7842_p2)
}
   0xb   :  { %s7846_s24 = scalar_lea.vmem %s44_s14, 16  ;;  %s7850_s25 = scalar_lea.vmem %s44_s14, 32 }
   0xc   :  { %p7847_p3 = scmp.ne.s32.totalorder %s44_s14, %s7846_s24  ;;  %p7851_p4 = scmp.lt.s32.totalorder %s44_s14, %s44_s14 }
   0xd   :  { %p7852_p5 = scmp.lt.s32.totalorder %s7850_s25, %s7846_s24 }
   0xf   :  { %p7853_p6 = por %p7852_p5, %p7851_p4 }
  0x11   :  { %p7854_p7 = pnand %p7853_p6, %p7847_p3 }
  0x13   :  { %7857 = shalt.err (!%p7854_p7)
}
  0x14   :  { %46 = dma.hbm_to_vmem [thread:$0]  %s9430_s4, 16, %s44_s14, [#allocation9]  }
  0x15   :  { %s7858_s30 = scalar_lea.hbm %s9434_s8, 4096 }
  0x16   :  { %p7859_p8 = scmp.ne.s32.totalorder %s9434_s8, %s7858_s30  ;;  %p7862_p9 = scmp.lt.u32.totalorder %s7858_s30, %s9434_s8 }
  0x18   :  { %p7864_p10 = pnand %p7862_p9, %p7859_p8 }
  0x1a   :  { %7867 = shalt.err (!%p7864_p10)
}
  0x1b   :  { %s7868_s17 = scalar_lea.vmem %s8076_s16, 4096  ;;  %p7873_p12 = scmp.lt.s32.totalorder %s8076_s16, %s8076_s16 }
  0x1c   :  { %p7869_p11 = scmp.ne.s32.totalorder %s8076_s16, %s7868_s17  ;;  %p7874_p13 = scmp.lt.s32.totalorder %s7868_s17, %s7868_s17 }
  0x1e   :  { %p7875_p0 = por %p7874_p13, %p7873_p12 }
  0x20   :  { %p7876_p1 = pnand %p7875_p0, %p7869_p11 }
  0x22   :  { %7879 = shalt.err (!%p7876_p1)
}
  0x23   :  { %s8012_s4 = smov 64   ;;  %s8013_s14 = smov 4  }
  0x24   :  { %70 = dma.hbm_to_vmem [thread:$0]  %s9434_s8, 4096, %s8076_s16, [#allocation12], %s8012_s4, %s8012_s4, %s8013_s14  }
  0x25   :  { %s8014_s20 = smov [#allocation5]   ;;  %s7880_s24 = scalar_lea.hbm %s9427_s1, 8704 }
  0x26   :  { %s26_s21 = sshll.u32 %s8014_s20, 4  ;;  %p7881_p2 = scmp.ne.s32.totalorder %s9427_s1, %s7880_s24  ;;  %s27_s21 = int_to_ptr.vmem [resolvable:$true] %s26_s21 }
  0x27   :  { %p7884_p3 = scmp.lt.u32.totalorder %s7880_s24, %s9427_s1 }
  0x29   :  { %p7886_p4 = pnand %p7884_p3, %p7881_p2 }
  0x2b   :  { %7889 = shalt.err (!%p7886_p4)
}
  0x2c   :  { %s7890_s29 = scalar_lea.vmem %s27_s21, 8704  ;;  %p7895_p6 = scmp.lt.s32.totalorder %s27_s21, %s27_s21 }
  0x2d   :  { %p7891_p5 = scmp.ne.s32.totalorder %s27_s21, %s7890_s29  ;;  %p7896_p7 = scmp.lt.s32.totalorder %s7890_s29, %s7890_s29 }
  0x2f   :  { %p7897_p8 = por %p7896_p7, %p7895_p6 }
  0x31   :  { %p7898_p9 = pnand %p7897_p8, %p7891_p5 }
  0x33   :  { %7901 = shalt.err (!%p7898_p9)
}
  0x34   :  { %s8015_s8 = smov 256   ;;  %s8016_s16 = smov 16  }
  0x35   :  { %32 = dma.hbm_to_vmem [thread:$0]  %s9427_s1, 8704, %s27_s21, [#allocation6], %s8015_s8, %s8015_s8, %s8016_s16  }
  0x36   :  { %s8017_s12 = smov [#allocation10]   ;;  %s8018_s15 = smov [#allocation13]  }
  0x37   :  { %s55_s13 = sshll.u32 %s8017_s12, 4  ;;  %s77_s17 = sshll.u32 %s8018_s15, 4  ;;  %s56_s13 = int_to_ptr.vmem [resolvable:$true] %s55_s13  ;;  %s78_s17 = int_to_ptr.vmem [resolvable:$true] %s77_s17 }
  0x38   :  { %s7902_s18 = scalar_lea.hbm %s9433_s7, 64 }
  0x39   :  { %p7903_p10 = scmp.ne.s32.totalorder %s9433_s7, %s7902_s18  ;;  %p7906_p11 = scmp.lt.u32.totalorder %s7902_s18, %s9433_s7 }
  0x3b   :  { %p7908_p12 = pnand %p7906_p11, %p7903_p10 }
  0x3d   :  { %7911 = shalt.err (!%p7908_p12)
}
  0x3e   :  { %s7912_s1 = scalar_lea.vmem %s56_s13, 64  ;;  %p7917_p0 = scmp.lt.s32.totalorder %s56_s13, %s56_s13 }
  0x3f   :  { %p7913_p13 = scmp.ne.s32.totalorder %s56_s13, %s7912_s1  ;;  %p7918_p1 = scmp.lt.s32.totalorder %s7912_s1, %s7912_s1 }
  0x41   :  { %p7919_p2 = por %p7918_p1, %p7917_p0 }
  0x43   :  { %p7920_p3 = pnand %p7919_p2, %p7913_p13 }
  0x45   :  { %7923 = shalt.err (!%p7920_p3)
}
  0x46   :  { %58 = dma.hbm_to_vmem [thread:$0]  %s9433_s7, 64, %s56_s13, [#allocation9]  }
  0x47   :  { %s7924_s27 = scalar_lea.hbm %s9435_s9, 16 }
  0x48   :  { %p7925_p4 = scmp.ne.s32.totalorder %s9435_s9, %s7924_s27  ;;  %p7928_p5 = scmp.lt.u32.totalorder %s7924_s27, %s9435_s9 }
  0x4a   :  { %p7930_p6 = pnand %p7928_p5, %p7925_p4 }
  0x4c   :  { %7933 = shalt.err (!%p7930_p6)
}
  0x4d   :  { %s7934_s30 = scalar_lea.vmem %s78_s17, 16  ;;  %s7938_s11 = scalar_lea.vmem %s78_s17, 32 }
  0x4e   :  { %p7935_p7 = scmp.ne.s32.totalorder %s78_s17, %s7934_s30  ;;  %p7939_p8 = scmp.lt.s32.totalorder %s78_s17, %s78_s17 }
  0x4f   :  { %p7940_p9 = scmp.lt.s32.totalorder %s7938_s11, %s7934_s30 }
  0x51   :  { %p7941_p10 = por %p7940_p9, %p7939_p8 }
  0x53   :  { %p7942_p11 = pnand %p7941_p10, %p7935_p7 }
  0x55   :  { %7945 = shalt.err (!%p7942_p11)
}
  0x56   :  { %80 = dma.hbm_to_vmem [thread:$0]  %s9435_s9, 16, %s78_s17, [#allocation12]  }
  0x57   :  { %7984 = dma.done.wait [#allocation6], 8704  }
  0x58   :  { %7985 = vsyncadd [#allocation6], 4294958592 }
  0x59   :  { %7986 = dma.done.wait [#allocation9], 80  }
  0x5a   :  { %7987 = vsyncadd [#allocation9], 4294967216 }
  0x5b   :  { %7988 = dma.done.wait [#allocation12], 4112  }
  0x5c   :  { %7989 = vsyncadd [#allocation12], 4294963184  ;;  %s8143_s13 = smov [#allocation2]   ;;  %s9437_s14 = smov %s9431_s5 }
  0x5d   :  { %s8150_s18 = smov 0   ;;  %s8152_s19 = smov 0  }
  0x5e LB: > { %v117_v0 = vld [vmem:[%s8000_s14] sm:$0xf]  ;;  %v119_v1 = vld [vmem:[%s8000_s14 + $0x4] sm:$0xf]  ;;  %v121_v2 = vld [vmem:[%s8000_s14 + $0x8] sm:$0xf]  ;;  %s8008_s19 = sphi %s8152_s19, %s113_s19   ;;  %s8004_s18 = sphi %s8150_s18, %s9438_s18   ;;  %s8000_s14 = sphi %s9437_s14, %s1146_s14   ;;  %s7996_s13 = sphi %s8143_s13, %s1147_s13  }
  0x5f   : > { %118 = vst [vmem:[%s7996_s13] sm:$0xf] %v117_v0  ;;  %120 = vst [vmem:[%s7996_s13 + $0x8] sm:$0xf] %v119_v1  ;;  %v123_v3 = vld [vmem:[%s8000_s14 + $0xc] sm:$0xf]  ;;  %s1141_s9 = sadd.s32 1, %s8004_s18 }
  0x60   : > { %122 = vst [vmem:[%s7996_s13 + $0x10] sm:$0xf] %v121_v2  ;;  %v125_v4 = vld [vmem:[%s8000_s14 + $0x20] sm:$0xf]  ;;  %v127_v5 = vld [vmem:[%s8000_s14 + $0x24] sm:$0xf] }
  0x61   : > { %124 = vst [vmem:[%s7996_s13 + $0x18] sm:$0xf] %v123_v3  ;;  %126 = vst [vmem:[%s7996_s13 + $0x20] sm:$0xf] %v125_v4  ;;  %v129_v6 = vld [vmem:[%s8000_s14 + $0x28] sm:$0xf] }
  0x62   : > { %128 = vst [vmem:[%s7996_s13 + $0x28] sm:$0xf] %v127_v5  ;;  %v131_v7 = vld [vmem:[%s8000_s14 + $0x2c] sm:$0xf]  ;;  %v133_v8 = vld [vmem:[%s8000_s14 + $0x40] sm:$0xf] }
  0x63   : > { %130 = vst [vmem:[%s7996_s13 + $0x30] sm:$0xf] %v129_v6  ;;  %132 = vst [vmem:[%s7996_s13 + $0x38] sm:$0xf] %v131_v7  ;;  %v135_v9 = vld [vmem:[%s8000_s14 + $0x44] sm:$0xf] }
  0x64   : > { %134 = vst [vmem:[%s7996_s13 + $0x40] sm:$0xf] %v133_v8  ;;  %v137_v10 = vld [vmem:[%s8000_s14 + $0x48] sm:$0xf]  ;;  %v139_v11 = vld [vmem:[%s8000_s14 + $0x4c] sm:$0xf] }
  0x65   : > { %136 = vst [vmem:[%s7996_s13 + $0x48] sm:$0xf] %v135_v9  ;;  %138 = vst [vmem:[%s7996_s13 + $0x50] sm:$0xf] %v137_v10  ;;  %v141_v12 = vld [vmem:[%s8000_s14 + $0x60] sm:$0xf] }
  0x66   : > { %140 = vst [vmem:[%s7996_s13 + $0x58] sm:$0xf] %v139_v11  ;;  %v143_v13 = vld [vmem:[%s8000_s14 + $0x64] sm:$0xf]  ;;  %v145_v14 = vld [vmem:[%s8000_s14 + $0x68] sm:$0xf] }
  0x67   : > { %142 = vst [vmem:[%s7996_s13 + $0x60] sm:$0xf] %v141_v12  ;;  %144 = vst [vmem:[%s7996_s13 + $0x68] sm:$0xf] %v143_v13  ;;  %v147_v15 = vld [vmem:[%s8000_s14 + $0x6c] sm:$0xf] }
  0x68   : > { %146 = vst [vmem:[%s7996_s13 + $0x70] sm:$0xf] %v145_v14  ;;  %v149_v16 = vld [vmem:[%s8000_s14 + $0x80] sm:$0xf]  ;;  %v151_v17 = vld [vmem:[%s8000_s14 + $0x84] sm:$0xf] }
  0x69   : > { %148 = vst [vmem:[%s7996_s13 + $0x78] sm:$0xf] %v147_v15  ;;  %150 = vst [vmem:[%s7996_s13 + $0x80] sm:$0xf] %v149_v16  ;;  %v153_v18 = vld [vmem:[%s8000_s14 + $0x88] sm:$0xf] }
  0x6a   : > { %152 = vst [vmem:[%s7996_s13 + $0x88] sm:$0xf] %v151_v17  ;;  %v155_v19 = vld [vmem:[%s8000_s14 + $0x8c] sm:$0xf]  ;;  %v157_v20 = vld [vmem:[%s8000_s14 + $0xa0] sm:$0xf] }
  0x6b   : > { %154 = vst [vmem:[%s7996_s13 + $0x90] sm:$0xf] %v153_v18  ;;  %156 = vst [vmem:[%s7996_s13 + $0x98] sm:$0xf] %v155_v19  ;;  %v159_v21 = vld [vmem:[%s8000_s14 + $0xa4] sm:$0xf] }
  0x6c   : > { %158 = vst [vmem:[%s7996_s13 + $0xa0] sm:$0xf] %v157_v20  ;;  %v161_v22 = vld [vmem:[%s8000_s14 + $0xa8] sm:$0xf]  ;;  %v163_v23 = vld [vmem:[%s8000_s14 + $0xac] sm:$0xf] }
  0x6d   : > { %160 = vst [vmem:[%s7996_s13 + $0xa8] sm:$0xf] %v159_v21  ;;  %162 = vst [vmem:[%s7996_s13 + $0xb0] sm:$0xf] %v161_v22  ;;  %v165_v24 = vld [vmem:[%s8000_s14 + $0xc0] sm:$0xf] }
  0x6e   : > { %164 = vst [vmem:[%s7996_s13 + $0xb8] sm:$0xf] %v163_v23  ;;  %v167_v25 = vld [vmem:[%s8000_s14 + $0xc4] sm:$0xf]  ;;  %v169_v26 = vld [vmem:[%s8000_s14 + $0xc8] sm:$0xf] }
  0x6f   : > { %166 = vst [vmem:[%s7996_s13 + $0xc0] sm:$0xf] %v165_v24  ;;  %168 = vst [vmem:[%s7996_s13 + $0xc8] sm:$0xf] %v167_v25  ;;  %v171_v27 = vld [vmem:[%s8000_s14 + $0xcc] sm:$0xf] }
  0x70   : > { %170 = vst [vmem:[%s7996_s13 + $0xd0] sm:$0xf] %v169_v26  ;;  %v173_v28 = vld [vmem:[%s8000_s14 + $0xe0] sm:$0xf]  ;;  %v175_v29 = vld [vmem:[%s8000_s14 + $0xe4] sm:$0xf] }
  0x71   : > { %172 = vst [vmem:[%s7996_s13 + $0xd8] sm:$0xf] %v171_v27  ;;  %174 = vst [vmem:[%s7996_s13 + $0xe0] sm:$0xf] %v173_v28  ;;  %v177_v30 = vld [vmem:[%s8000_s14 + $0xe8] sm:$0xf] }
  0x72   : > { %176 = vst [vmem:[%s7996_s13 + $0xe8] sm:$0xf] %v175_v29  ;;  %v179_v31 = vld [vmem:[%s8000_s14 + $0xec] sm:$0xf]  ;;  %v181_v32 = vld [vmem:[%s8000_s14 + $0x100] sm:$0xf] }
  0x73   : > { %178 = vst [vmem:[%s7996_s13 + $0xf0] sm:$0xf] %v177_v30  ;;  %180 = vst [vmem:[%s7996_s13 + $0xf8] sm:$0xf] %v179_v31  ;;  %v183_v33 = vld [vmem:[%s8000_s14 + $0x104] sm:$0xf] }
  0x74   : > { %182 = vst [vmem:[%s7996_s13 + $0x100] sm:$0xf] %v181_v32  ;;  %v185_v34 = vld [vmem:[%s8000_s14 + $0x108] sm:$0xf]  ;;  %v187_v35 = vld [vmem:[%s8000_s14 + $0x10c] sm:$0xf] }
  0x75   : > { %184 = vst [vmem:[%s7996_s13 + $0x108] sm:$0xf] %v183_v33  ;;  %186 = vst [vmem:[%s7996_s13 + $0x110] sm:$0xf] %v185_v34  ;;  %v189_v36 = vld [vmem:[%s8000_s14 + $0x120] sm:$0xf] }
  0x76   : > { %188 = vst [vmem:[%s7996_s13 + $0x118] sm:$0xf] %v187_v35  ;;  %v191_v37 = vld [vmem:[%s8000_s14 + $0x124] sm:$0xf]  ;;  %v193_v38 = vld [vmem:[%s8000_s14 + $0x128] sm:$0xf] }
  0x77   : > { %190 = vst [vmem:[%s7996_s13 + $0x120] sm:$0xf] %v189_v36  ;;  %192 = vst [vmem:[%s7996_s13 + $0x128] sm:$0xf] %v191_v37  ;;  %v195_v39 = vld [vmem:[%s8000_s14 + $0x12c] sm:$0xf] }
  0x78   : > { %194 = vst [vmem:[%s7996_s13 + $0x130] sm:$0xf] %v193_v38  ;;  %v197_v40 = vld [vmem:[%s8000_s14 + $0x140] sm:$0xf]  ;;  %v199_v41 = vld [vmem:[%s8000_s14 + $0x144] sm:$0xf] }
  0x79   : > { %196 = vst [vmem:[%s7996_s13 + $0x138] sm:$0xf] %v195_v39  ;;  %198 = vst [vmem:[%s7996_s13 + $0x140] sm:$0xf] %v197_v40  ;;  %v201_v42 = vld [vmem:[%s8000_s14 + $0x148] sm:$0xf] }
  0x7a   : > { %200 = vst [vmem:[%s7996_s13 + $0x148] sm:$0xf] %v199_v41  ;;  %v203_v43 = vld [vmem:[%s8000_s14 + $0x14c] sm:$0xf]  ;;  %v205_v44 = vld [vmem:[%s8000_s14 + $0x160] sm:$0xf] }
  0x7b   : > { %202 = vst [vmem:[%s7996_s13 + $0x150] sm:$0xf] %v201_v42  ;;  %204 = vst [vmem:[%s7996_s13 + $0x158] sm:$0xf] %v203_v43  ;;  %v207_v45 = vld [vmem:[%s8000_s14 + $0x164] sm:$0xf] }
  0x7c   : > { %206 = vst [vmem:[%s7996_s13 + $0x160] sm:$0xf] %v205_v44  ;;  %v209_v46 = vld [vmem:[%s8000_s14 + $0x168] sm:$0xf]  ;;  %v211_v47 = vld [vmem:[%s8000_s14 + $0x16c] sm:$0xf] }
  0x7d   : > { %208 = vst [vmem:[%s7996_s13 + $0x168] sm:$0xf] %v207_v45  ;;  %210 = vst [vmem:[%s7996_s13 + $0x170] sm:$0xf] %v209_v46  ;;  %v213_v48 = vld [vmem:[%s8000_s14 + $0x180] sm:$0xf] }
  0x7e   : > { %212 = vst [vmem:[%s7996_s13 + $0x178] sm:$0xf] %v211_v47  ;;  %v215_v49 = vld [vmem:[%s8000_s14 + $0x184] sm:$0xf]  ;;  %v217_v50 = vld [vmem:[%s8000_s14 + $0x188] sm:$0xf] }
  0x7f   : > { %214 = vst [vmem:[%s7996_s13 + $0x180] sm:$0xf] %v213_v48  ;;  %216 = vst [vmem:[%s7996_s13 + $0x188] sm:$0xf] %v215_v49  ;;  %v219_v51 = vld [vmem:[%s8000_s14 + $0x18c] sm:$0xf] }
  0x80   : > { %218 = vst [vmem:[%s7996_s13 + $0x190] sm:$0xf] %v217_v50  ;;  %v221_v52 = vld [vmem:[%s8000_s14 + $0x1a0] sm:$0xf]  ;;  %v223_v53 = vld [vmem:[%s8000_s14 + $0x1a4] sm:$0xf] }
  0x81   : > { %220 = vst [vmem:[%s7996_s13 + $0x198] sm:$0xf] %v219_v51  ;;  %222 = vst [vmem:[%s7996_s13 + $0x1a0] sm:$0xf] %v221_v52  ;;  %v225_v54 = vld [vmem:[%s8000_s14 + $0x1a8] sm:$0xf] }
  0x82   : > { %224 = vst [vmem:[%s7996_s13 + $0x1a8] sm:$0xf] %v223_v53  ;;  %v227_v55 = vld [vmem:[%s8000_s14 + $0x1ac] sm:$0xf]  ;;  %v229_v56 = vld [vmem:[%s8000_s14 + $0x1c0] sm:$0xf] }
  0x83   : > { %226 = vst [vmem:[%s7996_s13 + $0x1b0] sm:$0xf] %v225_v54  ;;  %228 = vst [vmem:[%s7996_s13 + $0x1b8] sm:$0xf] %v227_v55  ;;  %v231_v57 = vld [vmem:[%s8000_s14 + $0x1c4] sm:$0xf] }
  0x84   : > { %230 = vst [vmem:[%s7996_s13 + $0x1c0] sm:$0xf] %v229_v56  ;;  %v233_v58 = vld [vmem:[%s8000_s14 + $0x1c8] sm:$0xf]  ;;  %v235_v59 = vld [vmem:[%s8000_s14 + $0x1cc] sm:$0xf] }
  0x85   : > { %232 = vst [vmem:[%s7996_s13 + $0x1c8] sm:$0xf] %v231_v57  ;;  %234 = vst [vmem:[%s7996_s13 + $0x1d0] sm:$0xf] %v233_v58  ;;  %v237_v60 = vld [vmem:[%s8000_s14 + $0x1e0] sm:$0xf] }
  0x86   : > { %236 = vst [vmem:[%s7996_s13 + $0x1d8] sm:$0xf] %v235_v59  ;;  %v239_v61 = vld [vmem:[%s8000_s14 + $0x1e4] sm:$0xf]  ;;  %v241_v62 = vld [vmem:[%s8000_s14 + $0x1e8] sm:$0xf] }
  0x87   : > { %238 = vst [vmem:[%s7996_s13 + $0x1e0] sm:$0xf] %v237_v60  ;;  %240 = vst [vmem:[%s7996_s13 + $0x1e8] sm:$0xf] %v239_v61  ;;  %v243_v63 = vld [vmem:[%s8000_s14 + $0x1ec] sm:$0xf] }
  0x88   : > { %242 = vst [vmem:[%s7996_s13 + $0x1f0] sm:$0xf] %v241_v62  ;;  %v245_v0 = vld [vmem:[%s8000_s14 + $0x200] sm:$0xf]  ;;  %v247_v1 = vld [vmem:[%s8000_s14 + $0x204] sm:$0xf] }
  0x89   : > { %244 = vst [vmem:[%s7996_s13 + $0x1f8] sm:$0xf] %v243_v63  ;;  %246 = vst [vmem:[%s7996_s13 + $0x200] sm:$0xf] %v245_v0  ;;  %v249_v2 = vld [vmem:[%s8000_s14 + $0x208] sm:$0xf] }
  0x8a   : > { %248 = vst [vmem:[%s7996_s13 + $0x208] sm:$0xf] %v247_v1  ;;  %v251_v3 = vld [vmem:[%s8000_s14 + $0x20c] sm:$0xf]  ;;  %v253_v4 = vld [vmem:[%s8000_s14 + $0x220] sm:$0xf] }
  0x8b   : > { %250 = vst [vmem:[%s7996_s13 + $0x210] sm:$0xf] %v249_v2  ;;  %252 = vst [vmem:[%s7996_s13 + $0x218] sm:$0xf] %v251_v3  ;;  %v255_v5 = vld [vmem:[%s8000_s14 + $0x224] sm:$0xf] }
  0x8c   : > { %254 = vst [vmem:[%s7996_s13 + $0x220] sm:$0xf] %v253_v4  ;;  %v257_v6 = vld [vmem:[%s8000_s14 + $0x228] sm:$0xf]  ;;  %v259_v7 = vld [vmem:[%s8000_s14 + $0x22c] sm:$0xf] }
  0x8d   : > { %256 = vst [vmem:[%s7996_s13 + $0x228] sm:$0xf] %v255_v5  ;;  %258 = vst [vmem:[%s7996_s13 + $0x230] sm:$0xf] %v257_v6  ;;  %v261_v8 = vld [vmem:[%s8000_s14 + $0x240] sm:$0xf] }
  0x8e   : > { %260 = vst [vmem:[%s7996_s13 + $0x238] sm:$0xf] %v259_v7  ;;  %v263_v9 = vld [vmem:[%s8000_s14 + $0x244] sm:$0xf]  ;;  %v265_v10 = vld [vmem:[%s8000_s14 + $0x248] sm:$0xf] }
  0x8f   : > { %262 = vst [vmem:[%s7996_s13 + $0x240] sm:$0xf] %v261_v8  ;;  %264 = vst [vmem:[%s7996_s13 + $0x248] sm:$0xf] %v263_v9  ;;  %v267_v11 = vld [vmem:[%s8000_s14 + $0x24c] sm:$0xf] }
  0x90   : > { %266 = vst [vmem:[%s7996_s13 + $0x250] sm:$0xf] %v265_v10  ;;  %v269_v12 = vld [vmem:[%s8000_s14 + $0x260] sm:$0xf]  ;;  %v271_v13 = vld [vmem:[%s8000_s14 + $0x264] sm:$0xf] }
  0x91   : > { %268 = vst [vmem:[%s7996_s13 + $0x258] sm:$0xf] %v267_v11  ;;  %270 = vst [vmem:[%s7996_s13 + $0x260] sm:$0xf] %v269_v12  ;;  %v273_v14 = vld [vmem:[%s8000_s14 + $0x268] sm:$0xf] }
  0x92   : > { %272 = vst [vmem:[%s7996_s13 + $0x268] sm:$0xf] %v271_v13  ;;  %v275_v15 = vld [vmem:[%s8000_s14 + $0x26c] sm:$0xf]  ;;  %v277_v16 = vld [vmem:[%s8000_s14 + $0x280] sm:$0xf] }
  0x93   : > { %274 = vst [vmem:[%s7996_s13 + $0x270] sm:$0xf] %v273_v14  ;;  %276 = vst [vmem:[%s7996_s13 + $0x278] sm:$0xf] %v275_v15  ;;  %v279_v17 = vld [vmem:[%s8000_s14 + $0x284] sm:$0xf] }
  0x94   : > { %278 = vst [vmem:[%s7996_s13 + $0x280] sm:$0xf] %v277_v16  ;;  %v281_v18 = vld [vmem:[%s8000_s14 + $0x288] sm:$0xf]  ;;  %v283_v19 = vld [vmem:[%s8000_s14 + $0x28c] sm:$0xf] }
  0x95   : > { %280 = vst [vmem:[%s7996_s13 + $0x288] sm:$0xf] %v279_v17  ;;  %282 = vst [vmem:[%s7996_s13 + $0x290] sm:$0xf] %v281_v18  ;;  %v285_v20 = vld [vmem:[%s8000_s14 + $0x2a0] sm:$0xf] }
  0x96   : > { %284 = vst [vmem:[%s7996_s13 + $0x298] sm:$0xf] %v283_v19  ;;  %v287_v21 = vld [vmem:[%s8000_s14 + $0x2a4] sm:$0xf]  ;;  %v289_v22 = vld [vmem:[%s8000_s14 + $0x2a8] sm:$0xf] }
  0x97   : > { %286 = vst [vmem:[%s7996_s13 + $0x2a0] sm:$0xf] %v285_v20  ;;  %288 = vst [vmem:[%s7996_s13 + $0x2a8] sm:$0xf] %v287_v21  ;;  %v291_v23 = vld [vmem:[%s8000_s14 + $0x2ac] sm:$0xf] }
  0x98   : > { %290 = vst [vmem:[%s7996_s13 + $0x2b0] sm:$0xf] %v289_v22  ;;  %v293_v24 = vld [vmem:[%s8000_s14 + $0x2c0] sm:$0xf]  ;;  %v295_v25 = vld [vmem:[%s8000_s14 + $0x2c4] sm:$0xf] }
  0x99   : > { %292 = vst [vmem:[%s7996_s13 + $0x2b8] sm:$0xf] %v291_v23  ;;  %294 = vst [vmem:[%s7996_s13 + $0x2c0] sm:$0xf] %v293_v24  ;;  %v297_v26 = vld [vmem:[%s8000_s14 + $0x2c8] sm:$0xf] }
  0x9a   : > { %296 = vst [vmem:[%s7996_s13 + $0x2c8] sm:$0xf] %v295_v25  ;;  %v299_v27 = vld [vmem:[%s8000_s14 + $0x2cc] sm:$0xf]  ;;  %v301_v28 = vld [vmem:[%s8000_s14 + $0x2e0] sm:$0xf] }
  0x9b   : > { %298 = vst [vmem:[%s7996_s13 + $0x2d0] sm:$0xf] %v297_v26  ;;  %300 = vst [vmem:[%s7996_s13 + $0x2d8] sm:$0xf] %v299_v27  ;;  %v303_v29 = vld [vmem:[%s8000_s14 + $0x2e4] sm:$0xf] }
  0x9c   : > { %302 = vst [vmem:[%s7996_s13 + $0x2e0] sm:$0xf] %v301_v28  ;;  %v305_v30 = vld [vmem:[%s8000_s14 + $0x2e8] sm:$0xf]  ;;  %v307_v31 = vld [vmem:[%s8000_s14 + $0x2ec] sm:$0xf] }
  0x9d   : > { %304 = vst [vmem:[%s7996_s13 + $0x2e8] sm:$0xf] %v303_v29  ;;  %306 = vst [vmem:[%s7996_s13 + $0x2f0] sm:$0xf] %v305_v30  ;;  %v309_v32 = vld [vmem:[%s8000_s14 + $0x300] sm:$0xf] }
  0x9e   : > { %308 = vst [vmem:[%s7996_s13 + $0x2f8] sm:$0xf] %v307_v31  ;;  %v311_v33 = vld [vmem:[%s8000_s14 + $0x304] sm:$0xf]  ;;  %v313_v34 = vld [vmem:[%s8000_s14 + $0x308] sm:$0xf] }
  0x9f   : > { %310 = vst [vmem:[%s7996_s13 + $0x300] sm:$0xf] %v309_v32  ;;  %312 = vst [vmem:[%s7996_s13 + $0x308] sm:$0xf] %v311_v33  ;;  %v315_v35 = vld [vmem:[%s8000_s14 + $0x30c] sm:$0xf] }
  0xa0   : > { %314 = vst [vmem:[%s7996_s13 + $0x310] sm:$0xf] %v313_v34  ;;  %v317_v36 = vld [vmem:[%s8000_s14 + $0x320] sm:$0xf]  ;;  %v319_v37 = vld [vmem:[%s8000_s14 + $0x324] sm:$0xf] }
  0xa1   : > { %316 = vst [vmem:[%s7996_s13 + $0x318] sm:$0xf] %v315_v35  ;;  %318 = vst [vmem:[%s7996_s13 + $0x320] sm:$0xf] %v317_v36  ;;  %v321_v38 = vld [vmem:[%s8000_s14 + $0x328] sm:$0xf] }
  0xa2   : > { %320 = vst [vmem:[%s7996_s13 + $0x328] sm:$0xf] %v319_v37  ;;  %v323_v39 = vld [vmem:[%s8000_s14 + $0x32c] sm:$0xf]  ;;  %v325_v40 = vld [vmem:[%s8000_s14 + $0x340] sm:$0xf] }
  0xa3   : > { %322 = vst [vmem:[%s7996_s13 + $0x330] sm:$0xf] %v321_v38  ;;  %324 = vst [vmem:[%s7996_s13 + $0x338] sm:$0xf] %v323_v39  ;;  %v327_v41 = vld [vmem:[%s8000_s14 + $0x344] sm:$0xf] }
  0xa4   : > { %326 = vst [vmem:[%s7996_s13 + $0x340] sm:$0xf] %v325_v40  ;;  %v329_v42 = vld [vmem:[%s8000_s14 + $0x348] sm:$0xf]  ;;  %v331_v43 = vld [vmem:[%s8000_s14 + $0x34c] sm:$0xf] }
  0xa5   : > { %328 = vst [vmem:[%s7996_s13 + $0x348] sm:$0xf] %v327_v41  ;;  %330 = vst [vmem:[%s7996_s13 + $0x350] sm:$0xf] %v329_v42  ;;  %v333_v44 = vld [vmem:[%s8000_s14 + $0x360] sm:$0xf] }
  0xa6   : > { %332 = vst [vmem:[%s7996_s13 + $0x358] sm:$0xf] %v331_v43  ;;  %v335_v45 = vld [vmem:[%s8000_s14 + $0x364] sm:$0xf]  ;;  %v337_v46 = vld [vmem:[%s8000_s14 + $0x368] sm:$0xf] }
  0xa7   : > { %334 = vst [vmem:[%s7996_s13 + $0x360] sm:$0xf] %v333_v44  ;;  %336 = vst [vmem:[%s7996_s13 + $0x368] sm:$0xf] %v335_v45  ;;  %v339_v47 = vld [vmem:[%s8000_s14 + $0x36c] sm:$0xf] }
  0xa8   : > { %338 = vst [vmem:[%s7996_s13 + $0x370] sm:$0xf] %v337_v46  ;;  %v341_v48 = vld [vmem:[%s8000_s14 + $0x380] sm:$0xf]  ;;  %v343_v49 = vld [vmem:[%s8000_s14 + $0x384] sm:$0xf] }
  0xa9   : > { %340 = vst [vmem:[%s7996_s13 + $0x378] sm:$0xf] %v339_v47  ;;  %342 = vst [vmem:[%s7996_s13 + $0x380] sm:$0xf] %v341_v48  ;;  %v345_v50 = vld [vmem:[%s8000_s14 + $0x388] sm:$0xf] }
  0xaa   : > { %344 = vst [vmem:[%s7996_s13 + $0x388] sm:$0xf] %v343_v49  ;;  %v347_v51 = vld [vmem:[%s8000_s14 + $0x38c] sm:$0xf]  ;;  %v349_v52 = vld [vmem:[%s8000_s14 + $0x3a0] sm:$0xf] }
  0xab   : > { %346 = vst [vmem:[%s7996_s13 + $0x390] sm:$0xf] %v345_v50  ;;  %348 = vst [vmem:[%s7996_s13 + $0x398] sm:$0xf] %v347_v51  ;;  %v351_v53 = vld [vmem:[%s8000_s14 + $0x3a4] sm:$0xf] }
  0xac   : > { %350 = vst [vmem:[%s7996_s13 + $0x3a0] sm:$0xf] %v349_v52  ;;  %v353_v54 = vld [vmem:[%s8000_s14 + $0x3a8] sm:$0xf]  ;;  %v355_v55 = vld [vmem:[%s8000_s14 + $0x3ac] sm:$0xf] }
  0xad   : > { %352 = vst [vmem:[%s7996_s13 + $0x3a8] sm:$0xf] %v351_v53  ;;  %354 = vst [vmem:[%s7996_s13 + $0x3b0] sm:$0xf] %v353_v54  ;;  %v357_v56 = vld [vmem:[%s8000_s14 + $0x3c0] sm:$0xf] }
  0xae   : > { %356 = vst [vmem:[%s7996_s13 + $0x3b8] sm:$0xf] %v355_v55  ;;  %v359_v57 = vld [vmem:[%s8000_s14 + $0x3c4] sm:$0xf]  ;;  %v361_v58 = vld [vmem:[%s8000_s14 + $0x3c8] sm:$0xf] }
  0xaf   : > { %358 = vst [vmem:[%s7996_s13 + $0x3c0] sm:$0xf] %v357_v56  ;;  %360 = vst [vmem:[%s7996_s13 + $0x3c8] sm:$0xf] %v359_v57  ;;  %v363_v59 = vld [vmem:[%s8000_s14 + $0x3cc] sm:$0xf] }
  0xb0   : > { %362 = vst [vmem:[%s7996_s13 + $0x3d0] sm:$0xf] %v361_v58  ;;  %v365_v60 = vld [vmem:[%s8000_s14 + $0x3e0] sm:$0xf]  ;;  %v367_v61 = vld [vmem:[%s8000_s14 + $0x3e4] sm:$0xf] }
  0xb1   : > { %364 = vst [vmem:[%s7996_s13 + $0x3d8] sm:$0xf] %v363_v59  ;;  %366 = vst [vmem:[%s7996_s13 + $0x3e0] sm:$0xf] %v365_v60  ;;  %v369_v62 = vld [vmem:[%s8000_s14 + $0x3e8] sm:$0xf] }
  0xb2   : > { %368 = vst [vmem:[%s7996_s13 + $0x3e8] sm:$0xf] %v367_v61  ;;  %v371_v63 = vld [vmem:[%s8000_s14 + $0x3ec] sm:$0xf]  ;;  %v373_v0 = vld [vmem:[%s8000_s14 + $0x400] sm:$0xf] }
  0xb3   : > { %370 = vst [vmem:[%s7996_s13 + $0x3f0] sm:$0xf] %v369_v62  ;;  %372 = vst [vmem:[%s7996_s13 + $0x3f8] sm:$0xf] %v371_v63  ;;  %v375_v1 = vld [vmem:[%s8000_s14 + $0x404] sm:$0xf] }
  0xb4   : > { %374 = vst [vmem:[%s7996_s13 + $0x400] sm:$0xf] %v373_v0  ;;  %v377_v2 = vld [vmem:[%s8000_s14 + $0x408] sm:$0xf]  ;;  %v379_v3 = vld [vmem:[%s8000_s14 + $0x40c] sm:$0xf] }
  0xb5   : > { %376 = vst [vmem:[%s7996_s13 + $0x408] sm:$0xf] %v375_v1  ;;  %378 = vst [vmem:[%s7996_s13 + $0x410] sm:$0xf] %v377_v2  ;;  %v381_v4 = vld [vmem:[%s8000_s14 + $0x420] sm:$0xf] }
  0xb6   : > { %380 = vst [vmem:[%s7996_s13 + $0x418] sm:$0xf] %v379_v3  ;;  %v383_v5 = vld [vmem:[%s8000_s14 + $0x424] sm:$0xf]  ;;  %v385_v6 = vld [vmem:[%s8000_s14 + $0x428] sm:$0xf] }
  0xb7   : > { %382 = vst [vmem:[%s7996_s13 + $0x420] sm:$0xf] %v381_v4  ;;  %384 = vst [vmem:[%s7996_s13 + $0x428] sm:$0xf] %v383_v5  ;;  %v387_v7 = vld [vmem:[%s8000_s14 + $0x42c] sm:$0xf] }
  0xb8   : > { %386 = vst [vmem:[%s7996_s13 + $0x430] sm:$0xf] %v385_v6  ;;  %v389_v8 = vld [vmem:[%s8000_s14 + $0x440] sm:$0xf]  ;;  %v391_v9 = vld [vmem:[%s8000_s14 + $0x444] sm:$0xf] }
  0xb9   : > { %388 = vst [vmem:[%s7996_s13 + $0x438] sm:$0xf] %v387_v7  ;;  %390 = vst [vmem:[%s7996_s13 + $0x440] sm:$0xf] %v389_v8  ;;  %v393_v10 = vld [vmem:[%s8000_s14 + $0x448] sm:$0xf] }
  0xba   : > { %392 = vst [vmem:[%s7996_s13 + $0x448] sm:$0xf] %v391_v9  ;;  %v395_v11 = vld [vmem:[%s8000_s14 + $0x44c] sm:$0xf]  ;;  %v397_v12 = vld [vmem:[%s8000_s14 + $0x460] sm:$0xf] }
  0xbb   : > { %394 = vst [vmem:[%s7996_s13 + $0x450] sm:$0xf] %v393_v10  ;;  %396 = vst [vmem:[%s7996_s13 + $0x458] sm:$0xf] %v395_v11  ;;  %v399_v13 = vld [vmem:[%s8000_s14 + $0x464] sm:$0xf] }
  0xbc   : > { %398 = vst [vmem:[%s7996_s13 + $0x460] sm:$0xf] %v397_v12  ;;  %v401_v14 = vld [vmem:[%s8000_s14 + $0x468] sm:$0xf]  ;;  %v403_v15 = vld [vmem:[%s8000_s14 + $0x46c] sm:$0xf] }
  0xbd   : > { %400 = vst [vmem:[%s7996_s13 + $0x468] sm:$0xf] %v399_v13  ;;  %402 = vst [vmem:[%s7996_s13 + $0x470] sm:$0xf] %v401_v14  ;;  %v405_v16 = vld [vmem:[%s8000_s14 + $0x480] sm:$0xf] }
  0xbe   : > { %404 = vst [vmem:[%s7996_s13 + $0x478] sm:$0xf] %v403_v15  ;;  %v407_v17 = vld [vmem:[%s8000_s14 + $0x484] sm:$0xf]  ;;  %v409_v18 = vld [vmem:[%s8000_s14 + $0x488] sm:$0xf] }
  0xbf   : > { %406 = vst [vmem:[%s7996_s13 + $0x480] sm:$0xf] %v405_v16  ;;  %408 = vst [vmem:[%s7996_s13 + $0x488] sm:$0xf] %v407_v17  ;;  %v411_v19 = vld [vmem:[%s8000_s14 + $0x48c] sm:$0xf] }
  0xc0   : > { %410 = vst [vmem:[%s7996_s13 + $0x490] sm:$0xf] %v409_v18  ;;  %v413_v20 = vld [vmem:[%s8000_s14 + $0x4a0] sm:$0xf]  ;;  %v415_v21 = vld [vmem:[%s8000_s14 + $0x4a4] sm:$0xf] }
  0xc1   : > { %412 = vst [vmem:[%s7996_s13 + $0x498] sm:$0xf] %v411_v19  ;;  %414 = vst [vmem:[%s7996_s13 + $0x4a0] sm:$0xf] %v413_v20  ;;  %v417_v22 = vld [vmem:[%s8000_s14 + $0x4a8] sm:$0xf] }
  0xc2   : > { %416 = vst [vmem:[%s7996_s13 + $0x4a8] sm:$0xf] %v415_v21  ;;  %v419_v23 = vld [vmem:[%s8000_s14 + $0x4ac] sm:$0xf]  ;;  %v421_v24 = vld [vmem:[%s8000_s14 + $0x4c0] sm:$0xf] }
  0xc3   : > { %418 = vst [vmem:[%s7996_s13 + $0x4b0] sm:$0xf] %v417_v22  ;;  %420 = vst [vmem:[%s7996_s13 + $0x4b8] sm:$0xf] %v419_v23  ;;  %v423_v25 = vld [vmem:[%s8000_s14 + $0x4c4] sm:$0xf] }
  0xc4   : > { %422 = vst [vmem:[%s7996_s13 + $0x4c0] sm:$0xf] %v421_v24  ;;  %v425_v26 = vld [vmem:[%s8000_s14 + $0x4c8] sm:$0xf]  ;;  %v427_v27 = vld [vmem:[%s8000_s14 + $0x4cc] sm:$0xf] }
  0xc5   : > { %424 = vst [vmem:[%s7996_s13 + $0x4c8] sm:$0xf] %v423_v25  ;;  %426 = vst [vmem:[%s7996_s13 + $0x4d0] sm:$0xf] %v425_v26  ;;  %v429_v28 = vld [vmem:[%s8000_s14 + $0x4e0] sm:$0xf] }
  0xc6   : > { %428 = vst [vmem:[%s7996_s13 + $0x4d8] sm:$0xf] %v427_v27  ;;  %v431_v29 = vld [vmem:[%s8000_s14 + $0x4e4] sm:$0xf]  ;;  %v433_v30 = vld [vmem:[%s8000_s14 + $0x4e8] sm:$0xf] }
  0xc7   : > { %430 = vst [vmem:[%s7996_s13 + $0x4e0] sm:$0xf] %v429_v28  ;;  %432 = vst [vmem:[%s7996_s13 + $0x4e8] sm:$0xf] %v431_v29  ;;  %v435_v31 = vld [vmem:[%s8000_s14 + $0x4ec] sm:$0xf] }
  0xc8   : > { %434 = vst [vmem:[%s7996_s13 + $0x4f0] sm:$0xf] %v433_v30  ;;  %v437_v32 = vld [vmem:[%s8000_s14 + $0x500] sm:$0xf]  ;;  %v439_v33 = vld [vmem:[%s8000_s14 + $0x504] sm:$0xf] }
  0xc9   : > { %436 = vst [vmem:[%s7996_s13 + $0x4f8] sm:$0xf] %v435_v31  ;;  %438 = vst [vmem:[%s7996_s13 + $0x500] sm:$0xf] %v437_v32  ;;  %v441_v34 = vld [vmem:[%s8000_s14 + $0x508] sm:$0xf] }
  0xca   : > { %440 = vst [vmem:[%s7996_s13 + $0x508] sm:$0xf] %v439_v33  ;;  %v443_v35 = vld [vmem:[%s8000_s14 + $0x50c] sm:$0xf]  ;;  %v445_v36 = vld [vmem:[%s8000_s14 + $0x520] sm:$0xf] }
  0xcb   : > { %442 = vst [vmem:[%s7996_s13 + $0x510] sm:$0xf] %v441_v34  ;;  %444 = vst [vmem:[%s7996_s13 + $0x518] sm:$0xf] %v443_v35  ;;  %v447_v37 = vld [vmem:[%s8000_s14 + $0x524] sm:$0xf] }
  0xcc   : > { %446 = vst [vmem:[%s7996_s13 + $0x520] sm:$0xf] %v445_v36  ;;  %v449_v38 = vld [vmem:[%s8000_s14 + $0x528] sm:$0xf]  ;;  %v451_v39 = vld [vmem:[%s8000_s14 + $0x52c] sm:$0xf] }
  0xcd   : > { %448 = vst [vmem:[%s7996_s13 + $0x528] sm:$0xf] %v447_v37  ;;  %450 = vst [vmem:[%s7996_s13 + $0x530] sm:$0xf] %v449_v38  ;;  %v453_v40 = vld [vmem:[%s8000_s14 + $0x540] sm:$0xf] }
  0xce   : > { %452 = vst [vmem:[%s7996_s13 + $0x538] sm:$0xf] %v451_v39  ;;  %v455_v41 = vld [vmem:[%s8000_s14 + $0x544] sm:$0xf]  ;;  %v457_v42 = vld [vmem:[%s8000_s14 + $0x548] sm:$0xf] }
  0xcf   : > { %454 = vst [vmem:[%s7996_s13 + $0x540] sm:$0xf] %v453_v40  ;;  %456 = vst [vmem:[%s7996_s13 + $0x548] sm:$0xf] %v455_v41  ;;  %v459_v43 = vld [vmem:[%s8000_s14 + $0x54c] sm:$0xf] }
  0xd0   : > { %458 = vst [vmem:[%s7996_s13 + $0x550] sm:$0xf] %v457_v42  ;;  %v461_v44 = vld [vmem:[%s8000_s14 + $0x560] sm:$0xf]  ;;  %v463_v45 = vld [vmem:[%s8000_s14 + $0x564] sm:$0xf] }
  0xd1   : > { %460 = vst [vmem:[%s7996_s13 + $0x558] sm:$0xf] %v459_v43  ;;  %462 = vst [vmem:[%s7996_s13 + $0x560] sm:$0xf] %v461_v44  ;;  %v465_v46 = vld [vmem:[%s8000_s14 + $0x568] sm:$0xf] }
  0xd2   : > { %464 = vst [vmem:[%s7996_s13 + $0x568] sm:$0xf] %v463_v45  ;;  %v467_v47 = vld [vmem:[%s8000_s14 + $0x56c] sm:$0xf]  ;;  %v469_v48 = vld [vmem:[%s8000_s14 + $0x580] sm:$0xf] }
  0xd3   : > { %466 = vst [vmem:[%s7996_s13 + $0x570] sm:$0xf] %v465_v46  ;;  %468 = vst [vmem:[%s7996_s13 + $0x578] sm:$0xf] %v467_v47  ;;  %v471_v49 = vld [vmem:[%s8000_s14 + $0x584] sm:$0xf] }
  0xd4   : > { %470 = vst [vmem:[%s7996_s13 + $0x580] sm:$0xf] %v469_v48  ;;  %v473_v50 = vld [vmem:[%s8000_s14 + $0x588] sm:$0xf]  ;;  %v475_v51 = vld [vmem:[%s8000_s14 + $0x58c] sm:$0xf] }
  0xd5   : > { %472 = vst [vmem:[%s7996_s13 + $0x588] sm:$0xf] %v471_v49  ;;  %474 = vst [vmem:[%s7996_s13 + $0x590] sm:$0xf] %v473_v50  ;;  %v477_v52 = vld [vmem:[%s8000_s14 + $0x5a0] sm:$0xf] }
  0xd6   : > { %476 = vst [vmem:[%s7996_s13 + $0x598] sm:$0xf] %v475_v51  ;;  %v479_v53 = vld [vmem:[%s8000_s14 + $0x5a4] sm:$0xf]  ;;  %v481_v54 = vld [vmem:[%s8000_s14 + $0x5a8] sm:$0xf] }
  0xd7   : > { %478 = vst [vmem:[%s7996_s13 + $0x5a0] sm:$0xf] %v477_v52  ;;  %480 = vst [vmem:[%s7996_s13 + $0x5a8] sm:$0xf] %v479_v53  ;;  %v483_v55 = vld [vmem:[%s8000_s14 + $0x5ac] sm:$0xf] }
  0xd8   : > { %482 = vst [vmem:[%s7996_s13 + $0x5b0] sm:$0xf] %v481_v54  ;;  %v485_v56 = vld [vmem:[%s8000_s14 + $0x5c0] sm:$0xf]  ;;  %v487_v57 = vld [vmem:[%s8000_s14 + $0x5c4] sm:$0xf] }
  0xd9   : > { %484 = vst [vmem:[%s7996_s13 + $0x5b8] sm:$0xf] %v483_v55  ;;  %486 = vst [vmem:[%s7996_s13 + $0x5c0] sm:$0xf] %v485_v56  ;;  %v489_v58 = vld [vmem:[%s8000_s14 + $0x5c8] sm:$0xf] }
  0xda   : > { %488 = vst [vmem:[%s7996_s13 + $0x5c8] sm:$0xf] %v487_v57  ;;  %v491_v59 = vld [vmem:[%s8000_s14 + $0x5cc] sm:$0xf]  ;;  %v493_v60 = vld [vmem:[%s8000_s14 + $0x5e0] sm:$0xf] }
  0xdb   : > { %490 = vst [vmem:[%s7996_s13 + $0x5d0] sm:$0xf] %v489_v58  ;;  %492 = vst [vmem:[%s7996_s13 + $0x5d8] sm:$0xf] %v491_v59  ;;  %v495_v61 = vld [vmem:[%s8000_s14 + $0x5e4] sm:$0xf] }
  0xdc   : > { %494 = vst [vmem:[%s7996_s13 + $0x5e0] sm:$0xf] %v493_v60  ;;  %v497_v62 = vld [vmem:[%s8000_s14 + $0x5e8] sm:$0xf]  ;;  %v499_v63 = vld [vmem:[%s8000_s14 + $0x5ec] sm:$0xf] }
  0xdd   : > { %496 = vst [vmem:[%s7996_s13 + $0x5e8] sm:$0xf] %v495_v61  ;;  %498 = vst [vmem:[%s7996_s13 + $0x5f0] sm:$0xf] %v497_v62  ;;  %v501_v0 = vld [vmem:[%s8000_s14 + $0x600] sm:$0xf] }
  0xde   : > { %500 = vst [vmem:[%s7996_s13 + $0x5f8] sm:$0xf] %v499_v63  ;;  %v503_v1 = vld [vmem:[%s8000_s14 + $0x604] sm:$0xf]  ;;  %v505_v2 = vld [vmem:[%s8000_s14 + $0x608] sm:$0xf] }
  0xdf   : > { %502 = vst [vmem:[%s7996_s13 + $0x600] sm:$0xf] %v501_v0  ;;  %504 = vst [vmem:[%s7996_s13 + $0x608] sm:$0xf] %v503_v1  ;;  %v507_v3 = vld [vmem:[%s8000_s14 + $0x60c] sm:$0xf] }
  0xe0   : > { %506 = vst [vmem:[%s7996_s13 + $0x610] sm:$0xf] %v505_v2  ;;  %v509_v4 = vld [vmem:[%s8000_s14 + $0x620] sm:$0xf]  ;;  %v511_v5 = vld [vmem:[%s8000_s14 + $0x624] sm:$0xf] }
  0xe1   : > { %508 = vst [vmem:[%s7996_s13 + $0x618] sm:$0xf] %v507_v3  ;;  %510 = vst [vmem:[%s7996_s13 + $0x620] sm:$0xf] %v509_v4  ;;  %v513_v6 = vld [vmem:[%s8000_s14 + $0x628] sm:$0xf] }
  0xe2   : > { %512 = vst [vmem:[%s7996_s13 + $0x628] sm:$0xf] %v511_v5  ;;  %v515_v7 = vld [vmem:[%s8000_s14 + $0x62c] sm:$0xf]  ;;  %v517_v8 = vld [vmem:[%s8000_s14 + $0x640] sm:$0xf] }
  0xe3   : > { %514 = vst [vmem:[%s7996_s13 + $0x630] sm:$0xf] %v513_v6  ;;  %516 = vst [vmem:[%s7996_s13 + $0x638] sm:$0xf] %v515_v7  ;;  %v519_v9 = vld [vmem:[%s8000_s14 + $0x644] sm:$0xf] }
  0xe4   : > { %518 = vst [vmem:[%s7996_s13 + $0x640] sm:$0xf] %v517_v8  ;;  %v521_v10 = vld [vmem:[%s8000_s14 + $0x648] sm:$0xf]  ;;  %v523_v11 = vld [vmem:[%s8000_s14 + $0x64c] sm:$0xf] }
  0xe5   : > { %520 = vst [vmem:[%s7996_s13 + $0x648] sm:$0xf] %v519_v9  ;;  %522 = vst [vmem:[%s7996_s13 + $0x650] sm:$0xf] %v521_v10  ;;  %v525_v12 = vld [vmem:[%s8000_s14 + $0x660] sm:$0xf] }
  0xe6   : > { %524 = vst [vmem:[%s7996_s13 + $0x658] sm:$0xf] %v523_v11  ;;  %v527_v13 = vld [vmem:[%s8000_s14 + $0x664] sm:$0xf]  ;;  %v529_v14 = vld [vmem:[%s8000_s14 + $0x668] sm:$0xf] }
  0xe7   : > { %526 = vst [vmem:[%s7996_s13 + $0x660] sm:$0xf] %v525_v12  ;;  %528 = vst [vmem:[%s7996_s13 + $0x668] sm:$0xf] %v527_v13  ;;  %v531_v15 = vld [vmem:[%s8000_s14 + $0x66c] sm:$0xf] }
  0xe8   : > { %530 = vst [vmem:[%s7996_s13 + $0x670] sm:$0xf] %v529_v14  ;;  %v533_v16 = vld [vmem:[%s8000_s14 + $0x680] sm:$0xf]  ;;  %v535_v17 = vld [vmem:[%s8000_s14 + $0x684] sm:$0xf] }
  0xe9   : > { %532 = vst [vmem:[%s7996_s13 + $0x678] sm:$0xf] %v531_v15  ;;  %534 = vst [vmem:[%s7996_s13 + $0x680] sm:$0xf] %v533_v16  ;;  %v537_v18 = vld [vmem:[%s8000_s14 + $0x688] sm:$0xf] }
  0xea   : > { %536 = vst [vmem:[%s7996_s13 + $0x688] sm:$0xf] %v535_v17  ;;  %v539_v19 = vld [vmem:[%s8000_s14 + $0x68c] sm:$0xf]  ;;  %v541_v20 = vld [vmem:[%s8000_s14 + $0x6a0] sm:$0xf] }
  0xeb   : > { %538 = vst [vmem:[%s7996_s13 + $0x690] sm:$0xf] %v537_v18  ;;  %540 = vst [vmem:[%s7996_s13 + $0x698] sm:$0xf] %v539_v19  ;;  %v543_v21 = vld [vmem:[%s8000_s14 + $0x6a4] sm:$0xf] }
  0xec   : > { %542 = vst [vmem:[%s7996_s13 + $0x6a0] sm:$0xf] %v541_v20  ;;  %v545_v22 = vld [vmem:[%s8000_s14 + $0x6a8] sm:$0xf]  ;;  %v547_v23 = vld [vmem:[%s8000_s14 + $0x6ac] sm:$0xf] }
  0xed   : > { %544 = vst [vmem:[%s7996_s13 + $0x6a8] sm:$0xf] %v543_v21  ;;  %546 = vst [vmem:[%s7996_s13 + $0x6b0] sm:$0xf] %v545_v22  ;;  %v549_v24 = vld [vmem:[%s8000_s14 + $0x6c0] sm:$0xf] }
  0xee   : > { %548 = vst [vmem:[%s7996_s13 + $0x6b8] sm:$0xf] %v547_v23  ;;  %v551_v25 = vld [vmem:[%s8000_s14 + $0x6c4] sm:$0xf]  ;;  %v553_v26 = vld [vmem:[%s8000_s14 + $0x6c8] sm:$0xf] }
  0xef   : > { %550 = vst [vmem:[%s7996_s13 + $0x6c0] sm:$0xf] %v549_v24  ;;  %552 = vst [vmem:[%s7996_s13 + $0x6c8] sm:$0xf] %v551_v25  ;;  %v555_v27 = vld [vmem:[%s8000_s14 + $0x6cc] sm:$0xf] }
  0xf0   : > { %554 = vst [vmem:[%s7996_s13 + $0x6d0] sm:$0xf] %v553_v26  ;;  %v557_v28 = vld [vmem:[%s8000_s14 + $0x6e0] sm:$0xf]  ;;  %v559_v29 = vld [vmem:[%s8000_s14 + $0x6e4] sm:$0xf] }
  0xf1   : > { %556 = vst [vmem:[%s7996_s13 + $0x6d8] sm:$0xf] %v555_v27  ;;  %558 = vst [vmem:[%s7996_s13 + $0x6e0] sm:$0xf] %v557_v28  ;;  %v561_v30 = vld [vmem:[%s8000_s14 + $0x6e8] sm:$0xf] }
  0xf2   : > { %560 = vst [vmem:[%s7996_s13 + $0x6e8] sm:$0xf] %v559_v29  ;;  %v563_v31 = vld [vmem:[%s8000_s14 + $0x6ec] sm:$0xf]  ;;  %v565_v32 = vld [vmem:[%s8000_s14 + $0x700] sm:$0xf] }
  0xf3   : > { %562 = vst [vmem:[%s7996_s13 + $0x6f0] sm:$0xf] %v561_v30  ;;  %564 = vst [vmem:[%s7996_s13 + $0x6f8] sm:$0xf] %v563_v31  ;;  %v567_v33 = vld [vmem:[%s8000_s14 + $0x704] sm:$0xf] }
  0xf4   : > { %566 = vst [vmem:[%s7996_s13 + $0x700] sm:$0xf] %v565_v32  ;;  %v569_v34 = vld [vmem:[%s8000_s14 + $0x708] sm:$0xf]  ;;  %v571_v35 = vld [vmem:[%s8000_s14 + $0x70c] sm:$0xf] }
  0xf5   : > { %568 = vst [vmem:[%s7996_s13 + $0x708] sm:$0xf] %v567_v33  ;;  %570 = vst [vmem:[%s7996_s13 + $0x710] sm:$0xf] %v569_v34  ;;  %v573_v36 = vld [vmem:[%s8000_s14 + $0x720] sm:$0xf] }
  0xf6   : > { %572 = vst [vmem:[%s7996_s13 + $0x718] sm:$0xf] %v571_v35  ;;  %v575_v37 = vld [vmem:[%s8000_s14 + $0x724] sm:$0xf]  ;;  %v577_v38 = vld [vmem:[%s8000_s14 + $0x728] sm:$0xf] }
  0xf7   : > { %574 = vst [vmem:[%s7996_s13 + $0x720] sm:$0xf] %v573_v36  ;;  %576 = vst [vmem:[%s7996_s13 + $0x728] sm:$0xf] %v575_v37  ;;  %v579_v39 = vld [vmem:[%s8000_s14 + $0x72c] sm:$0xf] }
  0xf8   : > { %578 = vst [vmem:[%s7996_s13 + $0x730] sm:$0xf] %v577_v38  ;;  %v581_v40 = vld [vmem:[%s8000_s14 + $0x740] sm:$0xf]  ;;  %v583_v41 = vld [vmem:[%s8000_s14 + $0x744] sm:$0xf] }
  0xf9   : > { %580 = vst [vmem:[%s7996_s13 + $0x738] sm:$0xf] %v579_v39  ;;  %582 = vst [vmem:[%s7996_s13 + $0x740] sm:$0xf] %v581_v40  ;;  %v585_v42 = vld [vmem:[%s8000_s14 + $0x748] sm:$0xf] }
  0xfa   : > { %584 = vst [vmem:[%s7996_s13 + $0x748] sm:$0xf] %v583_v41  ;;  %v587_v43 = vld [vmem:[%s8000_s14 + $0x74c] sm:$0xf]  ;;  %v589_v44 = vld [vmem:[%s8000_s14 + $0x760] sm:$0xf] }
  0xfb   : > { %586 = vst [vmem:[%s7996_s13 + $0x750] sm:$0xf] %v585_v42  ;;  %588 = vst [vmem:[%s7996_s13 + $0x758] sm:$0xf] %v587_v43  ;;  %v591_v45 = vld [vmem:[%s8000_s14 + $0x764] sm:$0xf] }
  0xfc   : > { %590 = vst [vmem:[%s7996_s13 + $0x760] sm:$0xf] %v589_v44  ;;  %v593_v46 = vld [vmem:[%s8000_s14 + $0x768] sm:$0xf]  ;;  %v595_v47 = vld [vmem:[%s8000_s14 + $0x76c] sm:$0xf] }
  0xfd   : > { %592 = vst [vmem:[%s7996_s13 + $0x768] sm:$0xf] %v591_v45  ;;  %594 = vst [vmem:[%s7996_s13 + $0x770] sm:$0xf] %v593_v46  ;;  %v597_v48 = vld [vmem:[%s8000_s14 + $0x780] sm:$0xf] }
  0xfe   : > { %596 = vst [vmem:[%s7996_s13 + $0x778] sm:$0xf] %v595_v47  ;;  %v599_v49 = vld [vmem:[%s8000_s14 + $0x784] sm:$0xf]  ;;  %v601_v50 = vld [vmem:[%s8000_s14 + $0x788] sm:$0xf] }
  0xff   : > { %598 = vst [vmem:[%s7996_s13 + $0x780] sm:$0xf] %v597_v48  ;;  %600 = vst [vmem:[%s7996_s13 + $0x788] sm:$0xf] %v599_v49  ;;  %v603_v51 = vld [vmem:[%s8000_s14 + $0x78c] sm:$0xf] }
 0x100   : > { %602 = vst [vmem:[%s7996_s13 + $0x790] sm:$0xf] %v601_v50  ;;  %v605_v52 = vld [vmem:[%s8000_s14 + $0x7a0] sm:$0xf]  ;;  %v607_v53 = vld [vmem:[%s8000_s14 + $0x7a4] sm:$0xf] }
 0x101   : > { %604 = vst [vmem:[%s7996_s13 + $0x798] sm:$0xf] %v603_v51  ;;  %606 = vst [vmem:[%s7996_s13 + $0x7a0] sm:$0xf] %v605_v52  ;;  %v609_v54 = vld [vmem:[%s8000_s14 + $0x7a8] sm:$0xf] }
 0x102   : > { %608 = vst [vmem:[%s7996_s13 + $0x7a8] sm:$0xf] %v607_v53  ;;  %v611_v55 = vld [vmem:[%s8000_s14 + $0x7ac] sm:$0xf]  ;;  %v613_v56 = vld [vmem:[%s8000_s14 + $0x7c0] sm:$0xf] }
 0x103   : > { %610 = vst [vmem:[%s7996_s13 + $0x7b0] sm:$0xf] %v609_v54  ;;  %612 = vst [vmem:[%s7996_s13 + $0x7b8] sm:$0xf] %v611_v55  ;;  %v615_v57 = vld [vmem:[%s8000_s14 + $0x7c4] sm:$0xf] }
 0x104   : > { %614 = vst [vmem:[%s7996_s13 + $0x7c0] sm:$0xf] %v613_v56  ;;  %v617_v58 = vld [vmem:[%s8000_s14 + $0x7c8] sm:$0xf]  ;;  %v619_v59 = vld [vmem:[%s8000_s14 + $0x7cc] sm:$0xf] }
 0x105   : > { %616 = vst [vmem:[%s7996_s13 + $0x7c8] sm:$0xf] %v615_v57  ;;  %618 = vst [vmem:[%s7996_s13 + $0x7d0] sm:$0xf] %v617_v58  ;;  %v621_v60 = vld [vmem:[%s8000_s14 + $0x7e0] sm:$0xf] }
 0x106   : > { %620 = vst [vmem:[%s7996_s13 + $0x7d8] sm:$0xf] %v619_v59  ;;  %v623_v61 = vld [vmem:[%s8000_s14 + $0x7e4] sm:$0xf]  ;;  %v625_v62 = vld [vmem:[%s8000_s14 + $0x7e8] sm:$0xf] }
 0x107   : > { %622 = vst [vmem:[%s7996_s13 + $0x7e0] sm:$0xf] %v621_v60  ;;  %624 = vst [vmem:[%s7996_s13 + $0x7e8] sm:$0xf] %v623_v61  ;;  %v627_v63 = vld [vmem:[%s8000_s14 + $0x7ec] sm:$0xf] }
 0x108   : > { %626 = vst [vmem:[%s7996_s13 + $0x7f0] sm:$0xf] %v625_v62  ;;  %v629_v0 = vld [vmem:[%s8000_s14 + $0x800] sm:$0xf]  ;;  %v631_v1 = vld [vmem:[%s8000_s14 + $0x804] sm:$0xf] }
 0x109   : > { %628 = vst [vmem:[%s7996_s13 + $0x7f8] sm:$0xf] %v627_v63  ;;  %630 = vst [vmem:[%s7996_s13 + $0x800] sm:$0xf] %v629_v0  ;;  %v633_v2 = vld [vmem:[%s8000_s14 + $0x808] sm:$0xf] }
 0x10a   : > { %632 = vst [vmem:[%s7996_s13 + $0x808] sm:$0xf] %v631_v1  ;;  %v635_v3 = vld [vmem:[%s8000_s14 + $0x80c] sm:$0xf]  ;;  %v637_v4 = vld [vmem:[%s8000_s14 + $0x820] sm:$0xf] }
 0x10b   : > { %634 = vst [vmem:[%s7996_s13 + $0x810] sm:$0xf] %v633_v2  ;;  %636 = vst [vmem:[%s7996_s13 + $0x818] sm:$0xf] %v635_v3  ;;  %v639_v5 = vld [vmem:[%s8000_s14 + $0x824] sm:$0xf] }
 0x10c   : > { %638 = vst [vmem:[%s7996_s13 + $0x820] sm:$0xf] %v637_v4  ;;  %v641_v6 = vld [vmem:[%s8000_s14 + $0x828] sm:$0xf]  ;;  %v643_v7 = vld [vmem:[%s8000_s14 + $0x82c] sm:$0xf] }
 0x10d   : > { %640 = vst [vmem:[%s7996_s13 + $0x828] sm:$0xf] %v639_v5  ;;  %642 = vst [vmem:[%s7996_s13 + $0x830] sm:$0xf] %v641_v6  ;;  %v645_v8 = vld [vmem:[%s8000_s14 + $0x840] sm:$0xf] }
 0x10e   : > { %644 = vst [vmem:[%s7996_s13 + $0x838] sm:$0xf] %v643_v7  ;;  %v647_v9 = vld [vmem:[%s8000_s14 + $0x844] sm:$0xf]  ;;  %v649_v10 = vld [vmem:[%s8000_s14 + $0x848] sm:$0xf] }
 0x10f   : > { %646 = vst [vmem:[%s7996_s13 + $0x840] sm:$0xf] %v645_v8  ;;  %648 = vst [vmem:[%s7996_s13 + $0x848] sm:$0xf] %v647_v9  ;;  %v651_v11 = vld [vmem:[%s8000_s14 + $0x84c] sm:$0xf] }
 0x110   : > { %650 = vst [vmem:[%s7996_s13 + $0x850] sm:$0xf] %v649_v10  ;;  %v653_v12 = vld [vmem:[%s8000_s14 + $0x860] sm:$0xf]  ;;  %v655_v13 = vld [vmem:[%s8000_s14 + $0x864] sm:$0xf] }
 0x111   : > { %652 = vst [vmem:[%s7996_s13 + $0x858] sm:$0xf] %v651_v11  ;;  %654 = vst [vmem:[%s7996_s13 + $0x860] sm:$0xf] %v653_v12  ;;  %v657_v14 = vld [vmem:[%s8000_s14 + $0x868] sm:$0xf] }
 0x112   : > { %656 = vst [vmem:[%s7996_s13 + $0x868] sm:$0xf] %v655_v13  ;;  %v659_v15 = vld [vmem:[%s8000_s14 + $0x86c] sm:$0xf]  ;;  %v661_v16 = vld [vmem:[%s8000_s14 + $0x880] sm:$0xf] }
 0x113   : > { %658 = vst [vmem:[%s7996_s13 + $0x870] sm:$0xf] %v657_v14  ;;  %660 = vst [vmem:[%s7996_s13 + $0x878] sm:$0xf] %v659_v15  ;;  %v663_v17 = vld [vmem:[%s8000_s14 + $0x884] sm:$0xf] }
 0x114   : > { %662 = vst [vmem:[%s7996_s13 + $0x880] sm:$0xf] %v661_v16  ;;  %v665_v18 = vld [vmem:[%s8000_s14 + $0x888] sm:$0xf]  ;;  %v667_v19 = vld [vmem:[%s8000_s14 + $0x88c] sm:$0xf] }
 0x115   : > { %664 = vst [vmem:[%s7996_s13 + $0x888] sm:$0xf] %v663_v17  ;;  %666 = vst [vmem:[%s7996_s13 + $0x890] sm:$0xf] %v665_v18  ;;  %v669_v20 = vld [vmem:[%s8000_s14 + $0x8a0] sm:$0xf] }
 0x116   : > { %668 = vst [vmem:[%s7996_s13 + $0x898] sm:$0xf] %v667_v19  ;;  %v671_v21 = vld [vmem:[%s8000_s14 + $0x8a4] sm:$0xf]  ;;  %v673_v22 = vld [vmem:[%s8000_s14 + $0x8a8] sm:$0xf] }
 0x117   : > { %670 = vst [vmem:[%s7996_s13 + $0x8a0] sm:$0xf] %v669_v20  ;;  %672 = vst [vmem:[%s7996_s13 + $0x8a8] sm:$0xf] %v671_v21  ;;  %v675_v23 = vld [vmem:[%s8000_s14 + $0x8ac] sm:$0xf] }
 0x118   : > { %674 = vst [vmem:[%s7996_s13 + $0x8b0] sm:$0xf] %v673_v22  ;;  %v677_v24 = vld [vmem:[%s8000_s14 + $0x8c0] sm:$0xf]  ;;  %v679_v25 = vld [vmem:[%s8000_s14 + $0x8c4] sm:$0xf] }
 0x119   : > { %676 = vst [vmem:[%s7996_s13 + $0x8b8] sm:$0xf] %v675_v23  ;;  %678 = vst [vmem:[%s7996_s13 + $0x8c0] sm:$0xf] %v677_v24  ;;  %v681_v26 = vld [vmem:[%s8000_s14 + $0x8c8] sm:$0xf] }
 0x11a   : > { %680 = vst [vmem:[%s7996_s13 + $0x8c8] sm:$0xf] %v679_v25  ;;  %v683_v27 = vld [vmem:[%s8000_s14 + $0x8cc] sm:$0xf]  ;;  %v685_v28 = vld [vmem:[%s8000_s14 + $0x8e0] sm:$0xf] }
 0x11b   : > { %682 = vst [vmem:[%s7996_s13 + $0x8d0] sm:$0xf] %v681_v26  ;;  %684 = vst [vmem:[%s7996_s13 + $0x8d8] sm:$0xf] %v683_v27  ;;  %v687_v29 = vld [vmem:[%s8000_s14 + $0x8e4] sm:$0xf] }
 0x11c   : > { %686 = vst [vmem:[%s7996_s13 + $0x8e0] sm:$0xf] %v685_v28  ;;  %v689_v30 = vld [vmem:[%s8000_s14 + $0x8e8] sm:$0xf]  ;;  %v691_v31 = vld [vmem:[%s8000_s14 + $0x8ec] sm:$0xf] }
 0x11d   : > { %688 = vst [vmem:[%s7996_s13 + $0x8e8] sm:$0xf] %v687_v29  ;;  %690 = vst [vmem:[%s7996_s13 + $0x8f0] sm:$0xf] %v689_v30  ;;  %v693_v32 = vld [vmem:[%s8000_s14 + $0x900] sm:$0xf] }
 0x11e   : > { %692 = vst [vmem:[%s7996_s13 + $0x8f8] sm:$0xf] %v691_v31  ;;  %v695_v33 = vld [vmem:[%s8000_s14 + $0x904] sm:$0xf]  ;;  %v697_v34 = vld [vmem:[%s8000_s14 + $0x908] sm:$0xf] }
 0x11f   : > { %694 = vst [vmem:[%s7996_s13 + $0x900] sm:$0xf] %v693_v32  ;;  %696 = vst [vmem:[%s7996_s13 + $0x908] sm:$0xf] %v695_v33  ;;  %v699_v35 = vld [vmem:[%s8000_s14 + $0x90c] sm:$0xf] }
 0x120   : > { %698 = vst [vmem:[%s7996_s13 + $0x910] sm:$0xf] %v697_v34  ;;  %v701_v36 = vld [vmem:[%s8000_s14 + $0x920] sm:$0xf]  ;;  %v703_v37 = vld [vmem:[%s8000_s14 + $0x924] sm:$0xf] }
 0x121   : > { %700 = vst [vmem:[%s7996_s13 + $0x918] sm:$0xf] %v699_v35  ;;  %702 = vst [vmem:[%s7996_s13 + $0x920] sm:$0xf] %v701_v36  ;;  %v705_v38 = vld [vmem:[%s8000_s14 + $0x928] sm:$0xf] }
 0x122   : > { %704 = vst [vmem:[%s7996_s13 + $0x928] sm:$0xf] %v703_v37  ;;  %v707_v39 = vld [vmem:[%s8000_s14 + $0x92c] sm:$0xf]  ;;  %v709_v40 = vld [vmem:[%s8000_s14 + $0x940] sm:$0xf] }
 0x123   : > { %706 = vst [vmem:[%s7996_s13 + $0x930] sm:$0xf] %v705_v38  ;;  %708 = vst [vmem:[%s7996_s13 + $0x938] sm:$0xf] %v707_v39  ;;  %v711_v41 = vld [vmem:[%s8000_s14 + $0x944] sm:$0xf] }
 0x124   : > { %710 = vst [vmem:[%s7996_s13 + $0x940] sm:$0xf] %v709_v40  ;;  %v713_v42 = vld [vmem:[%s8000_s14 + $0x948] sm:$0xf]  ;;  %v715_v43 = vld [vmem:[%s8000_s14 + $0x94c] sm:$0xf] }
 0x125   : > { %712 = vst [vmem:[%s7996_s13 + $0x948] sm:$0xf] %v711_v41  ;;  %714 = vst [vmem:[%s7996_s13 + $0x950] sm:$0xf] %v713_v42  ;;  %v717_v44 = vld [vmem:[%s8000_s14 + $0x960] sm:$0xf] }
 0x126   : > { %716 = vst [vmem:[%s7996_s13 + $0x958] sm:$0xf] %v715_v43  ;;  %v719_v45 = vld [vmem:[%s8000_s14 + $0x964] sm:$0xf]  ;;  %v721_v46 = vld [vmem:[%s8000_s14 + $0x968] sm:$0xf] }
 0x127   : > { %718 = vst [vmem:[%s7996_s13 + $0x960] sm:$0xf] %v717_v44  ;;  %720 = vst [vmem:[%s7996_s13 + $0x968] sm:$0xf] %v719_v45  ;;  %v723_v47 = vld [vmem:[%s8000_s14 + $0x96c] sm:$0xf] }
 0x128   : > { %722 = vst [vmem:[%s7996_s13 + $0x970] sm:$0xf] %v721_v46  ;;  %v725_v48 = vld [vmem:[%s8000_s14 + $0x980] sm:$0xf]  ;;  %v727_v49 = vld [vmem:[%s8000_s14 + $0x984] sm:$0xf] }
 0x129   : > { %724 = vst [vmem:[%s7996_s13 + $0x978] sm:$0xf] %v723_v47  ;;  %726 = vst [vmem:[%s7996_s13 + $0x980] sm:$0xf] %v725_v48  ;;  %v729_v50 = vld [vmem:[%s8000_s14 + $0x988] sm:$0xf] }
 0x12a   : > { %728 = vst [vmem:[%s7996_s13 + $0x988] sm:$0xf] %v727_v49  ;;  %v731_v51 = vld [vmem:[%s8000_s14 + $0x98c] sm:$0xf]  ;;  %v733_v52 = vld [vmem:[%s8000_s14 + $0x9a0] sm:$0xf] }
 0x12b   : > { %730 = vst [vmem:[%s7996_s13 + $0x990] sm:$0xf] %v729_v50  ;;  %732 = vst [vmem:[%s7996_s13 + $0x998] sm:$0xf] %v731_v51  ;;  %v735_v53 = vld [vmem:[%s8000_s14 + $0x9a4] sm:$0xf] }
 0x12c   : > { %734 = vst [vmem:[%s7996_s13 + $0x9a0] sm:$0xf] %v733_v52  ;;  %v737_v54 = vld [vmem:[%s8000_s14 + $0x9a8] sm:$0xf]  ;;  %v739_v55 = vld [vmem:[%s8000_s14 + $0x9ac] sm:$0xf] }
 0x12d   : > { %736 = vst [vmem:[%s7996_s13 + $0x9a8] sm:$0xf] %v735_v53  ;;  %738 = vst [vmem:[%s7996_s13 + $0x9b0] sm:$0xf] %v737_v54  ;;  %v741_v56 = vld [vmem:[%s8000_s14 + $0x9c0] sm:$0xf] }
 0x12e   : > { %740 = vst [vmem:[%s7996_s13 + $0x9b8] sm:$0xf] %v739_v55  ;;  %v743_v57 = vld [vmem:[%s8000_s14 + $0x9c4] sm:$0xf]  ;;  %v745_v58 = vld [vmem:[%s8000_s14 + $0x9c8] sm:$0xf] }
 0x12f   : > { %742 = vst [vmem:[%s7996_s13 + $0x9c0] sm:$0xf] %v741_v56  ;;  %744 = vst [vmem:[%s7996_s13 + $0x9c8] sm:$0xf] %v743_v57  ;;  %v747_v59 = vld [vmem:[%s8000_s14 + $0x9cc] sm:$0xf] }
 0x130   : > { %746 = vst [vmem:[%s7996_s13 + $0x9d0] sm:$0xf] %v745_v58  ;;  %v749_v60 = vld [vmem:[%s8000_s14 + $0x9e0] sm:$0xf]  ;;  %v751_v61 = vld [vmem:[%s8000_s14 + $0x9e4] sm:$0xf] }
 0x131   : > { %748 = vst [vmem:[%s7996_s13 + $0x9d8] sm:$0xf] %v747_v59  ;;  %750 = vst [vmem:[%s7996_s13 + $0x9e0] sm:$0xf] %v749_v60  ;;  %v753_v62 = vld [vmem:[%s8000_s14 + $0x9e8] sm:$0xf] }
 0x132   : > { %752 = vst [vmem:[%s7996_s13 + $0x9e8] sm:$0xf] %v751_v61  ;;  %v755_v63 = vld [vmem:[%s8000_s14 + $0x9ec] sm:$0xf]  ;;  %v757_v0 = vld [vmem:[%s8000_s14 + $0xa00] sm:$0xf] }
 0x133   : > { %754 = vst [vmem:[%s7996_s13 + $0x9f0] sm:$0xf] %v753_v62  ;;  %756 = vst [vmem:[%s7996_s13 + $0x9f8] sm:$0xf] %v755_v63  ;;  %v759_v1 = vld [vmem:[%s8000_s14 + $0xa04] sm:$0xf] }
 0x134   : > { %758 = vst [vmem:[%s7996_s13 + $0xa00] sm:$0xf] %v757_v0  ;;  %v761_v2 = vld [vmem:[%s8000_s14 + $0xa08] sm:$0xf]  ;;  %v763_v3 = vld [vmem:[%s8000_s14 + $0xa0c] sm:$0xf] }
 0x135   : > { %760 = vst [vmem:[%s7996_s13 + $0xa08] sm:$0xf] %v759_v1  ;;  %762 = vst [vmem:[%s7996_s13 + $0xa10] sm:$0xf] %v761_v2  ;;  %v765_v4 = vld [vmem:[%s8000_s14 + $0xa20] sm:$0xf] }
 0x136   : > { %764 = vst [vmem:[%s7996_s13 + $0xa18] sm:$0xf] %v763_v3  ;;  %v767_v5 = vld [vmem:[%s8000_s14 + $0xa24] sm:$0xf]  ;;  %v769_v6 = vld [vmem:[%s8000_s14 + $0xa28] sm:$0xf] }
 0x137   : > { %766 = vst [vmem:[%s7996_s13 + $0xa20] sm:$0xf] %v765_v4  ;;  %768 = vst [vmem:[%s7996_s13 + $0xa28] sm:$0xf] %v767_v5  ;;  %v771_v7 = vld [vmem:[%s8000_s14 + $0xa2c] sm:$0xf] }
 0x138   : > { %770 = vst [vmem:[%s7996_s13 + $0xa30] sm:$0xf] %v769_v6  ;;  %v773_v8 = vld [vmem:[%s8000_s14 + $0xa40] sm:$0xf]  ;;  %v775_v9 = vld [vmem:[%s8000_s14 + $0xa44] sm:$0xf] }
 0x139   : > { %772 = vst [vmem:[%s7996_s13 + $0xa38] sm:$0xf] %v771_v7  ;;  %774 = vst [vmem:[%s7996_s13 + $0xa40] sm:$0xf] %v773_v8  ;;  %v777_v10 = vld [vmem:[%s8000_s14 + $0xa48] sm:$0xf] }
 0x13a   : > { %776 = vst [vmem:[%s7996_s13 + $0xa48] sm:$0xf] %v775_v9  ;;  %v779_v11 = vld [vmem:[%s8000_s14 + $0xa4c] sm:$0xf]  ;;  %v781_v12 = vld [vmem:[%s8000_s14 + $0xa60] sm:$0xf] }
 0x13b   : > { %778 = vst [vmem:[%s7996_s13 + $0xa50] sm:$0xf] %v777_v10  ;;  %780 = vst [vmem:[%s7996_s13 + $0xa58] sm:$0xf] %v779_v11  ;;  %v783_v13 = vld [vmem:[%s8000_s14 + $0xa64] sm:$0xf] }
 0x13c   : > { %782 = vst [vmem:[%s7996_s13 + $0xa60] sm:$0xf] %v781_v12  ;;  %v785_v14 = vld [vmem:[%s8000_s14 + $0xa68] sm:$0xf]  ;;  %v787_v15 = vld [vmem:[%s8000_s14 + $0xa6c] sm:$0xf] }
 0x13d   : > { %784 = vst [vmem:[%s7996_s13 + $0xa68] sm:$0xf] %v783_v13  ;;  %786 = vst [vmem:[%s7996_s13 + $0xa70] sm:$0xf] %v785_v14  ;;  %v789_v16 = vld [vmem:[%s8000_s14 + $0xa80] sm:$0xf] }
 0x13e   : > { %788 = vst [vmem:[%s7996_s13 + $0xa78] sm:$0xf] %v787_v15  ;;  %v791_v17 = vld [vmem:[%s8000_s14 + $0xa84] sm:$0xf]  ;;  %v793_v18 = vld [vmem:[%s8000_s14 + $0xa88] sm:$0xf] }
 0x13f   : > { %790 = vst [vmem:[%s7996_s13 + $0xa80] sm:$0xf] %v789_v16  ;;  %792 = vst [vmem:[%s7996_s13 + $0xa88] sm:$0xf] %v791_v17  ;;  %v795_v19 = vld [vmem:[%s8000_s14 + $0xa8c] sm:$0xf] }
 0x140   : > { %794 = vst [vmem:[%s7996_s13 + $0xa90] sm:$0xf] %v793_v18  ;;  %v797_v20 = vld [vmem:[%s8000_s14 + $0xaa0] sm:$0xf]  ;;  %v799_v21 = vld [vmem:[%s8000_s14 + $0xaa4] sm:$0xf] }
 0x141   : > { %796 = vst [vmem:[%s7996_s13 + $0xa98] sm:$0xf] %v795_v19  ;;  %798 = vst [vmem:[%s7996_s13 + $0xaa0] sm:$0xf] %v797_v20  ;;  %v801_v22 = vld [vmem:[%s8000_s14 + $0xaa8] sm:$0xf] }
 0x142   : > { %800 = vst [vmem:[%s7996_s13 + $0xaa8] sm:$0xf] %v799_v21  ;;  %v803_v23 = vld [vmem:[%s8000_s14 + $0xaac] sm:$0xf]  ;;  %v805_v24 = vld [vmem:[%s8000_s14 + $0xac0] sm:$0xf] }
 0x143   : > { %802 = vst [vmem:[%s7996_s13 + $0xab0] sm:$0xf] %v801_v22  ;;  %804 = vst [vmem:[%s7996_s13 + $0xab8] sm:$0xf] %v803_v23  ;;  %v807_v25 = vld [vmem:[%s8000_s14 + $0xac4] sm:$0xf] }
 0x144   : > { %806 = vst [vmem:[%s7996_s13 + $0xac0] sm:$0xf] %v805_v24  ;;  %v809_v26 = vld [vmem:[%s8000_s14 + $0xac8] sm:$0xf]  ;;  %v811_v27 = vld [vmem:[%s8000_s14 + $0xacc] sm:$0xf] }
 0x145   : > { %808 = vst [vmem:[%s7996_s13 + $0xac8] sm:$0xf] %v807_v25  ;;  %810 = vst [vmem:[%s7996_s13 + $0xad0] sm:$0xf] %v809_v26  ;;  %v813_v28 = vld [vmem:[%s8000_s14 + $0xae0] sm:$0xf] }
 0x146   : > { %812 = vst [vmem:[%s7996_s13 + $0xad8] sm:$0xf] %v811_v27  ;;  %v815_v29 = vld [vmem:[%s8000_s14 + $0xae4] sm:$0xf]  ;;  %v817_v30 = vld [vmem:[%s8000_s14 + $0xae8] sm:$0xf] }
 0x147   : > { %814 = vst [vmem:[%s7996_s13 + $0xae0] sm:$0xf] %v813_v28  ;;  %816 = vst [vmem:[%s7996_s13 + $0xae8] sm:$0xf] %v815_v29  ;;  %v819_v31 = vld [vmem:[%s8000_s14 + $0xaec] sm:$0xf] }
 0x148   : > { %818 = vst [vmem:[%s7996_s13 + $0xaf0] sm:$0xf] %v817_v30  ;;  %v821_v32 = vld [vmem:[%s8000_s14 + $0xb00] sm:$0xf]  ;;  %v823_v33 = vld [vmem:[%s8000_s14 + $0xb04] sm:$0xf] }
 0x149   : > { %820 = vst [vmem:[%s7996_s13 + $0xaf8] sm:$0xf] %v819_v31  ;;  %822 = vst [vmem:[%s7996_s13 + $0xb00] sm:$0xf] %v821_v32  ;;  %v825_v34 = vld [vmem:[%s8000_s14 + $0xb08] sm:$0xf] }
 0x14a   : > { %824 = vst [vmem:[%s7996_s13 + $0xb08] sm:$0xf] %v823_v33  ;;  %v827_v35 = vld [vmem:[%s8000_s14 + $0xb0c] sm:$0xf]  ;;  %v829_v36 = vld [vmem:[%s8000_s14 + $0xb20] sm:$0xf] }
 0x14b   : > { %826 = vst [vmem:[%s7996_s13 + $0xb10] sm:$0xf] %v825_v34  ;;  %828 = vst [vmem:[%s7996_s13 + $0xb18] sm:$0xf] %v827_v35  ;;  %v831_v37 = vld [vmem:[%s8000_s14 + $0xb24] sm:$0xf] }
 0x14c   : > { %830 = vst [vmem:[%s7996_s13 + $0xb20] sm:$0xf] %v829_v36  ;;  %v833_v38 = vld [vmem:[%s8000_s14 + $0xb28] sm:$0xf]  ;;  %v835_v39 = vld [vmem:[%s8000_s14 + $0xb2c] sm:$0xf] }
 0x14d   : > { %832 = vst [vmem:[%s7996_s13 + $0xb28] sm:$0xf] %v831_v37  ;;  %834 = vst [vmem:[%s7996_s13 + $0xb30] sm:$0xf] %v833_v38  ;;  %v837_v40 = vld [vmem:[%s8000_s14 + $0xb40] sm:$0xf] }
 0x14e   : > { %836 = vst [vmem:[%s7996_s13 + $0xb38] sm:$0xf] %v835_v39  ;;  %v839_v41 = vld [vmem:[%s8000_s14 + $0xb44] sm:$0xf]  ;;  %v841_v42 = vld [vmem:[%s8000_s14 + $0xb48] sm:$0xf] }
 0x14f   : > { %838 = vst [vmem:[%s7996_s13 + $0xb40] sm:$0xf] %v837_v40  ;;  %840 = vst [vmem:[%s7996_s13 + $0xb48] sm:$0xf] %v839_v41  ;;  %v843_v43 = vld [vmem:[%s8000_s14 + $0xb4c] sm:$0xf] }
 0x150   : > { %842 = vst [vmem:[%s7996_s13 + $0xb50] sm:$0xf] %v841_v42  ;;  %v845_v44 = vld [vmem:[%s8000_s14 + $0xb60] sm:$0xf]  ;;  %v847_v45 = vld [vmem:[%s8000_s14 + $0xb64] sm:$0xf] }
 0x151   : > { %844 = vst [vmem:[%s7996_s13 + $0xb58] sm:$0xf] %v843_v43  ;;  %846 = vst [vmem:[%s7996_s13 + $0xb60] sm:$0xf] %v845_v44  ;;  %v849_v46 = vld [vmem:[%s8000_s14 + $0xb68] sm:$0xf] }
 0x152   : > { %848 = vst [vmem:[%s7996_s13 + $0xb68] sm:$0xf] %v847_v45  ;;  %v851_v47 = vld [vmem:[%s8000_s14 + $0xb6c] sm:$0xf]  ;;  %v853_v48 = vld [vmem:[%s8000_s14 + $0xb80] sm:$0xf] }
 0x153   : > { %850 = vst [vmem:[%s7996_s13 + $0xb70] sm:$0xf] %v849_v46  ;;  %852 = vst [vmem:[%s7996_s13 + $0xb78] sm:$0xf] %v851_v47  ;;  %v855_v49 = vld [vmem:[%s8000_s14 + $0xb84] sm:$0xf] }
 0x154   : > { %854 = vst [vmem:[%s7996_s13 + $0xb80] sm:$0xf] %v853_v48  ;;  %v857_v50 = vld [vmem:[%s8000_s14 + $0xb88] sm:$0xf]  ;;  %v859_v51 = vld [vmem:[%s8000_s14 + $0xb8c] sm:$0xf] }
 0x155   : > { %856 = vst [vmem:[%s7996_s13 + $0xb88] sm:$0xf] %v855_v49  ;;  %858 = vst [vmem:[%s7996_s13 + $0xb90] sm:$0xf] %v857_v50  ;;  %v861_v52 = vld [vmem:[%s8000_s14 + $0xba0] sm:$0xf] }
 0x156   : > { %860 = vst [vmem:[%s7996_s13 + $0xb98] sm:$0xf] %v859_v51  ;;  %v863_v53 = vld [vmem:[%s8000_s14 + $0xba4] sm:$0xf]  ;;  %v865_v54 = vld [vmem:[%s8000_s14 + $0xba8] sm:$0xf] }
 0x157   : > { %862 = vst [vmem:[%s7996_s13 + $0xba0] sm:$0xf] %v861_v52  ;;  %864 = vst [vmem:[%s7996_s13 + $0xba8] sm:$0xf] %v863_v53  ;;  %v867_v55 = vld [vmem:[%s8000_s14 + $0xbac] sm:$0xf] }
 0x158   : > { %866 = vst [vmem:[%s7996_s13 + $0xbb0] sm:$0xf] %v865_v54  ;;  %v869_v56 = vld [vmem:[%s8000_s14 + $0xbc0] sm:$0xf]  ;;  %v871_v57 = vld [vmem:[%s8000_s14 + $0xbc4] sm:$0xf] }
 0x159   : > { %868 = vst [vmem:[%s7996_s13 + $0xbb8] sm:$0xf] %v867_v55  ;;  %870 = vst [vmem:[%s7996_s13 + $0xbc0] sm:$0xf] %v869_v56  ;;  %v873_v58 = vld [vmem:[%s8000_s14 + $0xbc8] sm:$0xf] }
 0x15a   : > { %872 = vst [vmem:[%s7996_s13 + $0xbc8] sm:$0xf] %v871_v57  ;;  %v875_v59 = vld [vmem:[%s8000_s14 + $0xbcc] sm:$0xf]  ;;  %v877_v60 = vld [vmem:[%s8000_s14 + $0xbe0] sm:$0xf] }
 0x15b   : > { %874 = vst [vmem:[%s7996_s13 + $0xbd0] sm:$0xf] %v873_v58  ;;  %876 = vst [vmem:[%s7996_s13 + $0xbd8] sm:$0xf] %v875_v59  ;;  %v879_v61 = vld [vmem:[%s8000_s14 + $0xbe4] sm:$0xf] }
 0x15c   : > { %878 = vst [vmem:[%s7996_s13 + $0xbe0] sm:$0xf] %v877_v60  ;;  %v881_v62 = vld [vmem:[%s8000_s14 + $0xbe8] sm:$0xf]  ;;  %v883_v63 = vld [vmem:[%s8000_s14 + $0xbec] sm:$0xf] }
 0x15d   : > { %880 = vst [vmem:[%s7996_s13 + $0xbe8] sm:$0xf] %v879_v61  ;;  %882 = vst [vmem:[%s7996_s13 + $0xbf0] sm:$0xf] %v881_v62  ;;  %v885_v0 = vld [vmem:[%s8000_s14 + $0xc00] sm:$0xf] }
 0x15e   : > { %884 = vst [vmem:[%s7996_s13 + $0xbf8] sm:$0xf] %v883_v63  ;;  %v887_v1 = vld [vmem:[%s8000_s14 + $0xc04] sm:$0xf]  ;;  %v889_v2 = vld [vmem:[%s8000_s14 + $0xc08] sm:$0xf] }
 0x15f   : > { %886 = vst [vmem:[%s7996_s13 + $0xc00] sm:$0xf] %v885_v0  ;;  %888 = vst [vmem:[%s7996_s13 + $0xc08] sm:$0xf] %v887_v1  ;;  %v891_v3 = vld [vmem:[%s8000_s14 + $0xc0c] sm:$0xf] }
 0x160   : > { %890 = vst [vmem:[%s7996_s13 + $0xc10] sm:$0xf] %v889_v2  ;;  %v893_v4 = vld [vmem:[%s8000_s14 + $0xc20] sm:$0xf]  ;;  %v895_v5 = vld [vmem:[%s8000_s14 + $0xc24] sm:$0xf] }
 0x161   : > { %892 = vst [vmem:[%s7996_s13 + $0xc18] sm:$0xf] %v891_v3  ;;  %894 = vst [vmem:[%s7996_s13 + $0xc20] sm:$0xf] %v893_v4  ;;  %v897_v6 = vld [vmem:[%s8000_s14 + $0xc28] sm:$0xf] }
 0x162   : > { %896 = vst [vmem:[%s7996_s13 + $0xc28] sm:$0xf] %v895_v5  ;;  %v899_v7 = vld [vmem:[%s8000_s14 + $0xc2c] sm:$0xf]  ;;  %v901_v8 = vld [vmem:[%s8000_s14 + $0xc40] sm:$0xf] }
 0x163   : > { %898 = vst [vmem:[%s7996_s13 + $0xc30] sm:$0xf] %v897_v6  ;;  %900 = vst [vmem:[%s7996_s13 + $0xc38] sm:$0xf] %v899_v7  ;;  %v903_v9 = vld [vmem:[%s8000_s14 + $0xc44] sm:$0xf] }
 0x164   : > { %902 = vst [vmem:[%s7996_s13 + $0xc40] sm:$0xf] %v901_v8  ;;  %v905_v10 = vld [vmem:[%s8000_s14 + $0xc48] sm:$0xf]  ;;  %v907_v11 = vld [vmem:[%s8000_s14 + $0xc4c] sm:$0xf] }
 0x165   : > { %904 = vst [vmem:[%s7996_s13 + $0xc48] sm:$0xf] %v903_v9  ;;  %906 = vst [vmem:[%s7996_s13 + $0xc50] sm:$0xf] %v905_v10  ;;  %v909_v12 = vld [vmem:[%s8000_s14 + $0xc60] sm:$0xf] }
 0x166   : > { %908 = vst [vmem:[%s7996_s13 + $0xc58] sm:$0xf] %v907_v11  ;;  %v911_v13 = vld [vmem:[%s8000_s14 + $0xc64] sm:$0xf]  ;;  %v913_v14 = vld [vmem:[%s8000_s14 + $0xc68] sm:$0xf] }
 0x167   : > { %910 = vst [vmem:[%s7996_s13 + $0xc60] sm:$0xf] %v909_v12  ;;  %912 = vst [vmem:[%s7996_s13 + $0xc68] sm:$0xf] %v911_v13  ;;  %v915_v15 = vld [vmem:[%s8000_s14 + $0xc6c] sm:$0xf] }
 0x168   : > { %914 = vst [vmem:[%s7996_s13 + $0xc70] sm:$0xf] %v913_v14  ;;  %v917_v16 = vld [vmem:[%s8000_s14 + $0xc80] sm:$0xf]  ;;  %v919_v17 = vld [vmem:[%s8000_s14 + $0xc84] sm:$0xf] }
 0x169   : > { %916 = vst [vmem:[%s7996_s13 + $0xc78] sm:$0xf] %v915_v15  ;;  %918 = vst [vmem:[%s7996_s13 + $0xc80] sm:$0xf] %v917_v16  ;;  %v921_v18 = vld [vmem:[%s8000_s14 + $0xc88] sm:$0xf] }
 0x16a   : > { %920 = vst [vmem:[%s7996_s13 + $0xc88] sm:$0xf] %v919_v17  ;;  %v923_v19 = vld [vmem:[%s8000_s14 + $0xc8c] sm:$0xf]  ;;  %v925_v20 = vld [vmem:[%s8000_s14 + $0xca0] sm:$0xf] }
 0x16b   : > { %922 = vst [vmem:[%s7996_s13 + $0xc90] sm:$0xf] %v921_v18  ;;  %924 = vst [vmem:[%s7996_s13 + $0xc98] sm:$0xf] %v923_v19  ;;  %v927_v21 = vld [vmem:[%s8000_s14 + $0xca4] sm:$0xf] }
 0x16c   : > { %926 = vst [vmem:[%s7996_s13 + $0xca0] sm:$0xf] %v925_v20  ;;  %v929_v22 = vld [vmem:[%s8000_s14 + $0xca8] sm:$0xf]  ;;  %v931_v23 = vld [vmem:[%s8000_s14 + $0xcac] sm:$0xf] }
 0x16d   : > { %928 = vst [vmem:[%s7996_s13 + $0xca8] sm:$0xf] %v927_v21  ;;  %930 = vst [vmem:[%s7996_s13 + $0xcb0] sm:$0xf] %v929_v22  ;;  %v933_v24 = vld [vmem:[%s8000_s14 + $0xcc0] sm:$0xf] }
 0x16e   : > { %932 = vst [vmem:[%s7996_s13 + $0xcb8] sm:$0xf] %v931_v23  ;;  %v935_v25 = vld [vmem:[%s8000_s14 + $0xcc4] sm:$0xf]  ;;  %v937_v26 = vld [vmem:[%s8000_s14 + $0xcc8] sm:$0xf] }
 0x16f   : > { %934 = vst [vmem:[%s7996_s13 + $0xcc0] sm:$0xf] %v933_v24  ;;  %936 = vst [vmem:[%s7996_s13 + $0xcc8] sm:$0xf] %v935_v25  ;;  %v939_v27 = vld [vmem:[%s8000_s14 + $0xccc] sm:$0xf] }
 0x170   : > { %938 = vst [vmem:[%s7996_s13 + $0xcd0] sm:$0xf] %v937_v26  ;;  %v941_v28 = vld [vmem:[%s8000_s14 + $0xce0] sm:$0xf]  ;;  %v943_v29 = vld [vmem:[%s8000_s14 + $0xce4] sm:$0xf] }
 0x171   : > { %940 = vst [vmem:[%s7996_s13 + $0xcd8] sm:$0xf] %v939_v27  ;;  %942 = vst [vmem:[%s7996_s13 + $0xce0] sm:$0xf] %v941_v28  ;;  %v945_v30 = vld [vmem:[%s8000_s14 + $0xce8] sm:$0xf] }
 0x172   : > { %944 = vst [vmem:[%s7996_s13 + $0xce8] sm:$0xf] %v943_v29  ;;  %v947_v31 = vld [vmem:[%s8000_s14 + $0xcec] sm:$0xf]  ;;  %v949_v32 = vld [vmem:[%s8000_s14 + $0xd00] sm:$0xf] }
 0x173   : > { %946 = vst [vmem:[%s7996_s13 + $0xcf0] sm:$0xf] %v945_v30  ;;  %948 = vst [vmem:[%s7996_s13 + $0xcf8] sm:$0xf] %v947_v31  ;;  %v951_v33 = vld [vmem:[%s8000_s14 + $0xd04] sm:$0xf] }
 0x174   : > { %950 = vst [vmem:[%s7996_s13 + $0xd00] sm:$0xf] %v949_v32  ;;  %v953_v34 = vld [vmem:[%s8000_s14 + $0xd08] sm:$0xf]  ;;  %v955_v35 = vld [vmem:[%s8000_s14 + $0xd0c] sm:$0xf] }
 0x175   : > { %952 = vst [vmem:[%s7996_s13 + $0xd08] sm:$0xf] %v951_v33  ;;  %954 = vst [vmem:[%s7996_s13 + $0xd10] sm:$0xf] %v953_v34  ;;  %v957_v36 = vld [vmem:[%s8000_s14 + $0xd20] sm:$0xf] }
 0x176   : > { %956 = vst [vmem:[%s7996_s13 + $0xd18] sm:$0xf] %v955_v35  ;;  %v959_v37 = vld [vmem:[%s8000_s14 + $0xd24] sm:$0xf]  ;;  %v961_v38 = vld [vmem:[%s8000_s14 + $0xd28] sm:$0xf] }
 0x177   : > { %958 = vst [vmem:[%s7996_s13 + $0xd20] sm:$0xf] %v957_v36  ;;  %960 = vst [vmem:[%s7996_s13 + $0xd28] sm:$0xf] %v959_v37  ;;  %v963_v39 = vld [vmem:[%s8000_s14 + $0xd2c] sm:$0xf] }
 0x178   : > { %962 = vst [vmem:[%s7996_s13 + $0xd30] sm:$0xf] %v961_v38  ;;  %v965_v40 = vld [vmem:[%s8000_s14 + $0xd40] sm:$0xf]  ;;  %v967_v41 = vld [vmem:[%s8000_s14 + $0xd44] sm:$0xf] }
 0x179   : > { %964 = vst [vmem:[%s7996_s13 + $0xd38] sm:$0xf] %v963_v39  ;;  %966 = vst [vmem:[%s7996_s13 + $0xd40] sm:$0xf] %v965_v40  ;;  %v969_v42 = vld [vmem:[%s8000_s14 + $0xd48] sm:$0xf] }
 0x17a   : > { %968 = vst [vmem:[%s7996_s13 + $0xd48] sm:$0xf] %v967_v41  ;;  %v971_v43 = vld [vmem:[%s8000_s14 + $0xd4c] sm:$0xf]  ;;  %v973_v44 = vld [vmem:[%s8000_s14 + $0xd60] sm:$0xf] }
 0x17b   : > { %970 = vst [vmem:[%s7996_s13 + $0xd50] sm:$0xf] %v969_v42  ;;  %972 = vst [vmem:[%s7996_s13 + $0xd58] sm:$0xf] %v971_v43  ;;  %v975_v45 = vld [vmem:[%s8000_s14 + $0xd64] sm:$0xf] }
 0x17c   : > { %974 = vst [vmem:[%s7996_s13 + $0xd60] sm:$0xf] %v973_v44  ;;  %v977_v46 = vld [vmem:[%s8000_s14 + $0xd68] sm:$0xf]  ;;  %v979_v47 = vld [vmem:[%s8000_s14 + $0xd6c] sm:$0xf] }
 0x17d   : > { %976 = vst [vmem:[%s7996_s13 + $0xd68] sm:$0xf] %v975_v45  ;;  %978 = vst [vmem:[%s7996_s13 + $0xd70] sm:$0xf] %v977_v46  ;;  %v981_v48 = vld [vmem:[%s8000_s14 + $0xd80] sm:$0xf] }
 0x17e   : > { %980 = vst [vmem:[%s7996_s13 + $0xd78] sm:$0xf] %v979_v47  ;;  %v983_v49 = vld [vmem:[%s8000_s14 + $0xd84] sm:$0xf]  ;;  %v985_v50 = vld [vmem:[%s8000_s14 + $0xd88] sm:$0xf] }
 0x17f   : > { %982 = vst [vmem:[%s7996_s13 + $0xd80] sm:$0xf] %v981_v48  ;;  %984 = vst [vmem:[%s7996_s13 + $0xd88] sm:$0xf] %v983_v49  ;;  %v987_v51 = vld [vmem:[%s8000_s14 + $0xd8c] sm:$0xf] }
 0x180   : > { %986 = vst [vmem:[%s7996_s13 + $0xd90] sm:$0xf] %v985_v50  ;;  %v989_v52 = vld [vmem:[%s8000_s14 + $0xda0] sm:$0xf]  ;;  %v991_v53 = vld [vmem:[%s8000_s14 + $0xda4] sm:$0xf] }
 0x181   : > { %988 = vst [vmem:[%s7996_s13 + $0xd98] sm:$0xf] %v987_v51  ;;  %990 = vst [vmem:[%s7996_s13 + $0xda0] sm:$0xf] %v989_v52  ;;  %v993_v54 = vld [vmem:[%s8000_s14 + $0xda8] sm:$0xf] }
 0x182   : > { %992 = vst [vmem:[%s7996_s13 + $0xda8] sm:$0xf] %v991_v53  ;;  %v995_v55 = vld [vmem:[%s8000_s14 + $0xdac] sm:$0xf]  ;;  %v997_v56 = vld [vmem:[%s8000_s14 + $0xdc0] sm:$0xf] }
 0x183   : > { %994 = vst [vmem:[%s7996_s13 + $0xdb0] sm:$0xf] %v993_v54  ;;  %996 = vst [vmem:[%s7996_s13 + $0xdb8] sm:$0xf] %v995_v55  ;;  %v999_v57 = vld [vmem:[%s8000_s14 + $0xdc4] sm:$0xf] }
 0x184   : > { %998 = vst [vmem:[%s7996_s13 + $0xdc0] sm:$0xf] %v997_v56  ;;  %v1001_v58 = vld [vmem:[%s8000_s14 + $0xdc8] sm:$0xf]  ;;  %v1003_v59 = vld [vmem:[%s8000_s14 + $0xdcc] sm:$0xf] }
 0x185   : > { %1000 = vst [vmem:[%s7996_s13 + $0xdc8] sm:$0xf] %v999_v57  ;;  %1002 = vst [vmem:[%s7996_s13 + $0xdd0] sm:$0xf] %v1001_v58  ;;  %v1005_v60 = vld [vmem:[%s8000_s14 + $0xde0] sm:$0xf] }
 0x186   : > { %1004 = vst [vmem:[%s7996_s13 + $0xdd8] sm:$0xf] %v1003_v59  ;;  %v1007_v61 = vld [vmem:[%s8000_s14 + $0xde4] sm:$0xf]  ;;  %v1009_v62 = vld [vmem:[%s8000_s14 + $0xde8] sm:$0xf] }
 0x187   : > { %1006 = vst [vmem:[%s7996_s13 + $0xde0] sm:$0xf] %v1005_v60  ;;  %1008 = vst [vmem:[%s7996_s13 + $0xde8] sm:$0xf] %v1007_v61  ;;  %v1011_v63 = vld [vmem:[%s8000_s14 + $0xdec] sm:$0xf] }
 0x188   : > { %1010 = vst [vmem:[%s7996_s13 + $0xdf0] sm:$0xf] %v1009_v62  ;;  %v1013_v0 = vld [vmem:[%s8000_s14 + $0xe00] sm:$0xf]  ;;  %v1015_v1 = vld [vmem:[%s8000_s14 + $0xe04] sm:$0xf] }
 0x189   : > { %1012 = vst [vmem:[%s7996_s13 + $0xdf8] sm:$0xf] %v1011_v63  ;;  %1014 = vst [vmem:[%s7996_s13 + $0xe00] sm:$0xf] %v1013_v0  ;;  %v1017_v2 = vld [vmem:[%s8000_s14 + $0xe08] sm:$0xf] }
 0x18a   : > { %1016 = vst [vmem:[%s7996_s13 + $0xe08] sm:$0xf] %v1015_v1  ;;  %v1019_v3 = vld [vmem:[%s8000_s14 + $0xe0c] sm:$0xf]  ;;  %v1021_v4 = vld [vmem:[%s8000_s14 + $0xe20] sm:$0xf] }
 0x18b   : > { %1018 = vst [vmem:[%s7996_s13 + $0xe10] sm:$0xf] %v1017_v2  ;;  %1020 = vst [vmem:[%s7996_s13 + $0xe18] sm:$0xf] %v1019_v3  ;;  %v1023_v5 = vld [vmem:[%s8000_s14 + $0xe24] sm:$0xf] }
 0x18c   : > { %1022 = vst [vmem:[%s7996_s13 + $0xe20] sm:$0xf] %v1021_v4  ;;  %v1025_v6 = vld [vmem:[%s8000_s14 + $0xe28] sm:$0xf]  ;;  %v1027_v7 = vld [vmem:[%s8000_s14 + $0xe2c] sm:$0xf] }
 0x18d   : > { %1024 = vst [vmem:[%s7996_s13 + $0xe28] sm:$0xf] %v1023_v5  ;;  %1026 = vst [vmem:[%s7996_s13 + $0xe30] sm:$0xf] %v1025_v6  ;;  %v1029_v8 = vld [vmem:[%s8000_s14 + $0xe40] sm:$0xf] }
 0x18e   : > { %1028 = vst [vmem:[%s7996_s13 + $0xe38] sm:$0xf] %v1027_v7  ;;  %v1031_v9 = vld [vmem:[%s8000_s14 + $0xe44] sm:$0xf]  ;;  %v1033_v10 = vld [vmem:[%s8000_s14 + $0xe48] sm:$0xf] }
 0x18f   : > { %1030 = vst [vmem:[%s7996_s13 + $0xe40] sm:$0xf] %v1029_v8  ;;  %1032 = vst [vmem:[%s7996_s13 + $0xe48] sm:$0xf] %v1031_v9  ;;  %v1035_v11 = vld [vmem:[%s8000_s14 + $0xe4c] sm:$0xf] }
 0x190   : > { %1034 = vst [vmem:[%s7996_s13 + $0xe50] sm:$0xf] %v1033_v10  ;;  %v1037_v12 = vld [vmem:[%s8000_s14 + $0xe60] sm:$0xf]  ;;  %v1039_v13 = vld [vmem:[%s8000_s14 + $0xe64] sm:$0xf] }
 0x191   : > { %1036 = vst [vmem:[%s7996_s13 + $0xe58] sm:$0xf] %v1035_v11  ;;  %1038 = vst [vmem:[%s7996_s13 + $0xe60] sm:$0xf] %v1037_v12  ;;  %v1041_v14 = vld [vmem:[%s8000_s14 + $0xe68] sm:$0xf] }
 0x192   : > { %1040 = vst [vmem:[%s7996_s13 + $0xe68] sm:$0xf] %v1039_v13  ;;  %v1043_v15 = vld [vmem:[%s8000_s14 + $0xe6c] sm:$0xf]  ;;  %v1045_v16 = vld [vmem:[%s8000_s14 + $0xe80] sm:$0xf] }
 0x193   : > { %1042 = vst [vmem:[%s7996_s13 + $0xe70] sm:$0xf] %v1041_v14  ;;  %1044 = vst [vmem:[%s7996_s13 + $0xe78] sm:$0xf] %v1043_v15  ;;  %v1047_v17 = vld [vmem:[%s8000_s14 + $0xe84] sm:$0xf] }
 0x194   : > { %1046 = vst [vmem:[%s7996_s13 + $0xe80] sm:$0xf] %v1045_v16  ;;  %v1049_v18 = vld [vmem:[%s8000_s14 + $0xe88] sm:$0xf]  ;;  %v1051_v19 = vld [vmem:[%s8000_s14 + $0xe8c] sm:$0xf] }
 0x195   : > { %1048 = vst [vmem:[%s7996_s13 + $0xe88] sm:$0xf] %v1047_v17  ;;  %1050 = vst [vmem:[%s7996_s13 + $0xe90] sm:$0xf] %v1049_v18  ;;  %v1053_v20 = vld [vmem:[%s8000_s14 + $0xea0] sm:$0xf] }
 0x196   : > { %1052 = vst [vmem:[%s7996_s13 + $0xe98] sm:$0xf] %v1051_v19  ;;  %v1055_v21 = vld [vmem:[%s8000_s14 + $0xea4] sm:$0xf]  ;;  %v1057_v22 = vld [vmem:[%s8000_s14 + $0xea8] sm:$0xf] }
 0x197   : > { %1054 = vst [vmem:[%s7996_s13 + $0xea0] sm:$0xf] %v1053_v20  ;;  %1056 = vst [vmem:[%s7996_s13 + $0xea8] sm:$0xf] %v1055_v21  ;;  %v1059_v23 = vld [vmem:[%s8000_s14 + $0xeac] sm:$0xf] }
 0x198   : > { %1058 = vst [vmem:[%s7996_s13 + $0xeb0] sm:$0xf] %v1057_v22  ;;  %v1061_v24 = vld [vmem:[%s8000_s14 + $0xec0] sm:$0xf]  ;;  %v1063_v25 = vld [vmem:[%s8000_s14 + $0xec4] sm:$0xf] }
 0x199   : > { %1060 = vst [vmem:[%s7996_s13 + $0xeb8] sm:$0xf] %v1059_v23  ;;  %1062 = vst [vmem:[%s7996_s13 + $0xec0] sm:$0xf] %v1061_v24  ;;  %v1065_v26 = vld [vmem:[%s8000_s14 + $0xec8] sm:$0xf] }
 0x19a   : > { %1064 = vst [vmem:[%s7996_s13 + $0xec8] sm:$0xf] %v1063_v25  ;;  %v1067_v27 = vld [vmem:[%s8000_s14 + $0xecc] sm:$0xf]  ;;  %v1069_v28 = vld [vmem:[%s8000_s14 + $0xee0] sm:$0xf] }
 0x19b   : > { %1066 = vst [vmem:[%s7996_s13 + $0xed0] sm:$0xf] %v1065_v26  ;;  %1068 = vst [vmem:[%s7996_s13 + $0xed8] sm:$0xf] %v1067_v27  ;;  %v1071_v29 = vld [vmem:[%s8000_s14 + $0xee4] sm:$0xf] }
 0x19c   : > { %1070 = vst [vmem:[%s7996_s13 + $0xee0] sm:$0xf] %v1069_v28  ;;  %v1073_v30 = vld [vmem:[%s8000_s14 + $0xee8] sm:$0xf]  ;;  %v1075_v31 = vld [vmem:[%s8000_s14 + $0xeec] sm:$0xf] }
 0x19d   : > { %1072 = vst [vmem:[%s7996_s13 + $0xee8] sm:$0xf] %v1071_v29  ;;  %1074 = vst [vmem:[%s7996_s13 + $0xef0] sm:$0xf] %v1073_v30  ;;  %v1077_v32 = vld [vmem:[%s8000_s14 + $0xf00] sm:$0xf] }
 0x19e   : > { %1076 = vst [vmem:[%s7996_s13 + $0xef8] sm:$0xf] %v1075_v31  ;;  %v1079_v33 = vld [vmem:[%s8000_s14 + $0xf04] sm:$0xf]  ;;  %v1081_v34 = vld [vmem:[%s8000_s14 + $0xf08] sm:$0xf] }
 0x19f   : > { %1078 = vst [vmem:[%s7996_s13 + $0xf00] sm:$0xf] %v1077_v32  ;;  %1080 = vst [vmem:[%s7996_s13 + $0xf08] sm:$0xf] %v1079_v33  ;;  %v1083_v35 = vld [vmem:[%s8000_s14 + $0xf0c] sm:$0xf] }
 0x1a0   : > { %1082 = vst [vmem:[%s7996_s13 + $0xf10] sm:$0xf] %v1081_v34  ;;  %v1085_v36 = vld [vmem:[%s8000_s14 + $0xf20] sm:$0xf]  ;;  %v1087_v37 = vld [vmem:[%s8000_s14 + $0xf24] sm:$0xf] }
 0x1a1   : > { %1084 = vst [vmem:[%s7996_s13 + $0xf18] sm:$0xf] %v1083_v35  ;;  %1086 = vst [vmem:[%s7996_s13 + $0xf20] sm:$0xf] %v1085_v36  ;;  %v1089_v38 = vld [vmem:[%s8000_s14 + $0xf28] sm:$0xf] }
 0x1a2   : > { %1088 = vst [vmem:[%s7996_s13 + $0xf28] sm:$0xf] %v1087_v37  ;;  %v1091_v39 = vld [vmem:[%s8000_s14 + $0xf2c] sm:$0xf]  ;;  %v1093_v40 = vld [vmem:[%s8000_s14 + $0xf40] sm:$0xf] }
 0x1a3   : > { %1090 = vst [vmem:[%s7996_s13 + $0xf30] sm:$0xf] %v1089_v38  ;;  %1092 = vst [vmem:[%s7996_s13 + $0xf38] sm:$0xf] %v1091_v39  ;;  %v1095_v41 = vld [vmem:[%s8000_s14 + $0xf44] sm:$0xf] }
 0x1a4   : > { %1094 = vst [vmem:[%s7996_s13 + $0xf40] sm:$0xf] %v1093_v40  ;;  %v1097_v42 = vld [vmem:[%s8000_s14 + $0xf48] sm:$0xf]  ;;  %v1099_v43 = vld [vmem:[%s8000_s14 + $0xf4c] sm:$0xf] }
 0x1a5   : > { %1096 = vst [vmem:[%s7996_s13 + $0xf48] sm:$0xf] %v1095_v41  ;;  %1098 = vst [vmem:[%s7996_s13 + $0xf50] sm:$0xf] %v1097_v42  ;;  %v1101_v44 = vld [vmem:[%s8000_s14 + $0xf60] sm:$0xf] }
 0x1a6   : > { %1100 = vst [vmem:[%s7996_s13 + $0xf58] sm:$0xf] %v1099_v43  ;;  %v1103_v45 = vld [vmem:[%s8000_s14 + $0xf64] sm:$0xf]  ;;  %v1105_v46 = vld [vmem:[%s8000_s14 + $0xf68] sm:$0xf] }
 0x1a7   : > { %1102 = vst [vmem:[%s7996_s13 + $0xf60] sm:$0xf] %v1101_v44  ;;  %1104 = vst [vmem:[%s7996_s13 + $0xf68] sm:$0xf] %v1103_v45  ;;  %v1107_v47 = vld [vmem:[%s8000_s14 + $0xf6c] sm:$0xf] }
 0x1a8   : > { %1106 = vst [vmem:[%s7996_s13 + $0xf70] sm:$0xf] %v1105_v46  ;;  %v1109_v48 = vld [vmem:[%s8000_s14 + $0xf80] sm:$0xf]  ;;  %v1111_v49 = vld [vmem:[%s8000_s14 + $0xf84] sm:$0xf] }
 0x1a9   : > { %1108 = vst [vmem:[%s7996_s13 + $0xf78] sm:$0xf] %v1107_v47  ;;  %1110 = vst [vmem:[%s7996_s13 + $0xf80] sm:$0xf] %v1109_v48  ;;  %v1113_v50 = vld [vmem:[%s8000_s14 + $0xf88] sm:$0xf] }
 0x1aa   : > { %1112 = vst [vmem:[%s7996_s13 + $0xf88] sm:$0xf] %v1111_v49  ;;  %v1115_v51 = vld [vmem:[%s8000_s14 + $0xf8c] sm:$0xf]  ;;  %v1117_v52 = vld [vmem:[%s8000_s14 + $0xfa0] sm:$0xf] }
 0x1ab   : > { %1114 = vst [vmem:[%s7996_s13 + $0xf90] sm:$0xf] %v1113_v50  ;;  %1116 = vst [vmem:[%s7996_s13 + $0xf98] sm:$0xf] %v1115_v51  ;;  %v1119_v53 = vld [vmem:[%s8000_s14 + $0xfa4] sm:$0xf] }
 0x1ac   : > { %1118 = vst [vmem:[%s7996_s13 + $0xfa0] sm:$0xf] %v1117_v52  ;;  %v1121_v54 = vld [vmem:[%s8000_s14 + $0xfa8] sm:$0xf]  ;;  %v1123_v55 = vld [vmem:[%s8000_s14 + $0xfac] sm:$0xf] }
 0x1ad   : > { %1120 = vst [vmem:[%s7996_s13 + $0xfa8] sm:$0xf] %v1119_v53  ;;  %1122 = vst [vmem:[%s7996_s13 + $0xfb0] sm:$0xf] %v1121_v54  ;;  %v1125_v56 = vld [vmem:[%s8000_s14 + $0xfc0] sm:$0xf] }
 0x1ae   : > { %1124 = vst [vmem:[%s7996_s13 + $0xfb8] sm:$0xf] %v1123_v55  ;;  %v1127_v57 = vld [vmem:[%s8000_s14 + $0xfc4] sm:$0xf]  ;;  %v1129_v58 = vld [vmem:[%s8000_s14 + $0xfc8] sm:$0xf] }
 0x1af   : > { %1126 = vst [vmem:[%s7996_s13 + $0xfc0] sm:$0xf] %v1125_v56  ;;  %1128 = vst [vmem:[%s7996_s13 + $0xfc8] sm:$0xf] %v1127_v57  ;;  %v1131_v59 = vld [vmem:[%s8000_s14 + $0xfcc] sm:$0xf] }
 0x1b0   : > { %1130 = vst [vmem:[%s7996_s13 + $0xfd0] sm:$0xf] %v1129_v58  ;;  %v1133_v60 = vld [vmem:[%s8000_s14 + $0xfe0] sm:$0xf]  ;;  %v1135_v61 = vld [vmem:[%s8000_s14 + $0xfe4] sm:$0xf] }
 0x1b1   : > { %1132 = vst [vmem:[%s7996_s13 + $0xfd8] sm:$0xf] %v1131_v59  ;;  %1134 = vst [vmem:[%s7996_s13 + $0xfe0] sm:$0xf] %v1133_v60  ;;  %v1137_v62 = vld [vmem:[%s8000_s14 + $0xfe8] sm:$0xf] }
 0x1b2   : > { %1136 = vst [vmem:[%s7996_s13 + $0xfe8] sm:$0xf] %v1135_v61  ;;  %v1139_v63 = vld [vmem:[%s8000_s14 + $0xfec] sm:$0xf]  ;;  %1138 = vst [vmem:[%s7996_s13 + $0xff0] sm:$0xf] %v1137_v62 }
 0x1b3   : > { %1140 = vst [vmem:[%s7996_s13 + $0xff8] sm:$0xf] %v1139_v63  ;;  %p1142_p12 = scmp.ge.s32.totalorder %s1141_s9, 2  ;;  %s113_s19 = sadd.s32 1, %s8008_s19  }
 0x1b4   : > { %p110_p13 = scmp.ge.s32.totalorder %s113_s19, 2  }
 0x1b5   : > { %s9440_s9 = smov (%p1142_p12, %s1141_s9), 0 }
 0x1b6   : > { %s7289_s17 = sshll.u32 %s9440_s9, 4  ;;  %s7290_s20 = sshll.u32 %s9440_s9, 2 }
 0x1b7   : > { %s1146_s14 = scalar_lea.vmem %s9431_s5, %s7289_s17   ;;  %s1147_s13 = scalar_lea.vmem [#allocation2], %s7290_s20  }
 0x1b8   : > { %s9438_s18 = smov %s9440_s9  ;;  %112 = sbr.rel (!%p110_p13) target bundleno = 94 (0x5e), region = 167 }
 0x1bf   :  { %4317 = vsyncadd [#allocation4], 65536  ;;  %v7652_v0 = vld [vmem:[#allocation5 + $0x4] ss:$16 sps:$4 sm:$0xff]   ;;  %v7654_v1 = vld [vmem:[#allocation5 + $0xc] ss:$16 sps:$4 sm:$0xff]  }
 0x1c0   :  { %v7656_v2 = vld [vmem:[#allocation5] ss:$16 sps:$4 sm:$0xff]   ;;  %v7657_v3 = vld [vmem:[#allocation5 + $0x8] ss:$16 sps:$4 sm:$0xff]   ;;  %4771 = vmatprep.subr.bf16.mxu0 %v7652_v0  ;;  %v7658_v4 = vld [vmem:[#allocation5 + $0x24] ss:$16 sps:$4 sm:$0xff]   ;;  %4877 = vmatprep.subr.bf16.mxu1 %v7654_v1 }
 0x1c1   :  { %4772 = vmatpush1.bf16.msra.mxu0 %v7656_v2  ;;  %v7660_v5 = vld [vmem:[#allocation5 + $0x2c] ss:$16 sps:$4 sm:$0xff]   ;;  %4878 = vmatpush1.bf16.msra.mxu1 %v7657_v3  ;;  %v7662_v6 = vld [vmem:[#allocation5 + $0x20] ss:$16 sps:$4 sm:$0xff]   ;;  %v7663_v7 = vld [vmem:[#allocation5 + $0x28] ss:$16 sps:$4 sm:$0xff]  }
 0x1c2   :  { %4773 = vmatprep.subr.bf16.mxu0 %v7658_v4  ;;  %4879 = vmatprep.subr.bf16.mxu1 %v7660_v5  ;;  %v7664_v8 = vld [vmem:[#allocation5 + $0x44] ss:$16 sps:$4 sm:$0xff]   ;;  %v7666_v9 = vld [vmem:[#allocation5 + $0x4c] ss:$16 sps:$4 sm:$0xff]   ;;  %v7668_v10 = vld [vmem:[#allocation5 + $0x40] ss:$16 sps:$4 sm:$0xff]  }
 0x1c3   :  { %v7669_v11 = vld [vmem:[#allocation5 + $0x48] ss:$16 sps:$4 sm:$0xff]   ;;  %v7670_v12 = vld [vmem:[#allocation5 + $0x64] ss:$16 sps:$4 sm:$0xff]   ;;  %v7672_v13 = vld [vmem:[#allocation5 + $0x6c] ss:$16 sps:$4 sm:$0xff]  }
 0x1c4   :  { %v7674_v14 = vld [vmem:[#allocation5 + $0x60] ss:$16 sps:$4 sm:$0xff]   ;;  %v7675_v15 = vld [vmem:[#allocation5 + $0x68] ss:$16 sps:$4 sm:$0xff]   ;;  %v7676_v16 = vld [vmem:[#allocation5 + $0x84] ss:$16 sps:$4 sm:$0xff]  }
 0x1c5   :  { %4774 = vmatpush1.bf16.msra.mxu0 %v7662_v6  ;;  %4880 = vmatpush1.bf16.msra.mxu1 %v7663_v7  ;;  %v7678_v17 = vld [vmem:[#allocation5 + $0x8c] ss:$16 sps:$4 sm:$0xff]   ;;  %v7680_v18 = vld [vmem:[#allocation5 + $0x80] ss:$16 sps:$4 sm:$0xff]   ;;  %v7681_v19 = vld [vmem:[#allocation5 + $0x88] ss:$16 sps:$4 sm:$0xff]  }
 0x1c6   :  { %4775 = vmatprep.subr.bf16.mxu0 %v7664_v8  ;;  %4881 = vmatprep.subr.bf16.mxu1 %v7666_v9  ;;  %v7682_v20 = vld [vmem:[#allocation5 + $0xa4] ss:$16 sps:$4 sm:$0xff]   ;;  %v7684_v21 = vld [vmem:[#allocation5 + $0xac] ss:$16 sps:$4 sm:$0xff]   ;;  %v7686_v22 = vld [vmem:[#allocation5 + $0xa0] ss:$16 sps:$4 sm:$0xff]  }
 0x1c7   :  { %v7687_v23 = vld [vmem:[#allocation5 + $0xa8] ss:$16 sps:$4 sm:$0xff]   ;;  %v7688_v24 = vld [vmem:[#allocation5 + $0xc4] ss:$16 sps:$4 sm:$0xff]   ;;  %v7690_v25 = vld [vmem:[#allocation5 + $0xcc] ss:$16 sps:$4 sm:$0xff]  }
 0x1c8   :  { %v7692_v26 = vld [vmem:[#allocation5 + $0xc0] ss:$16 sps:$4 sm:$0xff]   ;;  %v7693_v27 = vld [vmem:[#allocation5 + $0xc8] ss:$16 sps:$4 sm:$0xff]   ;;  %v7694_v28 = vld [vmem:[#allocation5 + $0xe4] ss:$16 sps:$4 sm:$0xff]  }
 0x1c9   :  { %4776 = vmatpush1.bf16.msra.mxu0 %v7668_v10  ;;  %4882 = vmatpush1.bf16.msra.mxu1 %v7669_v11  ;;  %v7696_v29 = vld [vmem:[#allocation5 + $0xec] ss:$16 sps:$4 sm:$0xff]   ;;  %v7698_v30 = vld [vmem:[#allocation5 + $0xe0] ss:$16 sps:$4 sm:$0xff]   ;;  %v7699_v31 = vld [vmem:[#allocation5 + $0xe8] ss:$16 sps:$4 sm:$0xff]  }
 0x1ca   :  { %4777 = vmatprep.subr.bf16.mxu0 %v7670_v12  ;;  %4883 = vmatprep.subr.bf16.mxu1 %v7672_v13  ;;  %v7700_v32 = vld [vmem:[#allocation5 + $0x104] ss:$16 sps:$4 sm:$0xff]   ;;  %v7702_v33 = vld [vmem:[#allocation5 + $0x10c] ss:$16 sps:$4 sm:$0xff]   ;;  %v7704_v34 = vld [vmem:[#allocation5 + $0x100] ss:$16 sps:$4 sm:$0xff]  }
 0x1cb   :  { %v7705_v35 = vld [vmem:[#allocation5 + $0x108] ss:$16 sps:$4 sm:$0xff]   ;;  %v7706_v36 = vld [vmem:[#allocation5 + $0x124] ss:$16 sps:$4 sm:$0xff]   ;;  %v7708_v37 = vld [vmem:[#allocation5 + $0x12c] ss:$16 sps:$4 sm:$0xff]  }
 0x1cc   :  { %v7710_v38 = vld [vmem:[#allocation5 + $0x120] ss:$16 sps:$4 sm:$0xff]   ;;  %v7711_v39 = vld [vmem:[#allocation5 + $0x128] ss:$16 sps:$4 sm:$0xff]   ;;  %v7712_v40 = vld [vmem:[#allocation5 + $0x144] ss:$16 sps:$4 sm:$0xff]  }
 0x1cd   :  { %4778 = vmatpush1.bf16.msra.mxu0 %v7674_v14  ;;  %4884 = vmatpush1.bf16.msra.mxu1 %v7675_v15  ;;  %v7714_v41 = vld [vmem:[#allocation5 + $0x14c] ss:$16 sps:$4 sm:$0xff]   ;;  %v7716_v42 = vld [vmem:[#allocation5 + $0x140] ss:$16 sps:$4 sm:$0xff]   ;;  %v7717_v43 = vld [vmem:[#allocation5 + $0x148] ss:$16 sps:$4 sm:$0xff]  }
 0x1ce   :  { %4779 = vmatprep.subr.bf16.mxu0 %v7676_v16  ;;  %4885 = vmatprep.subr.bf16.mxu1 %v7678_v17  ;;  %v7718_v44 = vld [vmem:[#allocation5 + $0x164] ss:$16 sps:$4 sm:$0xff]   ;;  %v7720_v45 = vld [vmem:[#allocation5 + $0x16c] ss:$16 sps:$4 sm:$0xff]   ;;  %v7722_v46 = vld [vmem:[#allocation5 + $0x160] ss:$16 sps:$4 sm:$0xff]  }
 0x1cf   :  { %v7750_v47 = vld [vmem:[%s9426_s0 + $0x4] ss:$12 sps:$4 sm:$0xff]   ;;  %v7723_v48 = vld [vmem:[#allocation5 + $0x168] ss:$16 sps:$4 sm:$0xff]   ;;  %v7726_v50 = vld [vmem:[#allocation5 + $0x18c] ss:$16 sps:$4 sm:$0xff]  }
 0x1d0   :  { %v7724_v49 = vld [vmem:[#allocation5 + $0x184] ss:$16 sps:$4 sm:$0xff]   ;;  %4803 = vmatprep.mubr.bf16.mxu0 %v7750_v47  ;;  %v7728_v51 = vld [vmem:[#allocation5 + $0x180] ss:$16 sps:$4 sm:$0xff]   ;;  %4909 = vmatprep.mubr.bf16.mxu1 %v7750_v47  ;;  %v7729_v52 = vld [vmem:[#allocation5 + $0x188] ss:$16 sps:$4 sm:$0xff]  }
 0x1d1   :  { %4780 = vmatpush1.bf16.msra.mxu0 %v7680_v18  ;;  %4886 = vmatpush1.bf16.msra.mxu1 %v7681_v19  ;;  %v7730_v53 = vld [vmem:[#allocation5 + $0x1a4] ss:$16 sps:$4 sm:$0xff]   ;;  %v7732_v54 = vld [vmem:[#allocation5 + $0x1ac] ss:$16 sps:$4 sm:$0xff]   ;;  %v7734_v55 = vld [vmem:[#allocation5 + $0x1a0] ss:$16 sps:$4 sm:$0xff]  }
 0x1d2   :  { %4781 = vmatprep.subr.bf16.mxu0 %v7682_v20  ;;  %4887 = vmatprep.subr.bf16.mxu1 %v7684_v21  ;;  %v7735_v56 = vld [vmem:[#allocation5 + $0x1a8] ss:$16 sps:$4 sm:$0xff]   ;;  %v7736_v57 = vld [vmem:[#allocation5 + $0x1c4] ss:$16 sps:$4 sm:$0xff]   ;;  %v7738_v58 = vld [vmem:[#allocation5 + $0x1cc] ss:$16 sps:$4 sm:$0xff]  }
 0x1d3   :  { %v7740_v59 = vld [vmem:[#allocation5 + $0x1c0] ss:$16 sps:$4 sm:$0xff]   ;;  %v7741_v60 = vld [vmem:[#allocation5 + $0x1c8] ss:$16 sps:$4 sm:$0xff]   ;;  %v7742_v61 = vld [vmem:[#allocation5 + $0x1e4] ss:$16 sps:$4 sm:$0xff]  }
 0x1d4   :  { %v7744_v62 = vld [vmem:[#allocation5 + $0x1ec] ss:$16 sps:$4 sm:$0xff]   ;;  %v7746_v63 = vld [vmem:[#allocation5 + $0x1e0] ss:$16 sps:$4 sm:$0xff]   ;;  %v7747_v0 = vld [vmem:[#allocation5 + $0x1e8] ss:$16 sps:$4 sm:$0xff]  }
 0x1d5   :  { %4782 = vmatpush1.bf16.msra.mxu0 %v7686_v22  ;;  %4888 = vmatpush1.bf16.msra.mxu1 %v7687_v23  ;;  %v7748_v1 = vld [vmem:[%s9426_s0] ss:$12 sps:$4 sm:$0xff]   ;;  %v7753_v2 = vld [vmem:[#allocation5 + $0x204] ss:$16 sps:$4 sm:$0xff]   ;;  %v7754_v5 = vld [vmem:[#allocation5 + $0x208] ss:$16 sps:$4 sm:$0xff]  }
 0x1d6   :  { %4783 = vmatprep.subr.bf16.mxu0 %v7688_v24  ;;  %4889 = vmatprep.subr.bf16.mxu1 %v7690_v25  ;;  %v7756_v3 = vld [vmem:[#allocation5 + $0x20c] ss:$16 sps:$4 sm:$0xff]   ;;  %v7751_v4 = vld [vmem:[#allocation5 + $0x200] ss:$16 sps:$4 sm:$0xff]   ;;  %v7759_v9 = vld [vmem:[%s9426_s0 + $0x18] ss:$12 sps:$4 sm:$0xff]  }
 0x1d7   :  { %v7757_v6 = vld [vmem:[%s9426_s0 + $0x1c] ss:$12 sps:$4 sm:$0xff]   ;;  %v7762_v7 = vld [vmem:[%s9428_s2 + $0x40] sm:$0xff]   ;;  %v8019_v10 = vmov 0   ;;  %vm4764_vm0 = vcmask 130048   ;;  %v7770_v18 = vld [vmem:[%s9428_s2 + $0x50] sm:$0xff]  }
 0x1d8   :  { %v7763_v8 = vld [vmem:[%s9428_s2 + $0xc0] sm:$0xff]   ;;  %v7760_v11 = vld [vmem:[%s9426_s0 + $0x8] ss:$12 sps:$4 sm:$0xff]   ;;  %v7774_v23 = vld [vmem:[%s9428_s2 + $0x58] sm:$0xff]  }
 0x1d9   :  { %4784 = vmatpush1.bf16.msra.mxu0 %v7692_v26  ;;  %4890 = vmatpush1.bf16.msra.mxu1 %v7693_v27  ;;  %v7764_v12 = vld [vmem:[%s9428_s2] sm:$0xff]   ;;  %v7766_v14 = vld [vmem:[%s9428_s2 + $0x48] sm:$0xff]   ;;  %v7771_v20 = vld [vmem:[%s9428_s2 + $0xd0] sm:$0xff]  }
 0x1da   :  { %4785 = vmatprep.subr.bf16.mxu0 %v7694_v28  ;;  %4891 = vmatprep.subr.bf16.mxu1 %v7696_v29  ;;  %v7765_v13 = vld [vmem:[%s9428_s2 + $0x80] sm:$0xff]   ;;  %v7767_v15 = vld [vmem:[%s9428_s2 + $0xc8] sm:$0xff]   ;;  %v7772_v21 = vld [vmem:[%s9428_s2 + $0x10] sm:$0xff]  }
 0x1db   :  { %v7768_v16 = vld [vmem:[%s9428_s2 + $0x8] sm:$0xff]   ;;  %v7773_v22 = vld [vmem:[%s9428_s2 + $0x90] sm:$0xff]   ;;  %v7775_v24 = vld [vmem:[%s9428_s2 + $0xd8] sm:$0xff]  }
 0x1dc   :  { %v7769_v17 = vld [vmem:[%s9428_s2 + $0x88] sm:$0xff]   ;;  %v7776_v25 = vld [vmem:[%s9428_s2 + $0x18] sm:$0xff]   ;;  %v7778_v27 = vld [vmem:[%s9428_s2 + $0x60] sm:$0xff]  }
 0x1dd   :  { %4786 = vmatpush1.bf16.msra.mxu0 %v7698_v30  ;;  %4892 = vmatpush1.bf16.msra.mxu1 %v7699_v31  ;;  %v7761_v19 = vld [vmem:[%s9426_s0 + $0x20] ss:$12 sps:$4 sm:$0xff]   ;;  %v7777_v26 = vld [vmem:[%s9428_s2 + $0x98] sm:$0xff]  }
 0x1de   :  { %4787 = vmatprep.subr.bf16.mxu0 %v7700_v32  ;;  %4893 = vmatprep.subr.bf16.mxu1 %v7702_v33  ;;  %v7779_v28 = vld [vmem:[%s9428_s2 + $0xe0] sm:$0xff]   ;;  %v7782_v31 = vld [vmem:[%s9428_s2 + $0x68] sm:$0xff]  }
 0x1df   :  { %v7780_v29 = vld [vmem:[%s9428_s2 + $0x20] sm:$0xff]   ;;  %v7783_v32 = vld [vmem:[%s9428_s2 + $0xe8] sm:$0xff]  }
 0x1e0   :  { %v7781_v30 = vld [vmem:[%s9428_s2 + $0xa0] sm:$0xff]   ;;  %v7784_v33 = vld [vmem:[%s9428_s2 + $0x28] sm:$0xff]  }
 0x1e1   :  { %4788 = vmatpush1.bf16.msra.mxu0 %v7704_v34  ;;  %4894 = vmatpush1.bf16.msra.mxu1 %v7705_v35  ;;  %v7785_v34 = vld [vmem:[%s9428_s2 + $0xa8] sm:$0xff]   ;;  %v7786_v35 = vld [vmem:[%s9428_s2 + $0x70] sm:$0xff]  }
 0x1e2   :  { %4789 = vmatprep.subr.bf16.mxu0 %v7706_v36  ;;  %4895 = vmatprep.subr.bf16.mxu1 %v7708_v37  ;;  %v7787_v36 = vld [vmem:[%s9428_s2 + $0xf0] sm:$0xff]  }
 0x1e3   :  { %v7788_v37 = vld [vmem:[%s9428_s2 + $0x30] sm:$0xff]  }
 0x1e5   :  { %4790 = vmatpush1.bf16.msra.mxu0 %v7710_v38  ;;  %4896 = vmatpush1.bf16.msra.mxu1 %v7711_v39  ;;  %v7789_v38 = vld [vmem:[%s9428_s2 + $0xb0] sm:$0xff]   ;;  %v7790_v39 = vld [vmem:[%s9428_s2 + $0x78] sm:$0xff]  }
 0x1e6   :  { %4791 = vmatprep.subr.bf16.mxu0 %v7712_v40  ;;  %4897 = vmatprep.subr.bf16.mxu1 %v7714_v41  ;;  %v7791_v40 = vld [vmem:[%s9428_s2 + $0xf8] sm:$0xff]  }
 0x1e7   :  { %v7792_v41 = vld [vmem:[%s9428_s2 + $0x38] sm:$0xff]  }
 0x1e9   :  { %4792 = vmatpush1.bf16.msra.mxu0 %v7716_v42  ;;  %4898 = vmatpush1.bf16.msra.mxu1 %v7717_v43  ;;  %v7793_v42 = vld [vmem:[%s9428_s2 + $0xb8] sm:$0xff]  }
 0x1ea   :  { %4793 = vmatprep.subr.bf16.mxu0 %v7718_v44  ;;  %4899 = vmatprep.subr.bf16.mxu1 %v7720_v45 }
 0x1ed   :  { %4794 = vmatpush1.bf16.msra.mxu0 %v7722_v46  ;;  %4900 = vmatpush1.bf16.msra.mxu1 %v7723_v48 }
 0x1ee   :  { %4795 = vmatprep.subr.bf16.mxu0 %v7724_v49  ;;  %4901 = vmatprep.subr.bf16.mxu1 %v7726_v50 }
 0x1f1   :  { %4796 = vmatpush1.bf16.msra.mxu0 %v7728_v51  ;;  %4902 = vmatpush1.bf16.msra.mxu1 %v7729_v52 }
 0x1f2   :  { %4797 = vmatprep.subr.bf16.mxu0 %v7730_v53  ;;  %4903 = vmatprep.subr.bf16.mxu1 %v7732_v54 }
 0x1f5   :  { %4798 = vmatpush1.bf16.msra.mxu0 %v7734_v55  ;;  %4904 = vmatpush1.bf16.msra.mxu1 %v7735_v56 }
 0x1f6   :  { %4799 = vmatprep.subr.bf16.mxu0 %v7736_v57  ;;  %4905 = vmatprep.subr.bf16.mxu1 %v7738_v58 }
 0x1f9   :  { %4800 = vmatpush1.bf16.msra.mxu0 %v7740_v59  ;;  %4906 = vmatpush1.bf16.msra.mxu1 %v7741_v60 }
 0x1fa   :  { %4801 = vmatprep.subr.bf16.mxu0 %v7742_v61  ;;  %4907 = vmatprep.subr.bf16.mxu1 %v7744_v62 }
 0x1fd   :  { %4802 = vmatpush1.bf16.msra.mxu0 %v7746_v63  ;;  %4908 = vmatpush1.bf16.msra.mxu1 %v7747_v0 }
 0x1fe   :  { %4824 = vmatprep.subr.bf16.mxu0 %v7753_v2  ;;  %4930 = vmatprep.subr.bf16.mxu1 %v7756_v3 }
 0x200   :  { %4804 = vmatmul.mubr.bf16.vlgmr.msra.gmra.mrb[0].mxu0 %v7748_v1  ;;  %4910 = vmatmul.mubr.bf16.vlgmr.msra.gmra.mrb[0].mxu1 %v7748_v1 }
 0x201   :  { %4825 = vmatpush1.bf16.msra.mxu0 %v7751_v4  ;;  %4931 = vmatpush1.bf16.msra.mxu1 %v7754_v5 }
 0x202   :  { %4813 = vmatprep.mubr.bf16.mxu0 %v7757_v6  ;;  %4919 = vmatprep.mubr.bf16.mxu1 %v7757_v6 }
 0x203   :  { %7437 = vmatprep.subr.bf16.mxu0 %v7762_v7  ;;  %7465 = vmatprep.subr.bf16.mxu1 %v7763_v8 }
 0x208   :  { %4814 = vmatmul.mubr.bf16.gmra.mrb[4].mxu0 %v7759_v9  ;;  %4920 = vmatmul.mubr.bf16.gmra.mrb[4].mxu1 %v7759_v9 }
 0x209   :  { %4856 = vmatprep.mubr.bf16.mxu0 %v8019_v10  ;;  %4962 = vmatprep.mubr.bf16.mxu1 %v8019_v10 }
 0x210   :  { %7365 = vmatmul.mubr.msk.bf16.vlgmr.msra.gmra.mrb[0].mxu0 %vm4764_vm0, %v7760_v11  ;;  %7367 = vmatmul.mubr.msk.bf16.vlgmr.msra.gmra.mrb[0].mxu1 %vm4764_vm0, %v7760_v11 }
 0x211   :  { %4866 = vmatprep.mubr.bf16.mxu0 %v8019_v10  ;;  %4972 = vmatprep.mubr.bf16.mxu1 %v8019_v10 }
 0x212   :  { %7438 = vmatpush3.bf16.msra.mxu0 %v7764_v12  ;;  %7466 = vmatpush3.bf16.msra.mxu1 %v7765_v13 }
 0x213   :  { %7439 = vmatprep.subr.bf16.mxu0 %v7766_v14  ;;  %7467 = vmatprep.subr.bf16.mxu1 %v7767_v15 }
 0x216   :  { %7440 = vmatpush3.bf16.msra.mxu0 %v7768_v16  ;;  %7468 = vmatpush3.bf16.msra.mxu1 %v7769_v17 }
 0x217   :  { %7441 = vmatprep.subr.bf16.mxu0 %v7770_v18  ;;  %7469 = vmatprep.subr.bf16.mxu1 %v7771_v20 }
 0x218   :  { %7366 = vmatmul.mubr.msk.bf16.gmra.mrb[4].mxu0 %vm4764_vm0, %v7761_v19  ;;  %7368 = vmatmul.mubr.msk.bf16.gmra.mrb[4].mxu1 %vm4764_vm0, %v7761_v19 }
 0x21a   :  { %7442 = vmatpush3.bf16.msra.mxu0 %v7772_v21  ;;  %7470 = vmatpush3.bf16.msra.mxu1 %v7773_v22 }
 0x21b   :  { %7443 = vmatprep.subr.bf16.mxu0 %v7774_v23  ;;  %7471 = vmatprep.subr.bf16.mxu1 %v7775_v24 }
 0x21e   :  { %7444 = vmatpush3.bf16.msra.mxu0 %v7776_v25  ;;  %7472 = vmatpush3.bf16.msra.mxu1 %v7777_v26 }
 0x21f   :  { %7445 = vmatprep.subr.bf16.mxu0 %v7778_v27  ;;  %7473 = vmatprep.subr.bf16.mxu1 %v7779_v28 }
 0x222   :  { %7446 = vmatpush3.bf16.msra.mxu0 %v7780_v29  ;;  %7474 = vmatpush3.bf16.msra.mxu1 %v7781_v30 }
 0x223   :  { %7447 = vmatprep.subr.bf16.mxu0 %v7782_v31  ;;  %7475 = vmatprep.subr.bf16.mxu1 %v7783_v32 }
 0x226   :  { %7448 = vmatpush3.bf16.msra.mxu0 %v7784_v33  ;;  %7476 = vmatpush3.bf16.msra.mxu1 %v7785_v34 }
 0x227   :  { %7449 = vmatprep.subr.bf16.mxu0 %v7786_v35  ;;  %7477 = vmatprep.subr.bf16.mxu1 %v7787_v36 }
 0x22a   :  { %7450 = vmatpush3.bf16.msra.mxu0 %v7788_v37  ;;  %7478 = vmatpush3.bf16.msra.mxu1 %v7789_v38 }
 0x22b   :  { %7451 = vmatprep.subr.bf16.mxu0 %v7790_v39  ;;  %7479 = vmatprep.subr.bf16.mxu1 %v7791_v40 }
 0x22e   :  { %7452 = vmatpush3.bf16.msra.mxu0 %v7792_v41  ;;  %7480 = vmatpush3.bf16.msra.mxu1 %v7793_v42 }
 0x2e3   :  { %v4858_v43 = vpop.f32.mrb[0].mxu0  ;;  %v4964_v45 = vpop.f32.mrb[0].mxu1 }
 0x2e4   :  { %vm4983_vm1 = vcmp.gt.f32.partialorder %v4858_v43, 0.0  ;;  %v4999_v44 = vmul.f32 0.3, %v4858_v43  ;;  %v4860_v46 = vpop.f32.mrb[1].mxu0  ;;  %v5001_v47 = vmul.f32 0.3, %v4964_v45 }
 0x2e5   :  { %vm4985_vm2 = vcmp.gt.f32.partialorder %v4964_v45, 0.0  ;;  %v4966_v48 = vpop.f32.mrb[1].mxu1  ;;  %v4862_v49 = vpop.f32.mrb[2].mxu0  ;;  %vm4984_vm3 = vcmp.gt.f32.partialorder %v4860_v46, 0.0  ;;  %v5000_v51 = vmul.f32 0.3, %v4860_v46 }
 0x2e6   :  { %v5015_v50 = vsel %vm4983_vm1, %v4858_v43, %v4999_v44  ;;  %vm4986_vm4 = vcmp.gt.f32.partialorder %v4966_v48, 0.0  ;;  %v4968_v52 = vpop.f32.mrb[2].mxu1  ;;  %v4864_v53 = vpop.f32.mrb[3].mxu0  ;;  %vm4987_vm5 = vcmp.gt.f32.partialorder %v4862_v49, 0.0  ;;  %v5003_v54 = vmul.f32 0.3, %v4862_v49 }
 0x2e7   :  { %vm4989_vm6 = vcmp.gt.f32.partialorder %v4968_v52, 0.0  ;;  %v5005_v55 = vmul.f32 0.3, %v4968_v52  ;;  %v5017_v56 = vsel %vm4985_vm2, %v4964_v45, %v5001_v47  ;;  %v5002_v57 = vmul.f32 0.3, %v4966_v48  ;;  %v4970_v59 = vpop.f32.mrb[3].mxu1 }
 0x2e8   :  { %vm4988_vm7 = vcmp.gt.f32.partialorder %v4864_v53, 0.0  ;;  %v5004_v58 = vmul.f32 0.3, %v4864_v53  ;;  %v5019_v60 = vsel %vm4987_vm5, %v4862_v49, %v5003_v54  ;;  %vm4990_vm8 = vcmp.gt.f32.partialorder %v4970_v59, 0.0 }
 0x2e9   :  { %v5021_v61 = vsel %vm4989_vm6, %v4968_v52, %v5005_v55  ;;  %v5006_v62 = vmul.f32 0.3, %v4970_v59  ;;  %v5016_v63 = vsel %vm4984_vm3, %v4860_v46, %v5000_v51  ;;  %v5031_v0 = vpack.c.bf16 %v5019_v60, %v5015_v50 }
 0x2ea   :  { %v5033_v1 = vpack.c.bf16 %v5021_v61, %v5017_v56  ;;  %v5020_v2 = vsel %vm4988_vm7, %v4864_v53, %v5004_v58  ;;  %v5018_v9 = vsel %vm4986_vm4, %v4966_v48, %v5002_v57 }
 0x2eb   :  { %v4868_v3 = vpop.f32.mrb[4].mxu0  ;;  %v5022_v4 = vsel %vm4990_vm8, %v4970_v59, %v5006_v62  ;;  %v4974_v6 = vpop.f32.mrb[4].mxu1  ;;  %v5032_v8 = vpack.c.bf16 %v5020_v2, %v5016_v63 }
 0x2ec   :  { %vm4991_vm9 = vcmp.gt.f32.partialorder %v4868_v3, 0.0  ;;  %v5007_v5 = vmul.f32 0.3, %v4868_v3  ;;  %v4870_v7 = vpop.f32.mrb[5].mxu0  ;;  %v5009_v10 = vmul.f32 0.3, %v4974_v6  ;;  %v5034_v12 = vpack.c.bf16 %v5022_v4, %v5018_v9 }
 0x2ed   :  { %vm4993_vm10 = vcmp.gt.f32.partialorder %v4974_v6, 0.0  ;;  %vm4992_vm11 = vcmp.gt.f32.partialorder %v4870_v7, 0.0  ;;  %v4976_v11 = vpop.f32.mrb[5].mxu1  ;;  %5327 = vmatprep.mubr.bf16.mxu0 %v5032_v8  ;;  %v4872_v13 = vpop.f32.mrb[6].mxu0  ;;  %v5008_v15 = vmul.f32 0.3, %v4870_v7 }
 0x2ee   :  { %v5023_v14 = vsel %vm4991_vm9, %v4868_v3, %v5007_v5  ;;  %v5010_v16 = vmul.f32 0.3, %v4976_v11  ;;  %v4978_v17 = vpop.f32.mrb[6].mxu1  ;;  %5328 = vmatmul.mubr.bf16.vlgmr.msra.gmra.mrb[8].mxu0 %v5031_v0  ;;  %v4874_v18 = vpop.f32.mrb[7].mxu0  ;;  %5376 = vmatprep.mubr.bf16.mxu1 %v5034_v12  ;;  %vm4995_vm12 = vcmp.gt.f32.partialorder %v4872_v13, 0.0  ;;  %v5025_v21 = vsel %vm4993_vm10, %v4974_v6, %v5009_v10 }
 0x2ef   :  { %v5011_v19 = vmul.f32 0.3, %v4872_v13  ;;  %vm4997_vm13 = vcmp.gt.f32.partialorder %v4978_v17, 0.0  ;;  %v5013_v20 = vmul.f32 0.3, %v4978_v17  ;;  %vm4994_vm14 = vcmp.gt.f32.partialorder %v4976_v11, 0.0  ;;  %5377 = vmatmul.mubr.bf16.vlgmr.msra.gmra.mrb[8].mxu1 %v5033_v1 }
 0x2f0   :  { %vm4996_vm15 = vcmp.gt.f32.partialorder %v4874_v18, 0.0  ;;  %v5012_v22 = vmul.f32 0.3, %v4874_v18  ;;  %v4980_v23 = vpop.f32.mrb[7].mxu1  ;;  %v5024_v27 = vsel %vm4992_vm11, %v4870_v7, %v5008_v15  ;;  %v5026_v31 = vsel %vm4994_vm14, %v4976_v11, %v5010_v16 }
 0x2f1   :  { %v5027_v24 = vsel %vm4995_vm12, %v4872_v13, %v5011_v19  ;;  %v5029_v25 = vsel %vm4997_vm13, %v4978_v17, %v5013_v20  ;;  %vm4998_vm0 = vcmp.gt.f32.partialorder %v4980_v23, 0.0  ;;  %v5014_v26 = vmul.f32 0.3, %v4980_v23 }
 0x2f2   :  { %v5028_v28 = vsel %vm4996_vm15, %v4874_v18, %v5012_v22  ;;  %v5035_v29 = vpack.c.bf16 %v5027_v24, %v5023_v14  ;;  %v5037_v30 = vpack.c.bf16 %v5029_v25, %v5025_v21 }
 0x2f3   :  { %v5030_v32 = vsel %vm4998_vm0, %v4980_v23, %v5014_v26  ;;  %v5036_v33 = vpack.c.bf16 %v5028_v28, %v5024_v27 }
 0x2f4   :  { %v5038_v34 = vpack.c.bf16 %v5030_v32, %v5026_v31 }
 0x2f5   :  { %5335 = vmatprep.mubr.bf16.mxu0 %v5036_v33 }
 0x2f6   :  { %5384 = vmatprep.mubr.bf16.mxu1 %v5038_v34  ;;  %5336 = vmatmul.mubr.bf16.gmra.mrb[12].mxu0 %v5035_v29  ;;  %v7401_v29 = vld [vmem:[%s9429_s3] ss:$0 sm:$0xff] }
 0x2f7   :  { %5385 = vmatmul.mubr.bf16.gmra.mrb[12].mxu1 %v5037_v30  ;;  %v7402_v34 = vld [vmem:[#allocation8] ss:$0 sm:$0xff] }
 0x3c1   :  { %v7453_v35 = vpop.f32.mrb[8].mxu0 }
 0x3c2   :  { %v7454_v36 = vpop.f32.mrb[9].mxu0  ;;  %v7481_v37 = vpop.f32.mrb[8].mxu1 }
 0x3c3   :  { %v7455_v38 = vadd.f32 %v7454_v36, %v7453_v35  ;;  %v7456_v39 = vpop.f32.mrb[10].mxu0  ;;  %v7482_v40 = vpop.f32.mrb[9].mxu1 }
 0x3c4   :  { %v7457_v41 = vpop.f32.mrb[11].mxu0  ;;  %v7483_v42 = vadd.f32 %v7482_v40, %v7481_v37  ;;  %v7484_v43 = vpop.f32.mrb[10].mxu1 }
 0x3c5   :  { %v7458_v44 = vadd.f32 %v7457_v41, %v7456_v39  ;;  %v7485_v45 = vpop.f32.mrb[11].mxu1 }
 0x3c6   :  { %v5379_v46 = vadd.f32 %v7483_v42, %v7455_v38  ;;  %v7486_v47 = vadd.f32 %v7485_v45, %v7484_v43 }
 0x3c8   :  { %v5382_v48 = vadd.f32 %v7486_v47, %v7458_v44 }
 0x3c9   :  { %v7459_v49 = vpop.f32.mrb[12].mxu0 }
 0x3ca   :  { %v7460_v50 = vpop.f32.mrb[13].mxu0  ;;  %v5393_v51 = vadd.f32 %v5382_v48, %v5379_v46  ;;  %v7487_v52 = vpop.f32.mrb[12].mxu1 }
 0x3cb   :  { %v7461_v53 = vadd.f32 %v7460_v50, %v7459_v49  ;;  %v7462_v54 = vpop.f32.mrb[14].mxu0  ;;  %v7488_v55 = vpop.f32.mrb[13].mxu1 }
 0x3cc   :  { %v7463_v56 = vpop.f32.mrb[15].mxu0  ;;  %v7489_v57 = vadd.f32 %v7488_v55, %v7487_v52  ;;  %v7490_v58 = vpop.f32.mrb[14].mxu1 }
 0x3cd   :  { %v7464_v59 = vadd.f32 %v7463_v56, %v7462_v54  ;;  %v7491_v60 = vpop.f32.mrb[15].mxu1 }
 0x3ce   :  { %v5387_v61 = vadd.f32 %v7489_v57, %v7461_v53  ;;  %v7492_v62 = vadd.f32 %v7491_v60, %v7490_v58 }
 0x3d0   :  { %v5394_v63 = vadd.f32 %v5393_v51, %v5387_v61  ;;  %v5390_v0 = vadd.f32 %v7492_v62, %v7464_v59 }
 0x3d2   :  { %v5395_v1 = vadd.f32 %v5394_v63, %v5390_v0 }
 0x3d4   :  { %v5396_v2 = vrot.slane %v5395_v1, 4 }
 0x3d6   :  { %v5397_v3 = vadd.f32 %v5396_v2, %v5395_v1 }
 0x3d8   :  { %v5398_v4 = vrot.slane %v5397_v3, 2 }
 0x3da   :  { %v5399_v5 = vadd.f32 %v5398_v4, %v5397_v3 }
 0x3dc   :  { %v5400_v6 = vrot.slane %v5399_v5, 1 }
 0x3de   :  { %v5401_v7 = vadd.f32 %v5400_v6, %v5399_v5 }
 0x3e0   :  { %v5403_v8 = vmul.f32 0.03125, %v5401_v7 }
 0x3e2   :  { %v5404_v9 = vsub.f32 %v5379_v46, %v5403_v8  ;;  %v5405_v10 = vsub.f32 %v5382_v48, %v5403_v8  ;;  %v5406_v11 = vsub.f32 %v5387_v61, %v5403_v8  ;;  %v5407_v12 = vsub.f32 %v5390_v0, %v5403_v8 }
 0x3e4   :  { %v5408_v13 = vmul.f32 %v5404_v9, %v5404_v9  ;;  %v5409_v14 = vmul.f32 %v5405_v10, %v5405_v10  ;;  %v5410_v15 = vmul.f32 %v5406_v11, %v5406_v11  ;;  %v5411_v17 = vmul.f32 %v5407_v12, %v5407_v12 }
 0x3e6   :  { %v5412_v16 = vadd.f32 %v5409_v14, %v5408_v13 }
 0x3e8   :  { %v5413_v18 = vadd.f32 %v5412_v16, %v5410_v15 }
 0x3ea   :  { %v5414_v19 = vadd.f32 %v5413_v18, %v5411_v17 }
 0x3ec   :  { %v5415_v20 = vrot.slane %v5414_v19, 4 }
 0x3ee   :  { %v5416_v21 = vadd.f32 %v5415_v20, %v5414_v19 }
 0x3f0   :  { %v5417_v22 = vrot.slane %v5416_v21, 2 }
 0x3f2   :  { %v5418_v23 = vadd.f32 %v5417_v22, %v5416_v21 }
 0x3f4   :  { %v5419_v24 = vrot.slane %v5418_v23, 1 }
 0x3f6   :  { %v5420_v25 = vadd.f32 %v5419_v24, %v5418_v23 }
 0x3f8   :  { %v5421_v26 = vmul.f32 0.03125, %v5420_v25 }
 0x3fa   :  { %v5422_v27 = vadd.f32 1e-05, %v5421_v26 }
 0x3fc   :  { %7794 = vrsqrt.f32 %v5422_v27 }
 0x406   :  { %v7795_v28 = vpop.eup %7794 }
 0x407   :  { %v5424_v30 = vmul.f32 %v7795_v28, %v5404_v9  ;;  %v5425_v31 = vmul.f32 %v7795_v28, %v5405_v10  ;;  %v5426_v32 = vmul.f32 %v7795_v28, %v5406_v11  ;;  %v5427_v33 = vmul.f32 %v7795_v28, %v5407_v12 }
 0x409   :  { %v5435_v35 = vmul.f32 %v7401_v29, %v5424_v30  ;;  %v5436_v36 = vmul.f32 %v7401_v29, %v5425_v31  ;;  %v5437_v37 = vmul.f32 %v7401_v29, %v5426_v32  ;;  %v5438_v38 = vmul.f32 %v7401_v29, %v5427_v33 }
 0x40b   :  { %v5446_v39 = vadd.f32 %v7402_v34, %v5435_v35  ;;  %v5447_v40 = vadd.f32 %v7402_v34, %v5436_v36  ;;  %v5448_v41 = vadd.f32 %v7402_v34, %v5437_v37  ;;  %v5449_v42 = vadd.f32 %v7402_v34, %v5438_v38 }
 0x40d   :  { %vm5450_vm1 = vcmp.gt.f32.partialorder %v5446_v39, 0.0  ;;  %vm5451_vm2 = vcmp.gt.f32.partialorder %v5447_v40, 0.0  ;;  %vm5452_vm3 = vcmp.gt.f32.partialorder %v5448_v41, 0.0  ;;  %vm5453_vm4 = vcmp.gt.f32.partialorder %v5449_v42, 0.0 }
 0x40e   :  { %v5454_v43 = vmul.f32 0.3, %v5446_v39  ;;  %v5455_v44 = vmul.f32 0.3, %v5447_v40  ;;  %v5456_v45 = vmul.f32 0.3, %v5448_v41 }
 0x40f   :  { %v5457_v46 = vmul.f32 0.3, %v5449_v42 }
 0x410   :  { %v5458_v47 = vsel %vm5450_vm1, %v5446_v39, %v5454_v43  ;;  %v5459_v48 = vsel %vm5451_vm2, %v5447_v40, %v5455_v44  ;;  %v5460_v49 = vsel %vm5452_vm3, %v5448_v41, %v5456_v45 }
 0x411   :  { %v5461_v50 = vsel %vm5453_vm4, %v5449_v42, %v5457_v46  ;;  %5462 = vst [vmem:[#allocation3] sm:$0xff] %v5458_v47  ;;  %5463 = vst [vmem:[#allocation3 + $0x8] sm:$0xff] %v5459_v48 }
 0x412   :  { %5464 = vst [vmem:[#allocation3 + $0x10] sm:$0xff] %v5460_v49  ;;  %5465 = vst [vmem:[#allocation3 + $0x18] sm:$0xff] %v5461_v50 }
 0x418   :  { %v9328_v51 = vld [vmem:[#allocation3] sm:$0x3]  ;;  %v5467_v52 = vld [vmem:[#allocation3 + $0x2] sm:$0x3]  ;;  %v9330_v53 = vld [vmem:[#allocation3 + $0x4] sm:$0x3] }
 0x419   :  { %v9332_v54 = vld [vmem:[#allocation3 + $0x6] sm:$0x3]  ;;  %v9334_v55 = vld [vmem:[#allocation3 + $0x8] sm:$0x3]  ;;  %v9336_v56 = vld [vmem:[#allocation3 + $0xa] sm:$0x3] }
 0x41a   :  { %v9338_v57 = vld [vmem:[#allocation3 + $0xc] sm:$0x3]  ;;  %v9340_v58 = vld [vmem:[#allocation3 + $0xe] sm:$0x3]  ;;  %v9342_v59 = vld [vmem:[#allocation3 + $0x10] sm:$0x3] }
 0x41b   :  { %v9344_v60 = vld [vmem:[#allocation3 + $0x12] sm:$0x3]  ;;  %v9346_v61 = vld [vmem:[#allocation3 + $0x14] sm:$0x3]  ;;  %v9348_v62 = vld [vmem:[#allocation3 + $0x16] sm:$0x3] }
 0x41c   :  { %v9350_v63 = vld [vmem:[#allocation3 + $0x18] sm:$0x3]  ;;  %v9352_v0 = vld [vmem:[#allocation3 + $0x1a] sm:$0x3]  ;;  %v9354_v1 = vld [vmem:[#allocation3 + $0x1c] sm:$0x3] }
 0x41d   :  { %v9356_v2 = vld [vmem:[#allocation3 + $0x1e] sm:$0x3] }
 0x41e   :  { %7990 = dma.done.wait [#allocation4], 65536 }
 0x41f   :  { %7991 = vsyncadd [#allocation4], 4294901760  ;;  %v5487_v3 = vpack.c.bf16 %v5467_v52, %v5467_v52  ;;  %v5503_v4 = vld [vmem:[#allocation2 + $0x8] sm:$0xff]  ;;  %v5505_v5 = vld [vmem:[#allocation2 + $0x18] sm:$0xff]  ;;  %vm6670_vm5 = vcmask 1041408  }
 0x420   :  { %v5502_v6 = vld [vmem:[#allocation2] sm:$0xff]  ;;  %6014 = vmatprep.subr.bf16.mxu0 %v5503_v4  ;;  %6342 = vmatprep.subr.bf16.mxu1 %v5505_v5  ;;  %v5504_v7 = vld [vmem:[#allocation2 + $0x10] sm:$0xff]  ;;  %v5507_v8 = vld [vmem:[#allocation2 + $0x28] sm:$0xff] }
 0x421   :  { %6046 = vmatprep.mubr.bf16.mxu0 %v5487_v3  ;;  %6374 = vmatprep.mubr.bf16.mxu1 %v5487_v3  ;;  %v5509_v9 = vld [vmem:[#allocation2 + $0x38] sm:$0xff]  ;;  %v5506_v10 = vld [vmem:[#allocation2 + $0x20] sm:$0xff]  ;;  %v5508_v11 = vld [vmem:[#allocation2 + $0x30] sm:$0xff] }
 0x422   :  { %6015 = vmatpush1.bf16.msra.mxu0 %v5502_v6  ;;  %6343 = vmatpush1.bf16.msra.mxu1 %v5504_v7  ;;  %v5511_v12 = vld [vmem:[#allocation2 + $0x48] sm:$0xff]  ;;  %v5513_v13 = vld [vmem:[#allocation2 + $0x58] sm:$0xff]  ;;  %v5510_v14 = vld [vmem:[#allocation2 + $0x40] sm:$0xff] }
 0x423   :  { %6016 = vmatprep.subr.bf16.mxu0 %v5507_v8  ;;  %6344 = vmatprep.subr.bf16.mxu1 %v5509_v9  ;;  %v5512_v15 = vld [vmem:[#allocation2 + $0x50] sm:$0xff]  ;;  %v5515_v16 = vld [vmem:[#allocation2 + $0x68] sm:$0xff]  ;;  %v5517_v17 = vld [vmem:[#allocation2 + $0x78] sm:$0xff] }
 0x424   :  { %v5514_v18 = vld [vmem:[#allocation2 + $0x60] sm:$0xff]  ;;  %v5516_v19 = vld [vmem:[#allocation2 + $0x70] sm:$0xff]  ;;  %v5519_v20 = vld [vmem:[#allocation2 + $0x88] sm:$0xff] }
 0x425   :  { %v5521_v21 = vld [vmem:[#allocation2 + $0x98] sm:$0xff]  ;;  %v5518_v22 = vld [vmem:[#allocation2 + $0x80] sm:$0xff]  ;;  %v5520_v23 = vld [vmem:[#allocation2 + $0x90] sm:$0xff] }
 0x426   :  { %6017 = vmatpush1.bf16.msra.mxu0 %v5506_v10  ;;  %6345 = vmatpush1.bf16.msra.mxu1 %v5508_v11  ;;  %v5523_v24 = vld [vmem:[#allocation2 + $0xa8] sm:$0xff]  ;;  %v5525_v25 = vld [vmem:[#allocation2 + $0xb8] sm:$0xff]  ;;  %v5522_v26 = vld [vmem:[#allocation2 + $0xa0] sm:$0xff] }
 0x427   :  { %6018 = vmatprep.subr.bf16.mxu0 %v5511_v12  ;;  %6346 = vmatprep.subr.bf16.mxu1 %v5513_v13  ;;  %v5524_v27 = vld [vmem:[#allocation2 + $0xb0] sm:$0xff]  ;;  %v5527_v28 = vld [vmem:[#allocation2 + $0xc8] sm:$0xff]  ;;  %v5529_v29 = vld [vmem:[#allocation2 + $0xd8] sm:$0xff] }
 0x428   :  { %v5526_v30 = vld [vmem:[#allocation2 + $0xc0] sm:$0xff]  ;;  %v5528_v31 = vld [vmem:[#allocation2 + $0xd0] sm:$0xff]  ;;  %v5531_v32 = vld [vmem:[#allocation2 + $0xe8] sm:$0xff] }
 0x429   :  { %v5533_v33 = vld [vmem:[#allocation2 + $0xf8] sm:$0xff]  ;;  %v5530_v34 = vld [vmem:[#allocation2 + $0xe0] sm:$0xff]  ;;  %v5532_v35 = vld [vmem:[#allocation2 + $0xf0] sm:$0xff] }
 0x42a   :  { %6019 = vmatpush1.bf16.msra.mxu0 %v5510_v14  ;;  %6347 = vmatpush1.bf16.msra.mxu1 %v5512_v15  ;;  %v5535_v36 = vld [vmem:[#allocation2 + $0x108] sm:$0xff]  ;;  %v5537_v37 = vld [vmem:[#allocation2 + $0x118] sm:$0xff]  ;;  %v5534_v38 = vld [vmem:[#allocation2 + $0x100] sm:$0xff] }
 0x42b   :  { %6020 = vmatprep.subr.bf16.mxu0 %v5515_v16  ;;  %6348 = vmatprep.subr.bf16.mxu1 %v5517_v17  ;;  %v5536_v39 = vld [vmem:[#allocation2 + $0x110] sm:$0xff]  ;;  %v5539_v40 = vld [vmem:[#allocation2 + $0x128] sm:$0xff]  ;;  %v5541_v41 = vld [vmem:[#allocation2 + $0x138] sm:$0xff] }
 0x42c   :  { %v5538_v42 = vld [vmem:[#allocation2 + $0x120] sm:$0xff]  ;;  %v5540_v43 = vld [vmem:[#allocation2 + $0x130] sm:$0xff]  ;;  %v5543_v44 = vld [vmem:[#allocation2 + $0x148] sm:$0xff] }
 0x42d   :  { %v5545_v45 = vld [vmem:[#allocation2 + $0x158] sm:$0xff]  ;;  %v5542_v46 = vld [vmem:[#allocation2 + $0x140] sm:$0xff]  ;;  %v5544_v47 = vld [vmem:[#allocation2 + $0x150] sm:$0xff] }
 0x42e   :  { %6021 = vmatpush1.bf16.msra.mxu0 %v5514_v18  ;;  %6349 = vmatpush1.bf16.msra.mxu1 %v5516_v19  ;;  %v5547_v48 = vld [vmem:[#allocation2 + $0x168] sm:$0xff]  ;;  %v5549_v49 = vld [vmem:[#allocation2 + $0x178] sm:$0xff]  ;;  %v5546_v50 = vld [vmem:[#allocation2 + $0x160] sm:$0xff] }
 0x42f   :  { %6022 = vmatprep.subr.bf16.mxu0 %v5519_v20  ;;  %6350 = vmatprep.subr.bf16.mxu1 %v5521_v21  ;;  %v5548_v52 = vld [vmem:[#allocation2 + $0x170] sm:$0xff]  ;;  %v5551_v3 = vld [vmem:[#allocation2 + $0x188] sm:$0xff]  ;;  %v5553_v4 = vld [vmem:[#allocation2 + $0x198] sm:$0xff]  ;;  %v5486_v21 = vpack.c.bf16 %v9328_v51, %v9328_v51 }
 0x430   :  { %v5550_v5 = vld [vmem:[#allocation2 + $0x180] sm:$0xff]  ;;  %v5552_v6 = vld [vmem:[#allocation2 + $0x190] sm:$0xff]  ;;  %v5555_v7 = vld [vmem:[#allocation2 + $0x1a8] sm:$0xff] }
 0x431   :  { %v5557_v8 = vld [vmem:[#allocation2 + $0x1b8] sm:$0xff]  ;;  %v5554_v9 = vld [vmem:[#allocation2 + $0x1a0] sm:$0xff]  ;;  %v5556_v10 = vld [vmem:[#allocation2 + $0x1b0] sm:$0xff] }
 0x432   :  { %6023 = vmatpush1.bf16.msra.mxu0 %v5518_v22  ;;  %6351 = vmatpush1.bf16.msra.mxu1 %v5520_v23  ;;  %v5559_v11 = vld [vmem:[#allocation2 + $0x1c8] sm:$0xff]  ;;  %v5561_v12 = vld [vmem:[#allocation2 + $0x1d8] sm:$0xff]  ;;  %v5558_v13 = vld [vmem:[#allocation2 + $0x1c0] sm:$0xff] }
 0x433   :  { %6024 = vmatprep.subr.bf16.mxu0 %v5523_v24  ;;  %6352 = vmatprep.subr.bf16.mxu1 %v5525_v25  ;;  %v5560_v14 = vld [vmem:[#allocation2 + $0x1d0] sm:$0xff]  ;;  %v5563_v15 = vld [vmem:[#allocation2 + $0x1e8] sm:$0xff]  ;;  %v5565_v16 = vld [vmem:[#allocation2 + $0x1f8] sm:$0xff] }
 0x434   :  { %v5562_v17 = vld [vmem:[#allocation2 + $0x1e0] sm:$0xff]  ;;  %v5564_v18 = vld [vmem:[#allocation2 + $0x1f0] sm:$0xff]  ;;  %v5567_v19 = vld [vmem:[#allocation2 + $0x208] sm:$0xff] }
 0x435   :  { %v5569_v20 = vld [vmem:[#allocation2 + $0x218] sm:$0xff]  ;;  %v5566_v22 = vld [vmem:[#allocation2 + $0x200] sm:$0xff]  ;;  %v5568_v23 = vld [vmem:[#allocation2 + $0x210] sm:$0xff] }
 0x436   :  { %6025 = vmatpush1.bf16.msra.mxu0 %v5522_v26  ;;  %6353 = vmatpush1.bf16.msra.mxu1 %v5524_v27  ;;  %v5571_v24 = vld [vmem:[#allocation2 + $0x228] sm:$0xff]  ;;  %v5573_v25 = vld [vmem:[#allocation2 + $0x238] sm:$0xff]  ;;  %v5489_v26 = vpack.c.bf16 %v9332_v54, %v9332_v54  ;;  %v5570_v27 = vld [vmem:[#allocation2 + $0x220] sm:$0xff] }
 0x437   :  { %6026 = vmatprep.subr.bf16.mxu0 %v5527_v28  ;;  %6354 = vmatprep.subr.bf16.mxu1 %v5529_v29  ;;  %v5572_v28 = vld [vmem:[#allocation2 + $0x230] sm:$0xff]  ;;  %v5575_v51 = vld [vmem:[#allocation2 + $0x248] sm:$0xff]  ;;  %v5577_v29 = vld [vmem:[#allocation2 + $0x258] sm:$0xff] }
 0x438   :  { %v5581_v54 = vld [vmem:[#allocation2 + $0x278] sm:$0xff] }
 0x43a   :  { %6027 = vmatpush1.bf16.msra.mxu0 %v5526_v30  ;;  %6355 = vmatpush1.bf16.msra.mxu1 %v5528_v31  ;;  %v5574_v30 = vld [vmem:[#allocation2 + $0x240] sm:$0xff]  ;;  %v5576_v31 = vld [vmem:[#allocation2 + $0x250] sm:$0xff] }
 0x43b   :  { %6028 = vmatprep.subr.bf16.mxu0 %v5531_v32  ;;  %6356 = vmatprep.subr.bf16.mxu1 %v5533_v33  ;;  %v5579_v32 = vld [vmem:[#allocation2 + $0x268] sm:$0xff]  ;;  %v5578_v33 = vld [vmem:[#allocation2 + $0x260] sm:$0xff] }
 0x43e   :  { %6029 = vmatpush1.bf16.msra.mxu0 %v5530_v34  ;;  %6357 = vmatpush1.bf16.msra.mxu1 %v5532_v35  ;;  %v5580_v34 = vld [vmem:[#allocation2 + $0x270] sm:$0xff]  ;;  %v5583_v35 = vld [vmem:[#allocation2 + $0x288] sm:$0xff] }
 0x43f   :  { %6030 = vmatprep.subr.bf16.mxu0 %v5535_v36  ;;  %6358 = vmatprep.subr.bf16.mxu1 %v5537_v37  ;;  %v5585_v36 = vld [vmem:[#allocation2 + $0x298] sm:$0xff]  ;;  %v5582_v37 = vld [vmem:[#allocation2 + $0x280] sm:$0xff] }
 0x442   :  { %6031 = vmatpush1.bf16.msra.mxu0 %v5534_v38  ;;  %6359 = vmatpush1.bf16.msra.mxu1 %v5536_v39  ;;  %v5584_v38 = vld [vmem:[#allocation2 + $0x290] sm:$0xff]  ;;  %v5587_v39 = vld [vmem:[#allocation2 + $0x2a8] sm:$0xff] }
 0x443   :  { %6032 = vmatprep.subr.bf16.mxu0 %v5539_v40  ;;  %6360 = vmatprep.subr.bf16.mxu1 %v5541_v41  ;;  %v5589_v40 = vld [vmem:[#allocation2 + $0x2b8] sm:$0xff]  ;;  %v5586_v41 = vld [vmem:[#allocation2 + $0x2a0] sm:$0xff] }
 0x446   :  { %6033 = vmatpush1.bf16.msra.mxu0 %v5538_v42  ;;  %6361 = vmatpush1.bf16.msra.mxu1 %v5540_v43  ;;  %v5588_v42 = vld [vmem:[#allocation2 + $0x2b0] sm:$0xff]  ;;  %v5591_v43 = vld [vmem:[#allocation2 + $0x2c8] sm:$0xff] }
 0x447   :  { %6034 = vmatprep.subr.bf16.mxu0 %v5543_v44  ;;  %6362 = vmatprep.subr.bf16.mxu1 %v5545_v45  ;;  %v5593_v44 = vld [vmem:[#allocation2 + $0x2d8] sm:$0xff]  ;;  %v5590_v45 = vld [vmem:[#allocation2 + $0x2c0] sm:$0xff] }
 0x44a   :  { %6035 = vmatpush1.bf16.msra.mxu0 %v5542_v46  ;;  %6363 = vmatpush1.bf16.msra.mxu1 %v5544_v47  ;;  %v5592_v46 = vld [vmem:[#allocation2 + $0x2d0] sm:$0xff]  ;;  %v5595_v47 = vld [vmem:[#allocation2 + $0x2e8] sm:$0xff] }
 0x44b   :  { %6036 = vmatprep.subr.bf16.mxu0 %v5547_v48  ;;  %6364 = vmatprep.subr.bf16.mxu1 %v5549_v49  ;;  %v5597_v48 = vld [vmem:[#allocation2 + $0x2f8] sm:$0xff]  ;;  %v5594_v49 = vld [vmem:[#allocation2 + $0x2e0] sm:$0xff] }
 0x44e   :  { %6037 = vmatpush1.bf16.msra.mxu0 %v5546_v50  ;;  %6365 = vmatpush1.bf16.msra.mxu1 %v5548_v52  ;;  %v5596_v50 = vld [vmem:[#allocation2 + $0x2f0] sm:$0xff]  ;;  %v5599_v52 = vld [vmem:[#allocation2 + $0x308] sm:$0xff] }
 0x44f   :  { %6038 = vmatprep.subr.bf16.mxu0 %v5551_v3  ;;  %6366 = vmatprep.subr.bf16.mxu1 %v5553_v4  ;;  %v5601_v3 = vld [vmem:[#allocation2 + $0x318] sm:$0xff]  ;;  %v5598_v4 = vld [vmem:[#allocation2 + $0x300] sm:$0xff] }
 0x452   :  { %6039 = vmatpush1.bf16.msra.mxu0 %v5550_v5  ;;  %6367 = vmatpush1.bf16.msra.mxu1 %v5552_v6  ;;  %v5600_v5 = vld [vmem:[#allocation2 + $0x310] sm:$0xff]  ;;  %v5603_v6 = vld [vmem:[#allocation2 + $0x328] sm:$0xff] }
 0x453   :  { %6040 = vmatprep.subr.bf16.mxu0 %v5555_v7  ;;  %6368 = vmatprep.subr.bf16.mxu1 %v5557_v8  ;;  %v5605_v7 = vld [vmem:[#allocation2 + $0x338] sm:$0xff]  ;;  %v5602_v8 = vld [vmem:[#allocation2 + $0x320] sm:$0xff] }
 0x456   :  { %6041 = vmatpush1.bf16.msra.mxu0 %v5554_v9  ;;  %6369 = vmatpush1.bf16.msra.mxu1 %v5556_v10  ;;  %v5604_v9 = vld [vmem:[#allocation2 + $0x330] sm:$0xff]  ;;  %v5607_v10 = vld [vmem:[#allocation2 + $0x348] sm:$0xff] }
 0x457   :  { %6042 = vmatprep.subr.bf16.mxu0 %v5559_v11  ;;  %6370 = vmatprep.subr.bf16.mxu1 %v5561_v12  ;;  %v5609_v11 = vld [vmem:[#allocation2 + $0x358] sm:$0xff]  ;;  %v5606_v12 = vld [vmem:[#allocation2 + $0x340] sm:$0xff] }
 0x45a   :  { %6043 = vmatpush1.bf16.msra.mxu0 %v5558_v13  ;;  %6371 = vmatpush1.bf16.msra.mxu1 %v5560_v14  ;;  %v5608_v13 = vld [vmem:[#allocation2 + $0x350] sm:$0xff]  ;;  %v5611_v14 = vld [vmem:[#allocation2 + $0x368] sm:$0xff] }
 0x45b   :  { %6044 = vmatprep.subr.bf16.mxu0 %v5563_v15  ;;  %6372 = vmatprep.subr.bf16.mxu1 %v5565_v16  ;;  %v5613_v15 = vld [vmem:[#allocation2 + $0x378] sm:$0xff]  ;;  %v5610_v16 = vld [vmem:[#allocation2 + $0x360] sm:$0xff] }
 0x45e   :  { %6045 = vmatpush1.bf16.msra.mxu0 %v5562_v17  ;;  %6373 = vmatpush1.bf16.msra.mxu1 %v5564_v18  ;;  %v5612_v17 = vld [vmem:[#allocation2 + $0x370] sm:$0xff]  ;;  %v5615_v18 = vld [vmem:[#allocation2 + $0x388] sm:$0xff] }
 0x45f   :  { %6055 = vmatprep.subr.bf16.mxu0 %v5567_v19  ;;  %6383 = vmatprep.subr.bf16.mxu1 %v5569_v20  ;;  %v5617_v19 = vld [vmem:[#allocation2 + $0x398] sm:$0xff]  ;;  %v5614_v20 = vld [vmem:[#allocation2 + $0x380] sm:$0xff] }
 0x461   :  { %6047 = vmatmul.mubr.bf16.vlgmr.msra.gmra.mrb[16].mxu0 %v5486_v21  ;;  %6375 = vmatmul.mubr.bf16.vlgmr.msra.gmra.mrb[16].mxu1 %v5486_v21  ;;  %v5616_v21 = vld [vmem:[#allocation2 + $0x390] sm:$0xff] }
 0x462   :  { %6056 = vmatpush1.bf16.msra.mxu0 %v5566_v22  ;;  %6384 = vmatpush1.bf16.msra.mxu1 %v5568_v23  ;;  %v5619_v22 = vld [vmem:[#allocation2 + $0x3a8] sm:$0xff]  ;;  %v5621_v23 = vld [vmem:[#allocation2 + $0x3b8] sm:$0xff] }
 0x463   :  { %6057 = vmatprep.subr.bf16.mxu0 %v5571_v24  ;;  %6385 = vmatprep.subr.bf16.mxu1 %v5573_v25  ;;  %v5618_v24 = vld [vmem:[#allocation2 + $0x3a0] sm:$0xff]  ;;  %v5620_v25 = vld [vmem:[#allocation2 + $0x3b0] sm:$0xff] }
 0x464   :  { %6087 = vmatprep.mubr.bf16.mxu0 %v5489_v26  ;;  %6415 = vmatprep.mubr.bf16.mxu1 %v5489_v26  ;;  %v5623_v26 = vld [vmem:[#allocation2 + $0x3c8] sm:$0xff] }
 0x466   :  { %6058 = vmatpush1.bf16.msra.mxu0 %v5570_v27  ;;  %6386 = vmatpush1.bf16.msra.mxu1 %v5572_v28  ;;  %v5625_v27 = vld [vmem:[#allocation2 + $0x3d8] sm:$0xff]  ;;  %v5622_v28 = vld [vmem:[#allocation2 + $0x3c0] sm:$0xff] }
 0x467   :  { %6059 = vmatprep.subr.bf16.mxu0 %v5575_v51  ;;  %6387 = vmatprep.subr.bf16.mxu1 %v5577_v29  ;;  %v5624_v51 = vld [vmem:[#allocation2 + $0x3d0] sm:$0xff]  ;;  %v5627_v29 = vld [vmem:[#allocation2 + $0x3e8] sm:$0xff] }
 0x46a   :  { %6060 = vmatpush1.bf16.msra.mxu0 %v5574_v30  ;;  %6388 = vmatpush1.bf16.msra.mxu1 %v5576_v31  ;;  %v5629_v30 = vld [vmem:[#allocation2 + $0x3f8] sm:$0xff]  ;;  %v5626_v31 = vld [vmem:[#allocation2 + $0x3e0] sm:$0xff] }
 0x46b   :  { %6061 = vmatprep.subr.bf16.mxu0 %v5579_v32  ;;  %6389 = vmatprep.subr.bf16.mxu1 %v5581_v54  ;;  %v5628_v32 = vld [vmem:[#allocation2 + $0x3f0] sm:$0xff]  ;;  %v5631_v54 = vld [vmem:[#allocation2 + $0x408] sm:$0xff] }
 0x46e   :  { %6062 = vmatpush1.bf16.msra.mxu0 %v5578_v33  ;;  %6390 = vmatpush1.bf16.msra.mxu1 %v5580_v34  ;;  %v5633_v33 = vld [vmem:[#allocation2 + $0x418] sm:$0xff]  ;;  %v5488_v34 = vpack.c.bf16 %v9330_v53, %v9330_v53  ;;  %v5639_v53 = vld [vmem:[#allocation2 + $0x448] sm:$0xff] }
 0x46f   :  { %6063 = vmatprep.subr.bf16.mxu0 %v5583_v35  ;;  %6391 = vmatprep.subr.bf16.mxu1 %v5585_v36  ;;  %v5630_v35 = vld [vmem:[#allocation2 + $0x400] sm:$0xff]  ;;  %v5632_v36 = vld [vmem:[#allocation2 + $0x410] sm:$0xff] }
 0x472   :  { %6064 = vmatpush1.bf16.msra.mxu0 %v5582_v37  ;;  %6392 = vmatpush1.bf16.msra.mxu1 %v5584_v38  ;;  %v5635_v37 = vld [vmem:[#allocation2 + $0x428] sm:$0xff]  ;;  %v5637_v38 = vld [vmem:[#allocation2 + $0x438] sm:$0xff] }
 0x473   :  { %6065 = vmatprep.subr.bf16.mxu0 %v5587_v39  ;;  %6393 = vmatprep.subr.bf16.mxu1 %v5589_v40  ;;  %v5491_v39 = vpack.c.bf16 %v9336_v56, %v9336_v56  ;;  %v5634_v40 = vld [vmem:[#allocation2 + $0x420] sm:$0xff]  ;;  %v5645_v56 = vld [vmem:[#allocation2 + $0x478] sm:$0xff] }
 0x476   :  { %6066 = vmatpush1.bf16.msra.mxu0 %v5586_v41  ;;  %6394 = vmatpush1.bf16.msra.mxu1 %v5588_v42  ;;  %v5636_v41 = vld [vmem:[#allocation2 + $0x430] sm:$0xff]  ;;  %v5641_v42 = vld [vmem:[#allocation2 + $0x458] sm:$0xff] }
 0x477   :  { %6067 = vmatprep.subr.bf16.mxu0 %v5591_v43  ;;  %6395 = vmatprep.subr.bf16.mxu1 %v5593_v44  ;;  %v5638_v43 = vld [vmem:[#allocation2 + $0x440] sm:$0xff]  ;;  %v5640_v44 = vld [vmem:[#allocation2 + $0x450] sm:$0xff] }
 0x47a   :  { %6068 = vmatpush1.bf16.msra.mxu0 %v5590_v45  ;;  %6396 = vmatpush1.bf16.msra.mxu1 %v5592_v46  ;;  %v5643_v45 = vld [vmem:[#allocation2 + $0x468] sm:$0xff]  ;;  %v5642_v46 = vld [vmem:[#allocation2 + $0x460] sm:$0xff] }
 0x47b   :  { %6069 = vmatprep.subr.bf16.mxu0 %v5595_v47  ;;  %6397 = vmatprep.subr.bf16.mxu1 %v5597_v48  ;;  %v5644_v47 = vld [vmem:[#allocation2 + $0x470] sm:$0xff]  ;;  %v5647_v48 = vld [vmem:[#allocation2 + $0x488] sm:$0xff] }
 0x47e   :  { %6070 = vmatpush1.bf16.msra.mxu0 %v5594_v49  ;;  %6398 = vmatpush1.bf16.msra.mxu1 %v5596_v50  ;;  %v5649_v49 = vld [vmem:[#allocation2 + $0x498] sm:$0xff]  ;;  %v5646_v50 = vld [vmem:[#allocation2 + $0x480] sm:$0xff] }
 0x47f   :  { %6071 = vmatprep.subr.bf16.mxu0 %v5599_v52  ;;  %6399 = vmatprep.subr.bf16.mxu1 %v5601_v3  ;;  %v5648_v52 = vld [vmem:[#allocation2 + $0x490] sm:$0xff]  ;;  %v5651_v3 = vld [vmem:[#allocation2 + $0x4a8] sm:$0xff] }
 0x482   :  { %6072 = vmatpush1.bf16.msra.mxu0 %v5598_v4  ;;  %6400 = vmatpush1.bf16.msra.mxu1 %v5600_v5  ;;  %v5653_v4 = vld [vmem:[#allocation2 + $0x4b8] sm:$0xff]  ;;  %v5650_v5 = vld [vmem:[#allocation2 + $0x4a0] sm:$0xff] }
 0x483   :  { %6073 = vmatprep.subr.bf16.mxu0 %v5603_v6  ;;  %6401 = vmatprep.subr.bf16.mxu1 %v5605_v7  ;;  %v5652_v6 = vld [vmem:[#allocation2 + $0x4b0] sm:$0xff]  ;;  %v5655_v7 = vld [vmem:[#allocation2 + $0x4c8] sm:$0xff] }
 0x486   :  { %6074 = vmatpush1.bf16.msra.mxu0 %v5602_v8  ;;  %6402 = vmatpush1.bf16.msra.mxu1 %v5604_v9  ;;  %v5657_v8 = vld [vmem:[#allocation2 + $0x4d8] sm:$0xff]  ;;  %v5654_v9 = vld [vmem:[#allocation2 + $0x4c0] sm:$0xff] }
 0x487   :  { %6075 = vmatprep.subr.bf16.mxu0 %v5607_v10  ;;  %6403 = vmatprep.subr.bf16.mxu1 %v5609_v11  ;;  %v5656_v10 = vld [vmem:[#allocation2 + $0x4d0] sm:$0xff]  ;;  %v5659_v11 = vld [vmem:[#allocation2 + $0x4e8] sm:$0xff] }
 0x48a   :  { %6076 = vmatpush1.bf16.msra.mxu0 %v5606_v12  ;;  %6404 = vmatpush1.bf16.msra.mxu1 %v5608_v13  ;;  %v5661_v12 = vld [vmem:[#allocation2 + $0x4f8] sm:$0xff]  ;;  %v5658_v13 = vld [vmem:[#allocation2 + $0x4e0] sm:$0xff] }
 0x48b   :  { %6077 = vmatprep.subr.bf16.mxu0 %v5611_v14  ;;  %6405 = vmatprep.subr.bf16.mxu1 %v5613_v15  ;;  %v5660_v14 = vld [vmem:[#allocation2 + $0x4f0] sm:$0xff]  ;;  %v5663_v15 = vld [vmem:[#allocation2 + $0x508] sm:$0xff] }
 0x48e   :  { %6078 = vmatpush1.bf16.msra.mxu0 %v5610_v16  ;;  %6406 = vmatpush1.bf16.msra.mxu1 %v5612_v17  ;;  %v5665_v16 = vld [vmem:[#allocation2 + $0x518] sm:$0xff]  ;;  %v5662_v17 = vld [vmem:[#allocation2 + $0x500] sm:$0xff] }
 0x48f   :  { %6079 = vmatprep.subr.bf16.mxu0 %v5615_v18  ;;  %6407 = vmatprep.subr.bf16.mxu1 %v5617_v19  ;;  %v5664_v18 = vld [vmem:[#allocation2 + $0x510] sm:$0xff]  ;;  %v5667_v19 = vld [vmem:[#allocation2 + $0x528] sm:$0xff] }
 0x492   :  { %6080 = vmatpush1.bf16.msra.mxu0 %v5614_v20  ;;  %6408 = vmatpush1.bf16.msra.mxu1 %v5616_v21  ;;  %v5669_v20 = vld [vmem:[#allocation2 + $0x538] sm:$0xff]  ;;  %v5666_v21 = vld [vmem:[#allocation2 + $0x520] sm:$0xff] }
 0x493   :  { %6081 = vmatprep.subr.bf16.mxu0 %v5619_v22  ;;  %6409 = vmatprep.subr.bf16.mxu1 %v5621_v23  ;;  %v5668_v22 = vld [vmem:[#allocation2 + $0x530] sm:$0xff]  ;;  %v5671_v23 = vld [vmem:[#allocation2 + $0x548] sm:$0xff] }
 0x496   :  { %6082 = vmatpush1.bf16.msra.mxu0 %v5618_v24  ;;  %6410 = vmatpush1.bf16.msra.mxu1 %v5620_v25  ;;  %v5673_v24 = vld [vmem:[#allocation2 + $0x558] sm:$0xff]  ;;  %v5670_v25 = vld [vmem:[#allocation2 + $0x540] sm:$0xff] }
 0x497   :  { %6083 = vmatprep.subr.bf16.mxu0 %v5623_v26  ;;  %6411 = vmatprep.subr.bf16.mxu1 %v5625_v27  ;;  %v5672_v26 = vld [vmem:[#allocation2 + $0x550] sm:$0xff]  ;;  %v5675_v27 = vld [vmem:[#allocation2 + $0x568] sm:$0xff] }
 0x49a   :  { %6084 = vmatpush1.bf16.msra.mxu0 %v5622_v28  ;;  %6412 = vmatpush1.bf16.msra.mxu1 %v5624_v51  ;;  %v5677_v28 = vld [vmem:[#allocation2 + $0x578] sm:$0xff]  ;;  %v5674_v51 = vld [vmem:[#allocation2 + $0x560] sm:$0xff] }
 0x49b   :  { %6085 = vmatprep.subr.bf16.mxu0 %v5627_v29  ;;  %6413 = vmatprep.subr.bf16.mxu1 %v5629_v30  ;;  %v5676_v29 = vld [vmem:[#allocation2 + $0x570] sm:$0xff]  ;;  %v5679_v30 = vld [vmem:[#allocation2 + $0x588] sm:$0xff] }
 0x49e   :  { %6086 = vmatpush1.bf16.msra.mxu0 %v5626_v31  ;;  %6414 = vmatpush1.bf16.msra.mxu1 %v5628_v32  ;;  %v5681_v31 = vld [vmem:[#allocation2 + $0x598] sm:$0xff]  ;;  %v5678_v32 = vld [vmem:[#allocation2 + $0x580] sm:$0xff] }
 0x49f   :  { %6096 = vmatprep.subr.bf16.mxu0 %v5631_v54  ;;  %6424 = vmatprep.subr.bf16.mxu1 %v5633_v33  ;;  %v5680_v54 = vld [vmem:[#allocation2 + $0x590] sm:$0xff]  ;;  %v5683_v33 = vld [vmem:[#allocation2 + $0x5a8] sm:$0xff] }
 0x4a1   :  { %6088 = vmatmul.mubr.bf16.vlgmr.msra.gmra.mrb[16].mxu0 %v5488_v34  ;;  %6416 = vmatmul.mubr.bf16.vlgmr.msra.gmra.mrb[16].mxu1 %v5488_v34  ;;  %v5685_v34 = vld [vmem:[#allocation2 + $0x5b8] sm:$0xff] }
 0x4a2   :  { %6097 = vmatpush1.bf16.msra.mxu0 %v5630_v35  ;;  %6425 = vmatpush1.bf16.msra.mxu1 %v5632_v36  ;;  %v5682_v35 = vld [vmem:[#allocation2 + $0x5a0] sm:$0xff]  ;;  %v5684_v36 = vld [vmem:[#allocation2 + $0x5b0] sm:$0xff] }
 0x4a3   :  { %6098 = vmatprep.subr.bf16.mxu0 %v5635_v37  ;;  %6426 = vmatprep.subr.bf16.mxu1 %v5637_v38  ;;  %v5687_v37 = vld [vmem:[#allocation2 + $0x5c8] sm:$0xff]  ;;  %v5689_v38 = vld [vmem:[#allocation2 + $0x5d8] sm:$0xff] }
 0x4a4   :  { %6128 = vmatprep.mubr.bf16.mxu0 %v5491_v39  ;;  %6456 = vmatprep.mubr.bf16.mxu1 %v5491_v39  ;;  %v5686_v39 = vld [vmem:[#allocation2 + $0x5c0] sm:$0xff] }
 0x4a6   :  { %6099 = vmatpush1.bf16.msra.mxu0 %v5634_v40  ;;  %6427 = vmatpush1.bf16.msra.mxu1 %v5636_v41  ;;  %v5688_v40 = vld [vmem:[#allocation2 + $0x5d0] sm:$0xff]  ;;  %v5691_v41 = vld [vmem:[#allocation2 + $0x5e8] sm:$0xff] }
 0x4a7   :  { %6100 = vmatprep.subr.bf16.mxu0 %v5639_v53  ;;  %6428 = vmatprep.subr.bf16.mxu1 %v5641_v42  ;;  %v5693_v53 = vld [vmem:[#allocation2 + $0x5f8] sm:$0xff]  ;;  %v5690_v42 = vld [vmem:[#allocation2 + $0x5e0] sm:$0xff] }
 0x4aa   :  { %6101 = vmatpush1.bf16.msra.mxu0 %v5638_v43  ;;  %6429 = vmatpush1.bf16.msra.mxu1 %v5640_v44  ;;  %v5692_v43 = vld [vmem:[#allocation2 + $0x5f0] sm:$0xff]  ;;  %v5695_v44 = vld [vmem:[#allocation2 + $0x608] sm:$0xff] }
 0x4ab   :  { %6102 = vmatprep.subr.bf16.mxu0 %v5643_v45  ;;  %6430 = vmatprep.subr.bf16.mxu1 %v5645_v56  ;;  %v5697_v45 = vld [vmem:[#allocation2 + $0x618] sm:$0xff]  ;;  %v5490_v56 = vpack.c.bf16 %v9334_v55, %v9334_v55  ;;  %v5703_v55 = vld [vmem:[#allocation2 + $0x648] sm:$0xff] }
 0x4ae   :  { %6103 = vmatpush1.bf16.msra.mxu0 %v5642_v46  ;;  %6431 = vmatpush1.bf16.msra.mxu1 %v5644_v47  ;;  %v5694_v46 = vld [vmem:[#allocation2 + $0x600] sm:$0xff]  ;;  %v5696_v47 = vld [vmem:[#allocation2 + $0x610] sm:$0xff] }
 0x4af   :  { %6104 = vmatprep.subr.bf16.mxu0 %v5647_v48  ;;  %6432 = vmatprep.subr.bf16.mxu1 %v5649_v49  ;;  %v5699_v48 = vld [vmem:[#allocation2 + $0x628] sm:$0xff]  ;;  %v5701_v49 = vld [vmem:[#allocation2 + $0x638] sm:$0xff] }
 0x4b2   :  { %6105 = vmatpush1.bf16.msra.mxu0 %v5646_v50  ;;  %6433 = vmatpush1.bf16.msra.mxu1 %v5648_v52  ;;  %v5493_v50 = vpack.c.bf16 %v9340_v58, %v9340_v58  ;;  %v5698_v52 = vld [vmem:[#allocation2 + $0x620] sm:$0xff]  ;;  %v5709_v58 = vld [vmem:[#allocation2 + $0x678] sm:$0xff] }
 0x4b3   :  { %6106 = vmatprep.subr.bf16.mxu0 %v5651_v3  ;;  %6434 = vmatprep.subr.bf16.mxu1 %v5653_v4  ;;  %v5700_v3 = vld [vmem:[#allocation2 + $0x630] sm:$0xff]  ;;  %v5705_v4 = vld [vmem:[#allocation2 + $0x658] sm:$0xff] }
 0x4b6   :  { %6107 = vmatpush1.bf16.msra.mxu0 %v5650_v5  ;;  %6435 = vmatpush1.bf16.msra.mxu1 %v5652_v6  ;;  %v5702_v5 = vld [vmem:[#allocation2 + $0x640] sm:$0xff]  ;;  %v5704_v6 = vld [vmem:[#allocation2 + $0x650] sm:$0xff] }
 0x4b7   :  { %6108 = vmatprep.subr.bf16.mxu0 %v5655_v7  ;;  %6436 = vmatprep.subr.bf16.mxu1 %v5657_v8  ;;  %v5707_v7 = vld [vmem:[#allocation2 + $0x668] sm:$0xff]  ;;  %v5706_v8 = vld [vmem:[#allocation2 + $0x660] sm:$0xff] }
 0x4ba   :  { %6109 = vmatpush1.bf16.msra.mxu0 %v5654_v9  ;;  %6437 = vmatpush1.bf16.msra.mxu1 %v5656_v10  ;;  %v5708_v9 = vld [vmem:[#allocation2 + $0x670] sm:$0xff]  ;;  %v5711_v10 = vld [vmem:[#allocation2 + $0x688] sm:$0xff] }
 0x4bb   :  { %6110 = vmatprep.subr.bf16.mxu0 %v5659_v11  ;;  %6438 = vmatprep.subr.bf16.mxu1 %v5661_v12  ;;  %v5713_v11 = vld [vmem:[#allocation2 + $0x698] sm:$0xff]  ;;  %v5710_v12 = vld [vmem:[#allocation2 + $0x680] sm:$0xff] }
 0x4be   :  { %6111 = vmatpush1.bf16.msra.mxu0 %v5658_v13  ;;  %6439 = vmatpush1.bf16.msra.mxu1 %v5660_v14  ;;  %v5712_v13 = vld [vmem:[#allocation2 + $0x690] sm:$0xff]  ;;  %v5715_v14 = vld [vmem:[#allocation2 + $0x6a8] sm:$0xff] }
 0x4bf   :  { %6112 = vmatprep.subr.bf16.mxu0 %v5663_v15  ;;  %6440 = vmatprep.subr.bf16.mxu1 %v5665_v16  ;;  %v5717_v15 = vld [vmem:[#allocation2 + $0x6b8] sm:$0xff]  ;;  %v5714_v16 = vld [vmem:[#allocation2 + $0x6a0] sm:$0xff] }
 0x4c2   :  { %6113 = vmatpush1.bf16.msra.mxu0 %v5662_v17  ;;  %6441 = vmatpush1.bf16.msra.mxu1 %v5664_v18  ;;  %v5716_v17 = vld [vmem:[#allocation2 + $0x6b0] sm:$0xff]  ;;  %v5719_v18 = vld [vmem:[#allocation2 + $0x6c8] sm:$0xff] }
 0x4c3   :  { %6114 = vmatprep.subr.bf16.mxu0 %v5667_v19  ;;  %6442 = vmatprep.subr.bf16.mxu1 %v5669_v20  ;;  %v5721_v19 = vld [vmem:[#allocation2 + $0x6d8] sm:$0xff]  ;;  %v5718_v20 = vld [vmem:[#allocation2 + $0x6c0] sm:$0xff] }
 0x4c6   :  { %6115 = vmatpush1.bf16.msra.mxu0 %v5666_v21  ;;  %6443 = vmatpush1.bf16.msra.mxu1 %v5668_v22  ;;  %v5720_v21 = vld [vmem:[#allocation2 + $0x6d0] sm:$0xff]  ;;  %v5723_v22 = vld [vmem:[#allocation2 + $0x6e8] sm:$0xff] }
 0x4c7   :  { %6116 = vmatprep.subr.bf16.mxu0 %v5671_v23  ;;  %6444 = vmatprep.subr.bf16.mxu1 %v5673_v24  ;;  %v5725_v23 = vld [vmem:[#allocation2 + $0x6f8] sm:$0xff]  ;;  %v5722_v24 = vld [vmem:[#allocation2 + $0x6e0] sm:$0xff] }
 0x4ca   :  { %6117 = vmatpush1.bf16.msra.mxu0 %v5670_v25  ;;  %6445 = vmatpush1.bf16.msra.mxu1 %v5672_v26  ;;  %v5724_v25 = vld [vmem:[#allocation2 + $0x6f0] sm:$0xff]  ;;  %v5727_v26 = vld [vmem:[#allocation2 + $0x708] sm:$0xff] }
 0x4cb   :  { %6118 = vmatprep.subr.bf16.mxu0 %v5675_v27  ;;  %6446 = vmatprep.subr.bf16.mxu1 %v5677_v28  ;;  %v5729_v27 = vld [vmem:[#allocation2 + $0x718] sm:$0xff]  ;;  %v5726_v28 = vld [vmem:[#allocation2 + $0x700] sm:$0xff] }
 0x4ce   :  { %6119 = vmatpush1.bf16.msra.mxu0 %v5674_v51  ;;  %6447 = vmatpush1.bf16.msra.mxu1 %v5676_v29  ;;  %v5728_v51 = vld [vmem:[#allocation2 + $0x710] sm:$0xff]  ;;  %v5731_v29 = vld [vmem:[#allocation2 + $0x728] sm:$0xff] }
 0x4cf   :  { %6120 = vmatprep.subr.bf16.mxu0 %v5679_v30  ;;  %6448 = vmatprep.subr.bf16.mxu1 %v5681_v31  ;;  %v5733_v30 = vld [vmem:[#allocation2 + $0x738] sm:$0xff]  ;;  %v5730_v31 = vld [vmem:[#allocation2 + $0x720] sm:$0xff] }
 0x4d2   :  { %6121 = vmatpush1.bf16.msra.mxu0 %v5678_v32  ;;  %6449 = vmatpush1.bf16.msra.mxu1 %v5680_v54  ;;  %v5732_v32 = vld [vmem:[#allocation2 + $0x730] sm:$0xff]  ;;  %v5735_v54 = vld [vmem:[#allocation2 + $0x748] sm:$0xff] }
 0x4d3   :  { %6122 = vmatprep.subr.bf16.mxu0 %v5683_v33  ;;  %6450 = vmatprep.subr.bf16.mxu1 %v5685_v34  ;;  %v5737_v33 = vld [vmem:[#allocation2 + $0x758] sm:$0xff]  ;;  %v5734_v34 = vld [vmem:[#allocation2 + $0x740] sm:$0xff] }
 0x4d6   :  { %6123 = vmatpush1.bf16.msra.mxu0 %v5682_v35  ;;  %6451 = vmatpush1.bf16.msra.mxu1 %v5684_v36  ;;  %v5736_v35 = vld [vmem:[#allocation2 + $0x750] sm:$0xff]  ;;  %v5739_v36 = vld [vmem:[#allocation2 + $0x768] sm:$0xff] }
 0x4d7   :  { %6124 = vmatprep.subr.bf16.mxu0 %v5687_v37  ;;  %6452 = vmatprep.subr.bf16.mxu1 %v5689_v38  ;;  %v5741_v37 = vld [vmem:[#allocation2 + $0x778] sm:$0xff]  ;;  %v5738_v38 = vld [vmem:[#allocation2 + $0x760] sm:$0xff] }
 0x4da   :  { %6125 = vmatpush1.bf16.msra.mxu0 %v5686_v39  ;;  %6453 = vmatpush1.bf16.msra.mxu1 %v5688_v40  ;;  %v5740_v39 = vld [vmem:[#allocation2 + $0x770] sm:$0xff]  ;;  %v5743_v40 = vld [vmem:[#allocation2 + $0x788] sm:$0xff] }
 0x4db   :  { %6126 = vmatprep.subr.bf16.mxu0 %v5691_v41  ;;  %6454 = vmatprep.subr.bf16.mxu1 %v5693_v53  ;;  %v5745_v41 = vld [vmem:[#allocation2 + $0x798] sm:$0xff]  ;;  %v5742_v53 = vld [vmem:[#allocation2 + $0x780] sm:$0xff] }
 0x4de   :  { %6127 = vmatpush1.bf16.msra.mxu0 %v5690_v42  ;;  %6455 = vmatpush1.bf16.msra.mxu1 %v5692_v43  ;;  %v5744_v42 = vld [vmem:[#allocation2 + $0x790] sm:$0xff]  ;;  %v5747_v43 = vld [vmem:[#allocation2 + $0x7a8] sm:$0xff] }
 0x4df   :  { %6137 = vmatprep.subr.bf16.mxu0 %v5695_v44  ;;  %6465 = vmatprep.subr.bf16.mxu1 %v5697_v45  ;;  %v5749_v44 = vld [vmem:[#allocation2 + $0x7b8] sm:$0xff]  ;;  %v5746_v45 = vld [vmem:[#allocation2 + $0x7a0] sm:$0xff] }
 0x4e1   :  { %6129 = vmatmul.mubr.bf16.vlgmr.msra.gmra.mrb[16].mxu0 %v5490_v56  ;;  %6457 = vmatmul.mubr.bf16.vlgmr.msra.gmra.mrb[16].mxu1 %v5490_v56  ;;  %v5748_v56 = vld [vmem:[#allocation2 + $0x7b0] sm:$0xff] }
 0x4e2   :  { %6138 = vmatpush1.bf16.msra.mxu0 %v5694_v46  ;;  %6466 = vmatpush1.bf16.msra.mxu1 %v5696_v47  ;;  %v5751_v46 = vld [vmem:[#allocation2 + $0x7c8] sm:$0xff]  ;;  %v5753_v47 = vld [vmem:[#allocation2 + $0x7d8] sm:$0xff] }
 0x4e3   :  { %6139 = vmatprep.subr.bf16.mxu0 %v5699_v48  ;;  %6467 = vmatprep.subr.bf16.mxu1 %v5701_v49  ;;  %v5750_v48 = vld [vmem:[#allocation2 + $0x7c0] sm:$0xff]  ;;  %v5752_v49 = vld [vmem:[#allocation2 + $0x7d0] sm:$0xff] }
 0x4e4   :  { %6169 = vmatprep.mubr.bf16.mxu0 %v5493_v50  ;;  %6497 = vmatprep.mubr.bf16.mxu1 %v5493_v50  ;;  %v5755_v50 = vld [vmem:[#allocation2 + $0x7e8] sm:$0xff] }
 0x4e6   :  { %6140 = vmatpush1.bf16.msra.mxu0 %v5698_v52  ;;  %6468 = vmatpush1.bf16.msra.mxu1 %v5700_v3  ;;  %v5757_v52 = vld [vmem:[#allocation2 + $0x7f8] sm:$0xff]  ;;  %v5754_v3 = vld [vmem:[#allocation2 + $0x7e0] sm:$0xff] }
 0x4e7   :  { %6141 = vmatprep.subr.bf16.mxu0 %v5703_v55  ;;  %6469 = vmatprep.subr.bf16.mxu1 %v5705_v4  ;;  %v5756_v55 = vld [vmem:[#allocation2 + $0x7f0] sm:$0xff]  ;;  %v5759_v4 = vld [vmem:[#allocation2 + $0x808] sm:$0xff] }
 0x4ea   :  { %6142 = vmatpush1.bf16.msra.mxu0 %v5702_v5  ;;  %6470 = vmatpush1.bf16.msra.mxu1 %v5704_v6  ;;  %v5761_v5 = vld [vmem:[#allocation2 + $0x818] sm:$0xff]  ;;  %v5492_v6 = vpack.c.bf16 %v9338_v57, %v9338_v57  ;;  %v5767_v57 = vld [vmem:[#allocation2 + $0x848] sm:$0xff] }
 0x4eb   :  { %6143 = vmatprep.subr.bf16.mxu0 %v5707_v7  ;;  %6471 = vmatprep.subr.bf16.mxu1 %v5709_v58  ;;  %v5758_v7 = vld [vmem:[#allocation2 + $0x800] sm:$0xff]  ;;  %v5760_v58 = vld [vmem:[#allocation2 + $0x810] sm:$0xff] }
 0x4ee   :  { %6144 = vmatpush1.bf16.msra.mxu0 %v5706_v8  ;;  %6472 = vmatpush1.bf16.msra.mxu1 %v5708_v9  ;;  %v5763_v8 = vld [vmem:[#allocation2 + $0x828] sm:$0xff]  ;;  %v5765_v9 = vld [vmem:[#allocation2 + $0x838] sm:$0xff] }
 0x4ef   :  { %6145 = vmatprep.subr.bf16.mxu0 %v5711_v10  ;;  %6473 = vmatprep.subr.bf16.mxu1 %v5713_v11  ;;  %v5495_v10 = vpack.c.bf16 %v9344_v60, %v9344_v60  ;;  %v5762_v11 = vld [vmem:[#allocation2 + $0x820] sm:$0xff]  ;;  %v5773_v60 = vld [vmem:[#allocation2 + $0x878] sm:$0xff] }
 0x4f2   :  { %6146 = vmatpush1.bf16.msra.mxu0 %v5710_v12  ;;  %6474 = vmatpush1.bf16.msra.mxu1 %v5712_v13  ;;  %v5764_v12 = vld [vmem:[#allocation2 + $0x830] sm:$0xff]  ;;  %v5769_v13 = vld [vmem:[#allocation2 + $0x858] sm:$0xff] }
 0x4f3   :  { %6147 = vmatprep.subr.bf16.mxu0 %v5715_v14  ;;  %6475 = vmatprep.subr.bf16.mxu1 %v5717_v15  ;;  %v5766_v14 = vld [vmem:[#allocation2 + $0x840] sm:$0xff]  ;;  %v5768_v15 = vld [vmem:[#allocation2 + $0x850] sm:$0xff] }
 0x4f6   :  { %6148 = vmatpush1.bf16.msra.mxu0 %v5714_v16  ;;  %6476 = vmatpush1.bf16.msra.mxu1 %v5716_v17  ;;  %v5771_v16 = vld [vmem:[#allocation2 + $0x868] sm:$0xff]  ;;  %v5770_v17 = vld [vmem:[#allocation2 + $0x860] sm:$0xff] }
 0x4f7   :  { %6149 = vmatprep.subr.bf16.mxu0 %v5719_v18  ;;  %6477 = vmatprep.subr.bf16.mxu1 %v5721_v19  ;;  %v5772_v18 = vld [vmem:[#allocation2 + $0x870] sm:$0xff]  ;;  %v5775_v19 = vld [vmem:[#allocation2 + $0x888] sm:$0xff] }
 0x4fa   :  { %6150 = vmatpush1.bf16.msra.mxu0 %v5718_v20  ;;  %6478 = vmatpush1.bf16.msra.mxu1 %v5720_v21  ;;  %v5777_v20 = vld [vmem:[#allocation2 + $0x898] sm:$0xff]  ;;  %v5774_v21 = vld [vmem:[#allocation2 + $0x880] sm:$0xff] }
 0x4fb   :  { %6151 = vmatprep.subr.bf16.mxu0 %v5723_v22  ;;  %6479 = vmatprep.subr.bf16.mxu1 %v5725_v23  ;;  %v5776_v22 = vld [vmem:[#allocation2 + $0x890] sm:$0xff]  ;;  %v5779_v23 = vld [vmem:[#allocation2 + $0x8a8] sm:$0xff] }
 0x4fe   :  { %6152 = vmatpush1.bf16.msra.mxu0 %v5722_v24  ;;  %6480 = vmatpush1.bf16.msra.mxu1 %v5724_v25  ;;  %v5781_v24 = vld [vmem:[#allocation2 + $0x8b8] sm:$0xff]  ;;  %v5778_v25 = vld [vmem:[#allocation2 + $0x8a0] sm:$0xff] }
 0x4ff   :  { %6153 = vmatprep.subr.bf16.mxu0 %v5727_v26  ;;  %6481 = vmatprep.subr.bf16.mxu1 %v5729_v27  ;;  %v5780_v26 = vld [vmem:[#allocation2 + $0x8b0] sm:$0xff]  ;;  %v5783_v27 = vld [vmem:[#allocation2 + $0x8c8] sm:$0xff] }
 0x502   :  { %6154 = vmatpush1.bf16.msra.mxu0 %v5726_v28  ;;  %6482 = vmatpush1.bf16.msra.mxu1 %v5728_v51  ;;  %v5785_v28 = vld [vmem:[#allocation2 + $0x8d8] sm:$0xff]  ;;  %v5782_v51 = vld [vmem:[#allocation2 + $0x8c0] sm:$0xff] }
 0x503   :  { %6155 = vmatprep.subr.bf16.mxu0 %v5731_v29  ;;  %6483 = vmatprep.subr.bf16.mxu1 %v5733_v30  ;;  %v5784_v29 = vld [vmem:[#allocation2 + $0x8d0] sm:$0xff]  ;;  %v5787_v30 = vld [vmem:[#allocation2 + $0x8e8] sm:$0xff] }
 0x506   :  { %6156 = vmatpush1.bf16.msra.mxu0 %v5730_v31  ;;  %6484 = vmatpush1.bf16.msra.mxu1 %v5732_v32  ;;  %v5789_v31 = vld [vmem:[#allocation2 + $0x8f8] sm:$0xff]  ;;  %v5786_v32 = vld [vmem:[#allocation2 + $0x8e0] sm:$0xff] }
 0x507   :  { %6157 = vmatprep.subr.bf16.mxu0 %v5735_v54  ;;  %6485 = vmatprep.subr.bf16.mxu1 %v5737_v33  ;;  %v5788_v54 = vld [vmem:[#allocation2 + $0x8f0] sm:$0xff]  ;;  %v5791_v33 = vld [vmem:[#allocation2 + $0x908] sm:$0xff] }
 0x50a   :  { %6158 = vmatpush1.bf16.msra.mxu0 %v5734_v34  ;;  %6486 = vmatpush1.bf16.msra.mxu1 %v5736_v35  ;;  %v5793_v34 = vld [vmem:[#allocation2 + $0x918] sm:$0xff]  ;;  %v5790_v35 = vld [vmem:[#allocation2 + $0x900] sm:$0xff] }
 0x50b   :  { %6159 = vmatprep.subr.bf16.mxu0 %v5739_v36  ;;  %6487 = vmatprep.subr.bf16.mxu1 %v5741_v37  ;;  %v5792_v36 = vld [vmem:[#allocation2 + $0x910] sm:$0xff]  ;;  %v5795_v37 = vld [vmem:[#allocation2 + $0x928] sm:$0xff] }
 0x50e   :  { %6160 = vmatpush1.bf16.msra.mxu0 %v5738_v38  ;;  %6488 = vmatpush1.bf16.msra.mxu1 %v5740_v39  ;;  %v5797_v38 = vld [vmem:[#allocation2 + $0x938] sm:$0xff]  ;;  %v5794_v39 = vld [vmem:[#allocation2 + $0x920] sm:$0xff] }
 0x50f   :  { %6161 = vmatprep.subr.bf16.mxu0 %v5743_v40  ;;  %6489 = vmatprep.subr.bf16.mxu1 %v5745_v41  ;;  %v5796_v40 = vld [vmem:[#allocation2 + $0x930] sm:$0xff]  ;;  %v5799_v41 = vld [vmem:[#allocation2 + $0x948] sm:$0xff] }
 0x512   :  { %6162 = vmatpush1.bf16.msra.mxu0 %v5742_v53  ;;  %6490 = vmatpush1.bf16.msra.mxu1 %v5744_v42  ;;  %v5801_v53 = vld [vmem:[#allocation2 + $0x958] sm:$0xff]  ;;  %v5798_v42 = vld [vmem:[#allocation2 + $0x940] sm:$0xff] }
 0x513   :  { %6163 = vmatprep.subr.bf16.mxu0 %v5747_v43  ;;  %6491 = vmatprep.subr.bf16.mxu1 %v5749_v44  ;;  %v5800_v43 = vld [vmem:[#allocation2 + $0x950] sm:$0xff]  ;;  %v5803_v44 = vld [vmem:[#allocation2 + $0x968] sm:$0xff] }
 0x516   :  { %6164 = vmatpush1.bf16.msra.mxu0 %v5746_v45  ;;  %6492 = vmatpush1.bf16.msra.mxu1 %v5748_v56  ;;  %v5805_v45 = vld [vmem:[#allocation2 + $0x978] sm:$0xff]  ;;  %v5802_v56 = vld [vmem:[#allocation2 + $0x960] sm:$0xff] }
 0x517   :  { %6165 = vmatprep.subr.bf16.mxu0 %v5751_v46  ;;  %6493 = vmatprep.subr.bf16.mxu1 %v5753_v47  ;;  %v5804_v46 = vld [vmem:[#allocation2 + $0x970] sm:$0xff]  ;;  %v5807_v47 = vld [vmem:[#allocation2 + $0x988] sm:$0xff] }
 0x51a   :  { %6166 = vmatpush1.bf16.msra.mxu0 %v5750_v48  ;;  %6494 = vmatpush1.bf16.msra.mxu1 %v5752_v49  ;;  %v5809_v48 = vld [vmem:[#allocation2 + $0x998] sm:$0xff]  ;;  %v5806_v49 = vld [vmem:[#allocation2 + $0x980] sm:$0xff] }
 0x51b   :  { %6167 = vmatprep.subr.bf16.mxu0 %v5755_v50  ;;  %6495 = vmatprep.subr.bf16.mxu1 %v5757_v52  ;;  %v5808_v50 = vld [vmem:[#allocation2 + $0x990] sm:$0xff]  ;;  %v5811_v52 = vld [vmem:[#allocation2 + $0x9a8] sm:$0xff] }
 0x51e   :  { %6168 = vmatpush1.bf16.msra.mxu0 %v5754_v3  ;;  %6496 = vmatpush1.bf16.msra.mxu1 %v5756_v55  ;;  %v5813_v3 = vld [vmem:[#allocation2 + $0x9b8] sm:$0xff]  ;;  %v5810_v55 = vld [vmem:[#allocation2 + $0x9a0] sm:$0xff] }
 0x51f   :  { %6178 = vmatprep.subr.bf16.mxu0 %v5759_v4  ;;  %6506 = vmatprep.subr.bf16.mxu1 %v5761_v5  ;;  %v5812_v4 = vld [vmem:[#allocation2 + $0x9b0] sm:$0xff]  ;;  %v5815_v5 = vld [vmem:[#allocation2 + $0x9c8] sm:$0xff] }
 0x521   :  { %6170 = vmatmul.mubr.bf16.vlgmr.msra.gmra.mrb[16].mxu0 %v5492_v6  ;;  %6498 = vmatmul.mubr.bf16.vlgmr.msra.gmra.mrb[16].mxu1 %v5492_v6  ;;  %v5817_v6 = vld [vmem:[#allocation2 + $0x9d8] sm:$0xff] }
 0x522   :  { %6179 = vmatpush1.bf16.msra.mxu0 %v5758_v7  ;;  %6507 = vmatpush1.bf16.msra.mxu1 %v5760_v58  ;;  %v5814_v7 = vld [vmem:[#allocation2 + $0x9c0] sm:$0xff]  ;;  %v5816_v58 = vld [vmem:[#allocation2 + $0x9d0] sm:$0xff] }
 0x523   :  { %6180 = vmatprep.subr.bf16.mxu0 %v5763_v8  ;;  %6508 = vmatprep.subr.bf16.mxu1 %v5765_v9  ;;  %v5819_v8 = vld [vmem:[#allocation2 + $0x9e8] sm:$0xff]  ;;  %v5821_v9 = vld [vmem:[#allocation2 + $0x9f8] sm:$0xff] }
 0x524   :  { %6210 = vmatprep.mubr.bf16.mxu0 %v5495_v10  ;;  %6538 = vmatprep.mubr.bf16.mxu1 %v5495_v10  ;;  %v5818_v10 = vld [vmem:[#allocation2 + $0x9e0] sm:$0xff] }
 0x526   :  { %6181 = vmatpush1.bf16.msra.mxu0 %v5762_v11  ;;  %6509 = vmatpush1.bf16.msra.mxu1 %v5764_v12  ;;  %v5820_v11 = vld [vmem:[#allocation2 + $0x9f0] sm:$0xff]  ;;  %v5823_v12 = vld [vmem:[#allocation2 + $0xa08] sm:$0xff] }
 0x527   :  { %6182 = vmatprep.subr.bf16.mxu0 %v5767_v57  ;;  %6510 = vmatprep.subr.bf16.mxu1 %v5769_v13  ;;  %v5825_v57 = vld [vmem:[#allocation2 + $0xa18] sm:$0xff]  ;;  %v5494_v13 = vpack.c.bf16 %v9342_v59, %v9342_v59  ;;  %v5831_v59 = vld [vmem:[#allocation2 + $0xa48] sm:$0xff] }
 0x52a   :  { %6183 = vmatpush1.bf16.msra.mxu0 %v5766_v14  ;;  %6511 = vmatpush1.bf16.msra.mxu1 %v5768_v15  ;;  %v5822_v14 = vld [vmem:[#allocation2 + $0xa00] sm:$0xff]  ;;  %v5824_v15 = vld [vmem:[#allocation2 + $0xa10] sm:$0xff] }
 0x52b   :  { %6184 = vmatprep.subr.bf16.mxu0 %v5771_v16  ;;  %6512 = vmatprep.subr.bf16.mxu1 %v5773_v60  ;;  %v5827_v16 = vld [vmem:[#allocation2 + $0xa28] sm:$0xff]  ;;  %v5829_v60 = vld [vmem:[#allocation2 + $0xa38] sm:$0xff] }
 0x52e   :  { %6185 = vmatpush1.bf16.msra.mxu0 %v5770_v17  ;;  %6513 = vmatpush1.bf16.msra.mxu1 %v5772_v18  ;;  %v5497_v17 = vpack.c.bf16 %v9348_v62, %v9348_v62  ;;  %v5826_v18 = vld [vmem:[#allocation2 + $0xa20] sm:$0xff]  ;;  %v5837_v62 = vld [vmem:[#allocation2 + $0xa78] sm:$0xff] }
 0x52f   :  { %6186 = vmatprep.subr.bf16.mxu0 %v5775_v19  ;;  %6514 = vmatprep.subr.bf16.mxu1 %v5777_v20  ;;  %v5828_v19 = vld [vmem:[#allocation2 + $0xa30] sm:$0xff]  ;;  %v5833_v20 = vld [vmem:[#allocation2 + $0xa58] sm:$0xff] }
 0x532   :  { %6187 = vmatpush1.bf16.msra.mxu0 %v5774_v21  ;;  %6515 = vmatpush1.bf16.msra.mxu1 %v5776_v22  ;;  %v5830_v21 = vld [vmem:[#allocation2 + $0xa40] sm:$0xff]  ;;  %v5832_v22 = vld [vmem:[#allocation2 + $0xa50] sm:$0xff] }
 0x533   :  { %6188 = vmatprep.subr.bf16.mxu0 %v5779_v23  ;;  %6516 = vmatprep.subr.bf16.mxu1 %v5781_v24  ;;  %v5835_v23 = vld [vmem:[#allocation2 + $0xa68] sm:$0xff]  ;;  %v5834_v24 = vld [vmem:[#allocation2 + $0xa60] sm:$0xff] }
 0x536   :  { %6189 = vmatpush1.bf16.msra.mxu0 %v5778_v25  ;;  %6517 = vmatpush1.bf16.msra.mxu1 %v5780_v26  ;;  %v5836_v25 = vld [vmem:[#allocation2 + $0xa70] sm:$0xff]  ;;  %v5839_v26 = vld [vmem:[#allocation2 + $0xa88] sm:$0xff] }
 0x537   :  { %6190 = vmatprep.subr.bf16.mxu0 %v5783_v27  ;;  %6518 = vmatprep.subr.bf16.mxu1 %v5785_v28  ;;  %v5841_v27 = vld [vmem:[#allocation2 + $0xa98] sm:$0xff]  ;;  %v5838_v28 = vld [vmem:[#allocation2 + $0xa80] sm:$0xff] }
 0x53a   :  { %6191 = vmatpush1.bf16.msra.mxu0 %v5782_v51  ;;  %6519 = vmatpush1.bf16.msra.mxu1 %v5784_v29  ;;  %v5840_v51 = vld [vmem:[#allocation2 + $0xa90] sm:$0xff]  ;;  %v5843_v29 = vld [vmem:[#allocation2 + $0xaa8] sm:$0xff] }
 0x53b   :  { %6192 = vmatprep.subr.bf16.mxu0 %v5787_v30  ;;  %6520 = vmatprep.subr.bf16.mxu1 %v5789_v31  ;;  %v5845_v30 = vld [vmem:[#allocation2 + $0xab8] sm:$0xff]  ;;  %v5842_v31 = vld [vmem:[#allocation2 + $0xaa0] sm:$0xff] }
 0x53e   :  { %6193 = vmatpush1.bf16.msra.mxu0 %v5786_v32  ;;  %6521 = vmatpush1.bf16.msra.mxu1 %v5788_v54  ;;  %v5844_v32 = vld [vmem:[#allocation2 + $0xab0] sm:$0xff]  ;;  %v5847_v54 = vld [vmem:[#allocation2 + $0xac8] sm:$0xff] }
 0x53f   :  { %6194 = vmatprep.subr.bf16.mxu0 %v5791_v33  ;;  %6522 = vmatprep.subr.bf16.mxu1 %v5793_v34  ;;  %v5849_v33 = vld [vmem:[#allocation2 + $0xad8] sm:$0xff]  ;;  %v5846_v34 = vld [vmem:[#allocation2 + $0xac0] sm:$0xff] }
 0x542   :  { %6195 = vmatpush1.bf16.msra.mxu0 %v5790_v35  ;;  %6523 = vmatpush1.bf16.msra.mxu1 %v5792_v36  ;;  %v5848_v35 = vld [vmem:[#allocation2 + $0xad0] sm:$0xff]  ;;  %v5851_v36 = vld [vmem:[#allocation2 + $0xae8] sm:$0xff] }
 0x543   :  { %6196 = vmatprep.subr.bf16.mxu0 %v5795_v37  ;;  %6524 = vmatprep.subr.bf16.mxu1 %v5797_v38  ;;  %v5853_v37 = vld [vmem:[#allocation2 + $0xaf8] sm:$0xff]  ;;  %v5850_v38 = vld [vmem:[#allocation2 + $0xae0] sm:$0xff] }
 0x546   :  { %6197 = vmatpush1.bf16.msra.mxu0 %v5794_v39  ;;  %6525 = vmatpush1.bf16.msra.mxu1 %v5796_v40  ;;  %v5852_v39 = vld [vmem:[#allocation2 + $0xaf0] sm:$0xff]  ;;  %v5855_v40 = vld [vmem:[#allocation2 + $0xb08] sm:$0xff] }
 0x547   :  { %6198 = vmatprep.subr.bf16.mxu0 %v5799_v41  ;;  %6526 = vmatprep.subr.bf16.mxu1 %v5801_v53  ;;  %v5857_v41 = vld [vmem:[#allocation2 + $0xb18] sm:$0xff]  ;;  %v5854_v53 = vld [vmem:[#allocation2 + $0xb00] sm:$0xff] }
 0x54a   :  { %6199 = vmatpush1.bf16.msra.mxu0 %v5798_v42  ;;  %6527 = vmatpush1.bf16.msra.mxu1 %v5800_v43  ;;  %v5856_v42 = vld [vmem:[#allocation2 + $0xb10] sm:$0xff]  ;;  %v5859_v43 = vld [vmem:[#allocation2 + $0xb28] sm:$0xff] }
 0x54b   :  { %6200 = vmatprep.subr.bf16.mxu0 %v5803_v44  ;;  %6528 = vmatprep.subr.bf16.mxu1 %v5805_v45  ;;  %v5861_v44 = vld [vmem:[#allocation2 + $0xb38] sm:$0xff]  ;;  %v5858_v45 = vld [vmem:[#allocation2 + $0xb20] sm:$0xff] }
 0x54e   :  { %6201 = vmatpush1.bf16.msra.mxu0 %v5802_v56  ;;  %6529 = vmatpush1.bf16.msra.mxu1 %v5804_v46  ;;  %v5860_v56 = vld [vmem:[#allocation2 + $0xb30] sm:$0xff]  ;;  %v5863_v46 = vld [vmem:[#allocation2 + $0xb48] sm:$0xff] }
 0x54f   :  { %6202 = vmatprep.subr.bf16.mxu0 %v5807_v47  ;;  %6530 = vmatprep.subr.bf16.mxu1 %v5809_v48  ;;  %v5865_v47 = vld [vmem:[#allocation2 + $0xb58] sm:$0xff]  ;;  %v5862_v48 = vld [vmem:[#allocation2 + $0xb40] sm:$0xff] }
 0x552   :  { %6203 = vmatpush1.bf16.msra.mxu0 %v5806_v49  ;;  %6531 = vmatpush1.bf16.msra.mxu1 %v5808_v50  ;;  %v5864_v49 = vld [vmem:[#allocation2 + $0xb50] sm:$0xff]  ;;  %v5867_v50 = vld [vmem:[#allocation2 + $0xb68] sm:$0xff] }
 0x553   :  { %6204 = vmatprep.subr.bf16.mxu0 %v5811_v52  ;;  %6532 = vmatprep.subr.bf16.mxu1 %v5813_v3  ;;  %v5869_v52 = vld [vmem:[#allocation2 + $0xb78] sm:$0xff]  ;;  %v5866_v3 = vld [vmem:[#allocation2 + $0xb60] sm:$0xff] }
 0x556   :  { %6205 = vmatpush1.bf16.msra.mxu0 %v5810_v55  ;;  %6533 = vmatpush1.bf16.msra.mxu1 %v5812_v4  ;;  %v5868_v55 = vld [vmem:[#allocation2 + $0xb70] sm:$0xff]  ;;  %v5871_v4 = vld [vmem:[#allocation2 + $0xb88] sm:$0xff] }
 0x557   :  { %6206 = vmatprep.subr.bf16.mxu0 %v5815_v5  ;;  %6534 = vmatprep.subr.bf16.mxu1 %v5817_v6  ;;  %v5873_v5 = vld [vmem:[#allocation2 + $0xb98] sm:$0xff]  ;;  %v5870_v6 = vld [vmem:[#allocation2 + $0xb80] sm:$0xff] }
 0x55a   :  { %6207 = vmatpush1.bf16.msra.mxu0 %v5814_v7  ;;  %6535 = vmatpush1.bf16.msra.mxu1 %v5816_v58  ;;  %v5872_v7 = vld [vmem:[#allocation2 + $0xb90] sm:$0xff]  ;;  %v5875_v58 = vld [vmem:[#allocation2 + $0xba8] sm:$0xff] }
 0x55b   :  { %6208 = vmatprep.subr.bf16.mxu0 %v5819_v8  ;;  %6536 = vmatprep.subr.bf16.mxu1 %v5821_v9  ;;  %v5877_v8 = vld [vmem:[#allocation2 + $0xbb8] sm:$0xff]  ;;  %v5874_v9 = vld [vmem:[#allocation2 + $0xba0] sm:$0xff] }
 0x55e   :  { %6209 = vmatpush1.bf16.msra.mxu0 %v5818_v10  ;;  %6537 = vmatpush1.bf16.msra.mxu1 %v5820_v11  ;;  %v5876_v10 = vld [vmem:[#allocation2 + $0xbb0] sm:$0xff]  ;;  %v5879_v11 = vld [vmem:[#allocation2 + $0xbc8] sm:$0xff] }
 0x55f   :  { %6219 = vmatprep.subr.bf16.mxu0 %v5823_v12  ;;  %6547 = vmatprep.subr.bf16.mxu1 %v5825_v57  ;;  %v5881_v12 = vld [vmem:[#allocation2 + $0xbd8] sm:$0xff]  ;;  %v5878_v57 = vld [vmem:[#allocation2 + $0xbc0] sm:$0xff] }
 0x561   :  { %6211 = vmatmul.mubr.bf16.vlgmr.msra.gmra.mrb[16].mxu0 %v5494_v13  ;;  %6539 = vmatmul.mubr.bf16.vlgmr.msra.gmra.mrb[16].mxu1 %v5494_v13  ;;  %v5880_v13 = vld [vmem:[#allocation2 + $0xbd0] sm:$0xff] }
 0x562   :  { %6220 = vmatpush1.bf16.msra.mxu0 %v5822_v14  ;;  %6548 = vmatpush1.bf16.msra.mxu1 %v5824_v15  ;;  %v5883_v14 = vld [vmem:[#allocation2 + $0xbe8] sm:$0xff]  ;;  %v5885_v15 = vld [vmem:[#allocation2 + $0xbf8] sm:$0xff] }
 0x563   :  { %6221 = vmatprep.subr.bf16.mxu0 %v5827_v16  ;;  %6549 = vmatprep.subr.bf16.mxu1 %v5829_v60  ;;  %v5882_v16 = vld [vmem:[#allocation2 + $0xbe0] sm:$0xff]  ;;  %v5884_v60 = vld [vmem:[#allocation2 + $0xbf0] sm:$0xff] }
 0x564   :  { %6251 = vmatprep.mubr.bf16.mxu0 %v5497_v17  ;;  %6579 = vmatprep.mubr.bf16.mxu1 %v5497_v17  ;;  %v5887_v17 = vld [vmem:[#allocation2 + $0xc08] sm:$0xff] }
 0x566   :  { %6222 = vmatpush1.bf16.msra.mxu0 %v5826_v18  ;;  %6550 = vmatpush1.bf16.msra.mxu1 %v5828_v19  ;;  %v5889_v18 = vld [vmem:[#allocation2 + $0xc18] sm:$0xff]  ;;  %v5496_v19 = vpack.c.bf16 %v9346_v61, %v9346_v61  ;;  %v5895_v61 = vld [vmem:[#allocation2 + $0xc48] sm:$0xff] }
 0x567   :  { %6223 = vmatprep.subr.bf16.mxu0 %v5831_v59  ;;  %6551 = vmatprep.subr.bf16.mxu1 %v5833_v20  ;;  %v5886_v59 = vld [vmem:[#allocation2 + $0xc00] sm:$0xff]  ;;  %v5888_v20 = vld [vmem:[#allocation2 + $0xc10] sm:$0xff] }
 0x56a   :  { %6224 = vmatpush1.bf16.msra.mxu0 %v5830_v21  ;;  %6552 = vmatpush1.bf16.msra.mxu1 %v5832_v22  ;;  %v5891_v21 = vld [vmem:[#allocation2 + $0xc28] sm:$0xff]  ;;  %v5893_v22 = vld [vmem:[#allocation2 + $0xc38] sm:$0xff] }
 0x56b   :  { %6225 = vmatprep.subr.bf16.mxu0 %v5835_v23  ;;  %6553 = vmatprep.subr.bf16.mxu1 %v5837_v62  ;;  %v5499_v23 = vpack.c.bf16 %v9352_v0, %v9352_v0  ;;  %v5890_v62 = vld [vmem:[#allocation2 + $0xc20] sm:$0xff]  ;;  %v5901_v0 = vld [vmem:[#allocation2 + $0xc78] sm:$0xff] }
 0x56e   :  { %6226 = vmatpush1.bf16.msra.mxu0 %v5834_v24  ;;  %6554 = vmatpush1.bf16.msra.mxu1 %v5836_v25  ;;  %v5892_v24 = vld [vmem:[#allocation2 + $0xc30] sm:$0xff]  ;;  %v5897_v25 = vld [vmem:[#allocation2 + $0xc58] sm:$0xff] }
 0x56f   :  { %6227 = vmatprep.subr.bf16.mxu0 %v5839_v26  ;;  %6555 = vmatprep.subr.bf16.mxu1 %v5841_v27  ;;  %v5894_v26 = vld [vmem:[#allocation2 + $0xc40] sm:$0xff]  ;;  %v5896_v27 = vld [vmem:[#allocation2 + $0xc50] sm:$0xff] }
 0x572   :  { %6228 = vmatpush1.bf16.msra.mxu0 %v5838_v28  ;;  %6556 = vmatpush1.bf16.msra.mxu1 %v5840_v51  ;;  %v5899_v28 = vld [vmem:[#allocation2 + $0xc68] sm:$0xff]  ;;  %v5898_v51 = vld [vmem:[#allocation2 + $0xc60] sm:$0xff] }
 0x573   :  { %6229 = vmatprep.subr.bf16.mxu0 %v5843_v29  ;;  %6557 = vmatprep.subr.bf16.mxu1 %v5845_v30  ;;  %v5900_v29 = vld [vmem:[#allocation2 + $0xc70] sm:$0xff]  ;;  %v5903_v30 = vld [vmem:[#allocation2 + $0xc88] sm:$0xff] }
 0x576   :  { %6230 = vmatpush1.bf16.msra.mxu0 %v5842_v31  ;;  %6558 = vmatpush1.bf16.msra.mxu1 %v5844_v32  ;;  %v5905_v31 = vld [vmem:[#allocation2 + $0xc98] sm:$0xff]  ;;  %v5902_v32 = vld [vmem:[#allocation2 + $0xc80] sm:$0xff] }
 0x577   :  { %6231 = vmatprep.subr.bf16.mxu0 %v5847_v54  ;;  %6559 = vmatprep.subr.bf16.mxu1 %v5849_v33  ;;  %v5904_v54 = vld [vmem:[#allocation2 + $0xc90] sm:$0xff]  ;;  %v5907_v33 = vld [vmem:[#allocation2 + $0xca8] sm:$0xff] }
 0x57a   :  { %6232 = vmatpush1.bf16.msra.mxu0 %v5846_v34  ;;  %6560 = vmatpush1.bf16.msra.mxu1 %v5848_v35  ;;  %v5909_v34 = vld [vmem:[#allocation2 + $0xcb8] sm:$0xff]  ;;  %v5906_v35 = vld [vmem:[#allocation2 + $0xca0] sm:$0xff] }
 0x57b   :  { %6233 = vmatprep.subr.bf16.mxu0 %v5851_v36  ;;  %6561 = vmatprep.subr.bf16.mxu1 %v5853_v37  ;;  %v5908_v36 = vld [vmem:[#allocation2 + $0xcb0] sm:$0xff]  ;;  %v5911_v37 = vld [vmem:[#allocation2 + $0xcc8] sm:$0xff] }
 0x57e   :  { %6234 = vmatpush1.bf16.msra.mxu0 %v5850_v38  ;;  %6562 = vmatpush1.bf16.msra.mxu1 %v5852_v39  ;;  %v5913_v38 = vld [vmem:[#allocation2 + $0xcd8] sm:$0xff]  ;;  %v5910_v39 = vld [vmem:[#allocation2 + $0xcc0] sm:$0xff] }
 0x57f   :  { %6235 = vmatprep.subr.bf16.mxu0 %v5855_v40  ;;  %6563 = vmatprep.subr.bf16.mxu1 %v5857_v41  ;;  %v5912_v40 = vld [vmem:[#allocation2 + $0xcd0] sm:$0xff]  ;;  %v5915_v41 = vld [vmem:[#allocation2 + $0xce8] sm:$0xff] }
 0x582   :  { %6236 = vmatpush1.bf16.msra.mxu0 %v5854_v53  ;;  %6564 = vmatpush1.bf16.msra.mxu1 %v5856_v42  ;;  %v5917_v53 = vld [vmem:[#allocation2 + $0xcf8] sm:$0xff]  ;;  %v5914_v42 = vld [vmem:[#allocation2 + $0xce0] sm:$0xff] }
 0x583   :  { %6237 = vmatprep.subr.bf16.mxu0 %v5859_v43  ;;  %6565 = vmatprep.subr.bf16.mxu1 %v5861_v44  ;;  %v5916_v43 = vld [vmem:[#allocation2 + $0xcf0] sm:$0xff]  ;;  %v5919_v44 = vld [vmem:[#allocation2 + $0xd08] sm:$0xff] }
 0x586   :  { %6238 = vmatpush1.bf16.msra.mxu0 %v5858_v45  ;;  %6566 = vmatpush1.bf16.msra.mxu1 %v5860_v56  ;;  %v5921_v45 = vld [vmem:[#allocation2 + $0xd18] sm:$0xff]  ;;  %v5918_v56 = vld [vmem:[#allocation2 + $0xd00] sm:$0xff] }
 0x587   :  { %6239 = vmatprep.subr.bf16.mxu0 %v5863_v46  ;;  %6567 = vmatprep.subr.bf16.mxu1 %v5865_v47  ;;  %v5920_v46 = vld [vmem:[#allocation2 + $0xd10] sm:$0xff]  ;;  %v5923_v47 = vld [vmem:[#allocation2 + $0xd28] sm:$0xff] }
 0x58a   :  { %6240 = vmatpush1.bf16.msra.mxu0 %v5862_v48  ;;  %6568 = vmatpush1.bf16.msra.mxu1 %v5864_v49  ;;  %v5925_v48 = vld [vmem:[#allocation2 + $0xd38] sm:$0xff]  ;;  %v5922_v49 = vld [vmem:[#allocation2 + $0xd20] sm:$0xff] }
 0x58b   :  { %6241 = vmatprep.subr.bf16.mxu0 %v5867_v50  ;;  %6569 = vmatprep.subr.bf16.mxu1 %v5869_v52  ;;  %v5924_v50 = vld [vmem:[#allocation2 + $0xd30] sm:$0xff]  ;;  %v5927_v52 = vld [vmem:[#allocation2 + $0xd48] sm:$0xff] }
 0x58e   :  { %6242 = vmatpush1.bf16.msra.mxu0 %v5866_v3  ;;  %6570 = vmatpush1.bf16.msra.mxu1 %v5868_v55  ;;  %v5929_v3 = vld [vmem:[#allocation2 + $0xd58] sm:$0xff]  ;;  %v5926_v55 = vld [vmem:[#allocation2 + $0xd40] sm:$0xff] }
 0x58f   :  { %6243 = vmatprep.subr.bf16.mxu0 %v5871_v4  ;;  %6571 = vmatprep.subr.bf16.mxu1 %v5873_v5  ;;  %v5928_v4 = vld [vmem:[#allocation2 + $0xd50] sm:$0xff]  ;;  %v5931_v5 = vld [vmem:[#allocation2 + $0xd68] sm:$0xff] }
 0x592   :  { %6244 = vmatpush1.bf16.msra.mxu0 %v5870_v6  ;;  %6572 = vmatpush1.bf16.msra.mxu1 %v5872_v7  ;;  %v5933_v6 = vld [vmem:[#allocation2 + $0xd78] sm:$0xff]  ;;  %v5930_v7 = vld [vmem:[#allocation2 + $0xd60] sm:$0xff] }
 0x593   :  { %6245 = vmatprep.subr.bf16.mxu0 %v5875_v58  ;;  %6573 = vmatprep.subr.bf16.mxu1 %v5877_v8  ;;  %v5932_v58 = vld [vmem:[#allocation2 + $0xd70] sm:$0xff]  ;;  %v5935_v8 = vld [vmem:[#allocation2 + $0xd88] sm:$0xff] }
 0x596   :  { %6246 = vmatpush1.bf16.msra.mxu0 %v5874_v9  ;;  %6574 = vmatpush1.bf16.msra.mxu1 %v5876_v10  ;;  %v5937_v9 = vld [vmem:[#allocation2 + $0xd98] sm:$0xff]  ;;  %v5934_v10 = vld [vmem:[#allocation2 + $0xd80] sm:$0xff] }
 0x597   :  { %6247 = vmatprep.subr.bf16.mxu0 %v5879_v11  ;;  %6575 = vmatprep.subr.bf16.mxu1 %v5881_v12  ;;  %v5936_v11 = vld [vmem:[#allocation2 + $0xd90] sm:$0xff]  ;;  %v5939_v12 = vld [vmem:[#allocation2 + $0xda8] sm:$0xff] }
 0x59a   :  { %6248 = vmatpush1.bf16.msra.mxu0 %v5878_v57  ;;  %6576 = vmatpush1.bf16.msra.mxu1 %v5880_v13  ;;  %v5941_v57 = vld [vmem:[#allocation2 + $0xdb8] sm:$0xff]  ;;  %v5938_v13 = vld [vmem:[#allocation2 + $0xda0] sm:$0xff] }
 0x59b   :  { %6249 = vmatprep.subr.bf16.mxu0 %v5883_v14  ;;  %6577 = vmatprep.subr.bf16.mxu1 %v5885_v15  ;;  %v5940_v14 = vld [vmem:[#allocation2 + $0xdb0] sm:$0xff]  ;;  %v5943_v15 = vld [vmem:[#allocation2 + $0xdc8] sm:$0xff] }
 0x59e   :  { %6250 = vmatpush1.bf16.msra.mxu0 %v5882_v16  ;;  %6578 = vmatpush1.bf16.msra.mxu1 %v5884_v60  ;;  %v5945_v16 = vld [vmem:[#allocation2 + $0xdd8] sm:$0xff]  ;;  %v5942_v60 = vld [vmem:[#allocation2 + $0xdc0] sm:$0xff] }
 0x59f   :  { %6260 = vmatprep.subr.bf16.mxu0 %v5887_v17  ;;  %6588 = vmatprep.subr.bf16.mxu1 %v5889_v18  ;;  %v5944_v17 = vld [vmem:[#allocation2 + $0xdd0] sm:$0xff]  ;;  %v5947_v18 = vld [vmem:[#allocation2 + $0xde8] sm:$0xff] }
 0x5a1   :  { %6252 = vmatmul.mubr.bf16.vlgmr.msra.gmra.mrb[16].mxu0 %v5496_v19  ;;  %6580 = vmatmul.mubr.bf16.vlgmr.msra.gmra.mrb[16].mxu1 %v5496_v19  ;;  %v5949_v19 = vld [vmem:[#allocation2 + $0xdf8] sm:$0xff] }
 0x5a2   :  { %6261 = vmatpush1.bf16.msra.mxu0 %v5886_v59  ;;  %6589 = vmatpush1.bf16.msra.mxu1 %v5888_v20  ;;  %v5946_v59 = vld [vmem:[#allocation2 + $0xde0] sm:$0xff]  ;;  %v5948_v20 = vld [vmem:[#allocation2 + $0xdf0] sm:$0xff] }
 0x5a3   :  { %6262 = vmatprep.subr.bf16.mxu0 %v5891_v21  ;;  %6590 = vmatprep.subr.bf16.mxu1 %v5893_v22  ;;  %v5951_v21 = vld [vmem:[#allocation2 + $0xe08] sm:$0xff]  ;;  %v5953_v22 = vld [vmem:[#allocation2 + $0xe18] sm:$0xff] }
 0x5a4   :  { %6292 = vmatprep.mubr.bf16.mxu0 %v5499_v23  ;;  %6620 = vmatprep.mubr.bf16.mxu1 %v5499_v23  ;;  %v5498_v23 = vpack.c.bf16 %v9350_v63, %v9350_v63  ;;  %v5959_v63 = vld [vmem:[#allocation2 + $0xe48] sm:$0xff] }
 0x5a6   :  { %6263 = vmatpush1.bf16.msra.mxu0 %v5890_v62  ;;  %6591 = vmatpush1.bf16.msra.mxu1 %v5892_v24  ;;  %v5950_v62 = vld [vmem:[#allocation2 + $0xe00] sm:$0xff]  ;;  %v5952_v24 = vld [vmem:[#allocation2 + $0xe10] sm:$0xff] }
 0x5a7   :  { %6264 = vmatprep.subr.bf16.mxu0 %v5895_v61  ;;  %6592 = vmatprep.subr.bf16.mxu1 %v5897_v25  ;;  %v5955_v61 = vld [vmem:[#allocation2 + $0xe28] sm:$0xff]  ;;  %v5957_v25 = vld [vmem:[#allocation2 + $0xe38] sm:$0xff] }
 0x5aa   :  { %6265 = vmatpush1.bf16.msra.mxu0 %v5894_v26  ;;  %6593 = vmatpush1.bf16.msra.mxu1 %v5896_v27  ;;  %v5501_v26 = vpack.c.bf16 %v9356_v2, %v9356_v2  ;;  %v5954_v27 = vld [vmem:[#allocation2 + $0xe20] sm:$0xff]  ;;  %v5965_v2 = vld [vmem:[#allocation2 + $0xe78] sm:$0xff] }
 0x5ab   :  { %6266 = vmatprep.subr.bf16.mxu0 %v5899_v28  ;;  %6594 = vmatprep.subr.bf16.mxu1 %v5901_v0  ;;  %v5956_v28 = vld [vmem:[#allocation2 + $0xe30] sm:$0xff]  ;;  %v5961_v0 = vld [vmem:[#allocation2 + $0xe58] sm:$0xff] }
 0x5ae   :  { %6267 = vmatpush1.bf16.msra.mxu0 %v5898_v51  ;;  %6595 = vmatpush1.bf16.msra.mxu1 %v5900_v29  ;;  %v5958_v51 = vld [vmem:[#allocation2 + $0xe40] sm:$0xff]  ;;  %v5960_v29 = vld [vmem:[#allocation2 + $0xe50] sm:$0xff] }
 0x5af   :  { %6268 = vmatprep.subr.bf16.mxu0 %v5903_v30  ;;  %6596 = vmatprep.subr.bf16.mxu1 %v5905_v31  ;;  %v5963_v30 = vld [vmem:[#allocation2 + $0xe68] sm:$0xff]  ;;  %v5962_v31 = vld [vmem:[#allocation2 + $0xe60] sm:$0xff] }
 0x5b2   :  { %6269 = vmatpush1.bf16.msra.mxu0 %v5902_v32  ;;  %6597 = vmatpush1.bf16.msra.mxu1 %v5904_v54  ;;  %v5964_v32 = vld [vmem:[#allocation2 + $0xe70] sm:$0xff]  ;;  %v5967_v54 = vld [vmem:[#allocation2 + $0xe88] sm:$0xff] }
 0x5b3   :  { %6270 = vmatprep.subr.bf16.mxu0 %v5907_v33  ;;  %6598 = vmatprep.subr.bf16.mxu1 %v5909_v34  ;;  %v5969_v33 = vld [vmem:[#allocation2 + $0xe98] sm:$0xff]  ;;  %v5966_v34 = vld [vmem:[#allocation2 + $0xe80] sm:$0xff] }
 0x5b6   :  { %6271 = vmatpush1.bf16.msra.mxu0 %v5906_v35  ;;  %6599 = vmatpush1.bf16.msra.mxu1 %v5908_v36  ;;  %v5968_v35 = vld [vmem:[#allocation2 + $0xe90] sm:$0xff]  ;;  %v5971_v36 = vld [vmem:[#allocation2 + $0xea8] sm:$0xff] }
 0x5b7   :  { %6272 = vmatprep.subr.bf16.mxu0 %v5911_v37  ;;  %6600 = vmatprep.subr.bf16.mxu1 %v5913_v38  ;;  %v5973_v37 = vld [vmem:[#allocation2 + $0xeb8] sm:$0xff]  ;;  %v5970_v38 = vld [vmem:[#allocation2 + $0xea0] sm:$0xff] }
 0x5ba   :  { %6273 = vmatpush1.bf16.msra.mxu0 %v5910_v39  ;;  %6601 = vmatpush1.bf16.msra.mxu1 %v5912_v40  ;;  %v5972_v39 = vld [vmem:[#allocation2 + $0xeb0] sm:$0xff]  ;;  %v5975_v40 = vld [vmem:[#allocation2 + $0xec8] sm:$0xff] }
 0x5bb   :  { %6274 = vmatprep.subr.bf16.mxu0 %v5915_v41  ;;  %6602 = vmatprep.subr.bf16.mxu1 %v5917_v53  ;;  %v5977_v41 = vld [vmem:[#allocation2 + $0xed8] sm:$0xff]  ;;  %v5974_v53 = vld [vmem:[#allocation2 + $0xec0] sm:$0xff] }
 0x5be   :  { %6275 = vmatpush1.bf16.msra.mxu0 %v5914_v42  ;;  %6603 = vmatpush1.bf16.msra.mxu1 %v5916_v43  ;;  %v5976_v42 = vld [vmem:[#allocation2 + $0xed0] sm:$0xff]  ;;  %v5979_v43 = vld [vmem:[#allocation2 + $0xee8] sm:$0xff] }
 0x5bf   :  { %6276 = vmatprep.subr.bf16.mxu0 %v5919_v44  ;;  %6604 = vmatprep.subr.bf16.mxu1 %v5921_v45  ;;  %v5981_v44 = vld [vmem:[#allocation2 + $0xef8] sm:$0xff]  ;;  %v5978_v45 = vld [vmem:[#allocation2 + $0xee0] sm:$0xff] }
 0x5c2   :  { %6277 = vmatpush1.bf16.msra.mxu0 %v5918_v56  ;;  %6605 = vmatpush1.bf16.msra.mxu1 %v5920_v46  ;;  %v5980_v56 = vld [vmem:[#allocation2 + $0xef0] sm:$0xff]  ;;  %v5983_v46 = vld [vmem:[#allocation2 + $0xf08] sm:$0xff] }
 0x5c3   :  { %6278 = vmatprep.subr.bf16.mxu0 %v5923_v47  ;;  %6606 = vmatprep.subr.bf16.mxu1 %v5925_v48  ;;  %v5985_v47 = vld [vmem:[#allocation2 + $0xf18] sm:$0xff]  ;;  %v5982_v48 = vld [vmem:[#allocation2 + $0xf00] sm:$0xff] }
 0x5c6   :  { %6279 = vmatpush1.bf16.msra.mxu0 %v5922_v49  ;;  %6607 = vmatpush1.bf16.msra.mxu1 %v5924_v50  ;;  %v5984_v49 = vld [vmem:[#allocation2 + $0xf10] sm:$0xff]  ;;  %v5987_v50 = vld [vmem:[#allocation2 + $0xf28] sm:$0xff] }
 0x5c7   :  { %6280 = vmatprep.subr.bf16.mxu0 %v5927_v52  ;;  %6608 = vmatprep.subr.bf16.mxu1 %v5929_v3  ;;  %v5989_v52 = vld [vmem:[#allocation2 + $0xf38] sm:$0xff]  ;;  %v5986_v3 = vld [vmem:[#allocation2 + $0xf20] sm:$0xff] }
 0x5ca   :  { %6281 = vmatpush1.bf16.msra.mxu0 %v5926_v55  ;;  %6609 = vmatpush1.bf16.msra.mxu1 %v5928_v4  ;;  %v5988_v55 = vld [vmem:[#allocation2 + $0xf30] sm:$0xff]  ;;  %v5991_v4 = vld [vmem:[#allocation2 + $0xf48] sm:$0xff] }
 0x5cb   :  { %6282 = vmatprep.subr.bf16.mxu0 %v5931_v5  ;;  %6610 = vmatprep.subr.bf16.mxu1 %v5933_v6  ;;  %v5993_v5 = vld [vmem:[#allocation2 + $0xf58] sm:$0xff]  ;;  %v5990_v6 = vld [vmem:[#allocation2 + $0xf40] sm:$0xff] }
 0x5ce   :  { %6283 = vmatpush1.bf16.msra.mxu0 %v5930_v7  ;;  %6611 = vmatpush1.bf16.msra.mxu1 %v5932_v58  ;;  %v5992_v7 = vld [vmem:[#allocation2 + $0xf50] sm:$0xff]  ;;  %v5995_v58 = vld [vmem:[#allocation2 + $0xf68] sm:$0xff] }
 0x5cf   :  { %6284 = vmatprep.subr.bf16.mxu0 %v5935_v8  ;;  %6612 = vmatprep.subr.bf16.mxu1 %v5937_v9  ;;  %v5997_v8 = vld [vmem:[#allocation2 + $0xf78] sm:$0xff]  ;;  %v5994_v9 = vld [vmem:[#allocation2 + $0xf60] sm:$0xff] }
 0x5d2   :  { %6285 = vmatpush1.bf16.msra.mxu0 %v5934_v10  ;;  %6613 = vmatpush1.bf16.msra.mxu1 %v5936_v11  ;;  %v5996_v10 = vld [vmem:[#allocation2 + $0xf70] sm:$0xff]  ;;  %v5999_v11 = vld [vmem:[#allocation2 + $0xf88] sm:$0xff] }
 0x5d3   :  { %6286 = vmatprep.subr.bf16.mxu0 %v5939_v12  ;;  %6614 = vmatprep.subr.bf16.mxu1 %v5941_v57  ;;  %v6001_v12 = vld [vmem:[#allocation2 + $0xf98] sm:$0xff]  ;;  %v5998_v57 = vld [vmem:[#allocation2 + $0xf80] sm:$0xff] }
 0x5d6   :  { %6287 = vmatpush1.bf16.msra.mxu0 %v5938_v13  ;;  %6615 = vmatpush1.bf16.msra.mxu1 %v5940_v14  ;;  %v6000_v13 = vld [vmem:[#allocation2 + $0xf90] sm:$0xff]  ;;  %v6003_v14 = vld [vmem:[#allocation2 + $0xfa8] sm:$0xff] }
 0x5d7   :  { %6288 = vmatprep.subr.bf16.mxu0 %v5943_v15  ;;  %6616 = vmatprep.subr.bf16.mxu1 %v5945_v16  ;;  %v6005_v15 = vld [vmem:[#allocation2 + $0xfb8] sm:$0xff]  ;;  %v6002_v16 = vld [vmem:[#allocation2 + $0xfa0] sm:$0xff] }
 0x5da   :  { %6289 = vmatpush1.bf16.msra.mxu0 %v5942_v60  ;;  %6617 = vmatpush1.bf16.msra.mxu1 %v5944_v17  ;;  %v6004_v60 = vld [vmem:[#allocation2 + $0xfb0] sm:$0xff]  ;;  %v6007_v17 = vld [vmem:[#allocation2 + $0xfc8] sm:$0xff] }
 0x5db   :  { %6290 = vmatprep.subr.bf16.mxu0 %v5947_v18  ;;  %6618 = vmatprep.subr.bf16.mxu1 %v5949_v19  ;;  %v6009_v18 = vld [vmem:[#allocation2 + $0xfd8] sm:$0xff]  ;;  %v6006_v19 = vld [vmem:[#allocation2 + $0xfc0] sm:$0xff] }
 0x5de   :  { %6291 = vmatpush1.bf16.msra.mxu0 %v5946_v59  ;;  %6619 = vmatpush1.bf16.msra.mxu1 %v5948_v20  ;;  %v6008_v59 = vld [vmem:[#allocation2 + $0xfd0] sm:$0xff]  ;;  %v6011_v20 = vld [vmem:[#allocation2 + $0xfe8] sm:$0xff] }
 0x5df   :  { %6301 = vmatprep.subr.bf16.mxu0 %v5951_v21  ;;  %6629 = vmatprep.subr.bf16.mxu1 %v5953_v22  ;;  %v6013_v21 = vld [vmem:[#allocation2 + $0xff8] sm:$0xff]  ;;  %v6010_v22 = vld [vmem:[#allocation2 + $0xfe0] sm:$0xff] }
 0x5e1   :  { %6293 = vmatmul.mubr.bf16.vlgmr.msra.gmra.mrb[16].mxu0 %v5498_v23  ;;  %6621 = vmatmul.mubr.bf16.vlgmr.msra.gmra.mrb[16].mxu1 %v5498_v23  ;;  %v6012_v23 = vld [vmem:[#allocation2 + $0xff0] sm:$0xff] }
 0x5e2   :  { %6302 = vmatpush1.bf16.msra.mxu0 %v5950_v62  ;;  %6630 = vmatpush1.bf16.msra.mxu1 %v5952_v24  ;;  %v5500_v62 = vpack.c.bf16 %v9354_v1, %v9354_v1  ;;  %v7796_v24 = vld [vmem:[#allocation11 + $0x40] sm:$0xff]   ;;  %v7804_v1 = vld [vmem:[#allocation11 + $0x50] sm:$0xff]  }
 0x5e3   :  { %6303 = vmatprep.subr.bf16.mxu0 %v5955_v61  ;;  %6631 = vmatprep.subr.bf16.mxu1 %v5957_v25  ;;  %v7797_v61 = vld [vmem:[#allocation11 + $0xc0] sm:$0xff]  }
 0x5e4   :  { %6333 = vmatprep.mubr.bf16.mxu0 %v5501_v26  ;;  %6661 = vmatprep.mubr.bf16.mxu1 %v5501_v26  ;;  %v7798_v25 = vld [vmem:[#allocation11] sm:$0xff]  }
 0x5e5   :  { %v7799_v26 = vld [vmem:[#allocation11 + $0x80] sm:$0xff]  }
 0x5e6   :  { %6304 = vmatpush1.bf16.msra.mxu0 %v5954_v27  ;;  %6632 = vmatpush1.bf16.msra.mxu1 %v5956_v28  ;;  %v7800_v27 = vld [vmem:[#allocation11 + $0x48] sm:$0xff]  }
 0x5e7   :  { %6305 = vmatprep.subr.bf16.mxu0 %v5959_v63  ;;  %6633 = vmatprep.subr.bf16.mxu1 %v5961_v0  ;;  %v7801_v28 = vld [vmem:[#allocation11 + $0xc8] sm:$0xff]  }
 0x5e8   :  { %v7802_v63 = vld [vmem:[#allocation11 + $0x8] sm:$0xff]  }
 0x5e9   :  { %v7803_v0 = vld [vmem:[#allocation11 + $0x88] sm:$0xff]  }
 0x5ea   :  { %6306 = vmatpush1.bf16.msra.mxu0 %v5958_v51  ;;  %6634 = vmatpush1.bf16.msra.mxu1 %v5960_v29  ;;  %v7805_v51 = vld [vmem:[#allocation11 + $0xd0] sm:$0xff]  }
 0x5eb   :  { %6307 = vmatprep.subr.bf16.mxu0 %v5963_v30  ;;  %6635 = vmatprep.subr.bf16.mxu1 %v5965_v2  ;;  %v7806_v29 = vld [vmem:[#allocation11 + $0x10] sm:$0xff]   ;;  %v7808_v2 = vld [vmem:[#allocation11 + $0x58] sm:$0xff]  }
 0x5ec   :  { %v7807_v30 = vld [vmem:[#allocation11 + $0x90] sm:$0xff]  }
 0x5ee   :  { %6308 = vmatpush1.bf16.msra.mxu0 %v5962_v31  ;;  %6636 = vmatpush1.bf16.msra.mxu1 %v5964_v32  ;;  %v7809_v31 = vld [vmem:[#allocation11 + $0xd8] sm:$0xff]  }
 0x5ef   :  { %6309 = vmatprep.subr.bf16.mxu0 %v5967_v54  ;;  %6637 = vmatprep.subr.bf16.mxu1 %v5969_v33  ;;  %v7810_v32 = vld [vmem:[#allocation11 + $0x18] sm:$0xff]   ;;  %v7812_v33 = vld [vmem:[#allocation11 + $0x60] sm:$0xff]  }
 0x5f0   :  { %v7811_v54 = vld [vmem:[#allocation11 + $0x98] sm:$0xff]  }
 0x5f2   :  { %6310 = vmatpush1.bf16.msra.mxu0 %v5966_v34  ;;  %6638 = vmatpush1.bf16.msra.mxu1 %v5968_v35  ;;  %v7813_v34 = vld [vmem:[#allocation11 + $0xe0] sm:$0xff]  }
 0x5f3   :  { %6311 = vmatprep.subr.bf16.mxu0 %v5971_v36  ;;  %6639 = vmatprep.subr.bf16.mxu1 %v5973_v37  ;;  %v7814_v35 = vld [vmem:[#allocation11 + $0x20] sm:$0xff]   ;;  %v7816_v37 = vld [vmem:[#allocation11 + $0x68] sm:$0xff]  }
 0x5f4   :  { %v7815_v36 = vld [vmem:[#allocation11 + $0xa0] sm:$0xff]  }
 0x5f6   :  { %6312 = vmatpush1.bf16.msra.mxu0 %v5970_v38  ;;  %6640 = vmatpush1.bf16.msra.mxu1 %v5972_v39  ;;  %v7817_v38 = vld [vmem:[#allocation11 + $0xe8] sm:$0xff]  }
 0x5f7   :  { %6313 = vmatprep.subr.bf16.mxu0 %v5975_v40  ;;  %6641 = vmatprep.subr.bf16.mxu1 %v5977_v41  ;;  %v7818_v39 = vld [vmem:[#allocation11 + $0x28] sm:$0xff]   ;;  %v7820_v41 = vld [vmem:[#allocation11 + $0x70] sm:$0xff]  }
 0x5f8   :  { %v7819_v40 = vld [vmem:[#allocation11 + $0xa8] sm:$0xff]  }
 0x5fa   :  { %6314 = vmatpush1.bf16.msra.mxu0 %v5974_v53  ;;  %6642 = vmatpush1.bf16.msra.mxu1 %v5976_v42  ;;  %v7821_v53 = vld [vmem:[#allocation11 + $0xf0] sm:$0xff]  }
 0x5fb   :  { %6315 = vmatprep.subr.bf16.mxu0 %v5979_v43  ;;  %6643 = vmatprep.subr.bf16.mxu1 %v5981_v44  ;;  %v7822_v42 = vld [vmem:[#allocation11 + $0x30] sm:$0xff]   ;;  %v7824_v44 = vld [vmem:[#allocation11 + $0x78] sm:$0xff]  }
 0x5fc   :  { %v7823_v43 = vld [vmem:[#allocation11 + $0xb0] sm:$0xff]  }
 0x5fe   :  { %6316 = vmatpush1.bf16.msra.mxu0 %v5978_v45  ;;  %6644 = vmatpush1.bf16.msra.mxu1 %v5980_v56  ;;  %v7825_v45 = vld [vmem:[#allocation11 + $0xf8] sm:$0xff]  }
 0x5ff   :  { %6317 = vmatprep.subr.bf16.mxu0 %v5983_v46  ;;  %6645 = vmatprep.subr.bf16.mxu1 %v5985_v47  ;;  %v7826_v56 = vld [vmem:[#allocation11 + $0x38] sm:$0xff]  }
 0x600   :  { %v7827_v46 = vld [vmem:[#allocation11 + $0xb8] sm:$0xff]  }
 0x602   :  { %6318 = vmatpush1.bf16.msra.mxu0 %v5982_v48  ;;  %6646 = vmatpush1.bf16.msra.mxu1 %v5984_v49 }
 0x603   :  { %6319 = vmatprep.subr.bf16.mxu0 %v5987_v50  ;;  %6647 = vmatprep.subr.bf16.mxu1 %v5989_v52 }
 0x606   :  { %6320 = vmatpush1.bf16.msra.mxu0 %v5986_v3  ;;  %6648 = vmatpush1.bf16.msra.mxu1 %v5988_v55 }
 0x607   :  { %6321 = vmatprep.subr.bf16.mxu0 %v5991_v4  ;;  %6649 = vmatprep.subr.bf16.mxu1 %v5993_v5 }
 0x60a   :  { %6322 = vmatpush1.bf16.msra.mxu0 %v5990_v6  ;;  %6650 = vmatpush1.bf16.msra.mxu1 %v5992_v7 }
 0x60b   :  { %6323 = vmatprep.subr.bf16.mxu0 %v5995_v58  ;;  %6651 = vmatprep.subr.bf16.mxu1 %v5997_v8 }
 0x60e   :  { %6324 = vmatpush1.bf16.msra.mxu0 %v5994_v9  ;;  %6652 = vmatpush1.bf16.msra.mxu1 %v5996_v10 }
 0x60f   :  { %6325 = vmatprep.subr.bf16.mxu0 %v5999_v11  ;;  %6653 = vmatprep.subr.bf16.mxu1 %v6001_v12 }
 0x612   :  { %6326 = vmatpush1.bf16.msra.mxu0 %v5998_v57  ;;  %6654 = vmatpush1.bf16.msra.mxu1 %v6000_v13 }
 0x613   :  { %6327 = vmatprep.subr.bf16.mxu0 %v6003_v14  ;;  %6655 = vmatprep.subr.bf16.mxu1 %v6005_v15 }
 0x616   :  { %6328 = vmatpush1.bf16.msra.mxu0 %v6002_v16  ;;  %6656 = vmatpush1.bf16.msra.mxu1 %v6004_v60 }
 0x617   :  { %6329 = vmatprep.subr.bf16.mxu0 %v6007_v17  ;;  %6657 = vmatprep.subr.bf16.mxu1 %v6009_v18 }
 0x61a   :  { %6330 = vmatpush1.bf16.msra.mxu0 %v6006_v19  ;;  %6658 = vmatpush1.bf16.msra.mxu1 %v6008_v59 }
 0x61b   :  { %6331 = vmatprep.subr.bf16.mxu0 %v6011_v20  ;;  %6659 = vmatprep.subr.bf16.mxu1 %v6013_v21 }
 0x61e   :  { %6332 = vmatpush1.bf16.msra.mxu0 %v6010_v22  ;;  %6660 = vmatpush1.bf16.msra.mxu1 %v6012_v23 }
 0x61f   :  { %7493 = vmatprep.subr.bf16.mxu0 %v7796_v24  ;;  %7515 = vmatprep.subr.bf16.mxu1 %v7797_v61 }
 0x621   :  { %6334 = vmatmul.mubr.bf16.vlgmr.msra.gmra.mrb[16].mxu0 %v5500_v62  ;;  %6662 = vmatmul.mubr.bf16.vlgmr.msra.gmra.mrb[16].mxu1 %v5500_v62 }
 0x622   :  { %7494 = vmatpush3.bf16.msra.mxu0 %v7798_v25  ;;  %7516 = vmatpush3.bf16.msra.mxu1 %v7799_v26 }
 0x623   :  { %7495 = vmatprep.subr.bf16.mxu0 %v7800_v27  ;;  %7517 = vmatprep.subr.bf16.mxu1 %v7801_v28 }
 0x626   :  { %7496 = vmatpush3.bf16.msra.mxu0 %v7802_v63  ;;  %7518 = vmatpush3.bf16.msra.mxu1 %v7803_v0 }
 0x627   :  { %7497 = vmatprep.subr.bf16.mxu0 %v7804_v1  ;;  %7519 = vmatprep.subr.bf16.mxu1 %v7805_v51 }
 0x62a   :  { %7498 = vmatpush3.bf16.msra.mxu0 %v7806_v29  ;;  %7520 = vmatpush3.bf16.msra.mxu1 %v7807_v30 }
 0x62b   :  { %7499 = vmatprep.subr.bf16.mxu0 %v7808_v2  ;;  %7521 = vmatprep.subr.bf16.mxu1 %v7809_v31 }
 0x62e   :  { %7500 = vmatpush3.bf16.msra.mxu0 %v7810_v32  ;;  %7522 = vmatpush3.bf16.msra.mxu1 %v7811_v54 }
 0x62f   :  { %7501 = vmatprep.subr.bf16.mxu0 %v7812_v33  ;;  %7523 = vmatprep.subr.bf16.mxu1 %v7813_v34 }
 0x632   :  { %7502 = vmatpush3.bf16.msra.mxu0 %v7814_v35  ;;  %7524 = vmatpush3.bf16.msra.mxu1 %v7815_v36 }
 0x633   :  { %7503 = vmatprep.subr.bf16.mxu0 %v7816_v37  ;;  %7525 = vmatprep.subr.bf16.mxu1 %v7817_v38 }
 0x636   :  { %7504 = vmatpush3.bf16.msra.mxu0 %v7818_v39  ;;  %7526 = vmatpush3.bf16.msra.mxu1 %v7819_v40 }
 0x637   :  { %7505 = vmatprep.subr.bf16.mxu0 %v7820_v41  ;;  %7527 = vmatprep.subr.bf16.mxu1 %v7821_v53 }
 0x63a   :  { %7506 = vmatpush3.bf16.msra.mxu0 %v7822_v42  ;;  %7528 = vmatpush3.bf16.msra.mxu1 %v7823_v43 }
 0x63b   :  { %7507 = vmatprep.subr.bf16.mxu0 %v7824_v44  ;;  %7529 = vmatprep.subr.bf16.mxu1 %v7825_v45 }
 0x63e   :  { %7508 = vmatpush3.bf16.msra.mxu0 %v7826_v56  ;;  %7530 = vmatpush3.bf16.msra.mxu1 %v7827_v46 }
 0x6f4   :  { %v6335_v47 = vpop.f32.mrb[16].mxu0  ;;  %v6663_v48 = vpop.f32.mrb[16].mxu1 }
 0x6f5   :  { %v6671_v49 = vsel %vm6670_vm5, %v6335_v47, 0.0  ;;  %v6685_v50 = vsel %vm6670_vm5, %v6663_v48, 0.0  ;;  %v6337_v52 = vpop.f32.mrb[17].mxu0  ;;  %v6665_v3 = vpop.f32.mrb[17].mxu1 }
 0x6f6   :  { %v6672_v55 = vrot.slane %v6671_v49, 4  ;;  %v6686_v4 = vrot.slane %v6685_v50, 4  ;;  %v6678_v5 = vsel %vm6670_vm5, %v6337_v52, 0.0  ;;  %v6692_v6 = vsel %vm6670_vm5, %v6665_v3, 0.0  ;;  %v6339_v7 = vpop.f32.mrb[18].mxu0  ;;  %v6667_v58 = vpop.f32.mrb[18].mxu1 }
 0x6f7   :  { %v6679_v8 = vrot.slane %v6678_v5, 4  ;;  %v6693_v9 = vrot.slane %v6692_v6, 4  ;;  %v6340_v10 = vpop.f32.mrb[19].mxu0  ;;  %v6668_v11 = vpop.f32.mrb[19].mxu1 }
 0x6f8   :  { %v6673_v12 = vadd.f32 %v6672_v55, %v6671_v49  ;;  %v6687_v57 = vadd.f32 %v6686_v4, %v6685_v50  ;;  %v6758_v10 = vlaneseq }
 0x6f9   :  { %v6680_v13 = vadd.f32 %v6679_v8, %v6678_v5  ;;  %v6694_v14 = vadd.f32 %v6693_v9, %v6692_v6 }
 0x6fa   :  { %v6674_v15 = vrot.slane %v6673_v12, 2  ;;  %v6688_v16 = vrot.slane %v6687_v57, 2 }
 0x6fb   :  { %v6681_v60 = vrot.slane %v6680_v13, 2  ;;  %v6695_v17 = vrot.slane %v6694_v14, 2 }
 0x6fc   :  { %v6675_v18 = vadd.f32 %v6674_v15, %v6673_v12  ;;  %v6689_v19 = vadd.f32 %v6688_v16, %v6687_v57  ;;  %v6759_v16 = vshrl.u32 %v6758_v10, 7 }
 0x6fd   :  { %v6682_v59 = vadd.f32 %v6681_v60, %v6680_v13  ;;  %v6696_v20 = vadd.f32 %v6695_v17, %v6694_v14  ;;  %v6756_v17 = vld [vmem:[%s9432_s6] sm:$0xf]  ;;  %s8020_s6 = smov [#allocation14]  }
 0x6fe   :  { %v6676_v21 = vrot.slane %v6675_v18, 1  ;;  %v6690_v22 = vrot.slane %v6689_v19, 1  ;;  %v6760_v60 = vsub.s32 0, %v6759_v16  ;;  %s7174_s22 = sshll.u32 %s8020_s6, 4  ;;  %s7175_s22 = int_to_ptr.vmem [resolvable:$true] %s7174_s22 }
 0x6ff   :  { %v6683_v23 = vrot.slane %v6682_v59, 1  ;;  %v6697_v62 = vrot.slane %v6696_v20, 1  ;;  %s7946_s23 = scalar_lea.vmem %s7175_s22, 32  ;;  %p7951_p1 = scmp.lt.s32.totalorder %s7175_s22, %s7175_s22 }
 0x700   :  { %v6677_v24 = vadd.f32 %v6676_v21, %v6675_v18  ;;  %v6691_v61 = vadd.f32 %v6690_v22, %v6689_v19  ;;  %v6768_v18 = vsub.s32 2, %v6759_v16  ;;  %v6764_v19 = vsub.s32 1, %v6759_v16  ;;  %p7947_p0 = scmp.ne.s32.totalorder %s7175_s22, %s7946_s23  ;;  %p7952_p2 = scmp.lt.s32.totalorder %s7946_s23, %s7946_s23 }
 0x701   :  { %v6684_v25 = vadd.f32 %v6683_v23, %v6682_v59  ;;  %v6698_v26 = vadd.f32 %v6697_v62, %v6696_v20  ;;  %v6782_v59 = vld [vmem:[#allocation10] sm:$0xf]  ;;  %v6772_v20 = vsub.s32 3, %v6759_v16  ;;  %v6761_v21 = vrot.slane %v6756_v17, %v6760_v60 }
 0x702   :  { %v6700_v27 = vmul.f32 0.5, %v6677_v24  ;;  %v6702_v28 = vmul.f32 0.5, %v6691_v61  ;;  %v6769_v23 = vrot.slane %v6756_v17, %v6768_v18  ;;  %v6787_v61 = vrot.slane %v6782_v59, %v6760_v60  ;;  %p7953_p3 = por %p7952_p2, %p7951_p1 }
 0x703   :  { %v6701_v63 = vmul.f32 0.5, %v6684_v25  ;;  %v6703_v0 = vmul.f32 0.5, %v6698_v26  ;;  %v6765_v25 = vrot.slane %v6756_v17, %v6764_v19 }
 0x704   :  { %v6704_v1 = vsub.f32 %v6335_v47, %v6700_v27  ;;  %v9392_v51 = vsub.f32 %v6663_v48, %v6702_v28  ;;  %v6795_v28 = vrot.slane %v6782_v59, %v6768_v18  ;;  %p7954_p4 = pnand %p7953_p3, %p7947_p0 }
 0x705   :  { %v9394_v29 = vsub.f32 %v6337_v52, %v6701_v63  ;;  %v9396_v30 = vsub.f32 %v6665_v3, %v6703_v0  ;;  %v6773_v63 = vrot.slane %v6756_v17, %v6772_v20 }
 0x706   :  { %v6708_v2 = vmul.f32 %v6704_v1, %v6704_v1  ;;  %v6710_v31 = vmul.f32 %v9392_v51, %v9392_v51 }
 0x707   :  { %v6709_v32 = vmul.f32 %v9394_v29, %v9394_v29  ;;  %v6711_v54 = vmul.f32 %v9396_v30, %v9396_v30 }
 0x708   :  { %v6712_v33 = vsel %vm6670_vm5, %v6708_v2, 0.0  ;;  %v6726_v34 = vsel %vm6670_vm5, %v6710_v31, 0.0 }
 0x709   :  { %v6713_v35 = vrot.slane %v6712_v33, 4  ;;  %v6727_v36 = vrot.slane %v6726_v34, 4  ;;  %v6719_v37 = vsel %vm6670_vm5, %v6709_v32, 0.0  ;;  %v6733_v38 = vsel %vm6670_vm5, %v6711_v54, 0.0 }
 0x70a   :  { %v6720_v39 = vrot.slane %v6719_v37, 4  ;;  %v6734_v40 = vrot.slane %v6733_v38, 4  ;;  %v6791_v32 = vrot.slane %v6782_v59, %v6764_v19 }
 0x70b   :  { %v6714_v41 = vadd.f32 %v6713_v35, %v6712_v33  ;;  %v6728_v53 = vadd.f32 %v6727_v36, %v6726_v34  ;;  %v6799_v34 = vrot.slane %v6782_v59, %v6772_v20 }
 0x70c   :  { %v6721_v42 = vadd.f32 %v6720_v39, %v6719_v37  ;;  %v6735_v43 = vadd.f32 %v6734_v40, %v6733_v38 }
 0x70d   :  { %v6715_v44 = vrot.slane %v6714_v41, 2  ;;  %v6729_v45 = vrot.slane %v6728_v53, 2 }
 0x70e   :  { %v6722_v56 = vrot.slane %v6721_v42, 2  ;;  %v6736_v46 = vrot.slane %v6735_v43, 2 }
 0x70f   :  { %v6716_v47 = vadd.f32 %v6715_v44, %v6714_v41  ;;  %v6730_v48 = vadd.f32 %v6729_v45, %v6728_v53 }
 0x710   :  { %v6723_v49 = vadd.f32 %v6722_v56, %v6721_v42  ;;  %v6737_v50 = vadd.f32 %v6736_v46, %v6735_v43 }
 0x711   :  { %v6717_v52 = vrot.slane %v6716_v47, 1  ;;  %v6731_v3 = vrot.slane %v6730_v48, 1 }
 0x712   :  { %v6724_v55 = vrot.slane %v6723_v49, 1  ;;  %v6738_v4 = vrot.slane %v6737_v50, 1 }
 0x713   :  { %v6718_v5 = vadd.f32 %v6717_v52, %v6716_v47  ;;  %v6732_v6 = vadd.f32 %v6731_v3, %v6730_v48 }
 0x714   :  { %v6725_v7 = vadd.f32 %v6724_v55, %v6723_v49  ;;  %v6739_v58 = vadd.f32 %v6738_v4, %v6737_v50  ;;  %v7403_v49 = vld [vmem:[#allocation13] ss:$0 sm:$0xff] }
 0x715   :  { %v6740_v8 = vmul.f32 0.5, %v6718_v5  ;;  %v6742_v9 = vmul.f32 0.5, %v6732_v6 }
 0x716   :  { %v6741_v11 = vmul.f32 0.5, %v6725_v7  ;;  %v6743_v12 = vmul.f32 0.5, %v6739_v58 }
 0x717   :  { %v6744_v57 = vadd.f32 1e-05, %v6740_v8  ;;  %v6746_v13 = vadd.f32 1e-05, %v6742_v9 }
 0x718   :  { %v6745_v14 = vadd.f32 1e-05, %v6741_v11  ;;  %v6747_v15 = vadd.f32 1e-05, %v6743_v12 }
 0x719   :  { %7828 = vrsqrt.f32 %v6744_v57 }
 0x71a   :  { %7830 = vrsqrt.f32 %v6746_v13 }
 0x71b   :  { %7832 = vrsqrt.f32 %v6745_v14 }
 0x71c   :  { %7834 = vrsqrt.f32 %v6747_v15 }
 0x723   :  { %v7829_v22 = vpop.eup %7828 }
 0x724   :  { %v7831_v62 = vpop.eup %7830  ;;  %v6752_v24 = vmul.f32 %v7829_v22, %v6704_v1 }
 0x725   :  { %v7833_v26 = vpop.eup %7832  ;;  %v6754_v27 = vmul.f32 %v7831_v62, %v9392_v51 }
 0x726   :  { %v7835_v0 = vpop.eup %7834  ;;  %v6778_v2 = vmul.f32 %v6761_v21, %v6752_v24  ;;  %v6753_v31 = vmul.f32 %v7833_v26, %v9394_v29 }
 0x727   :  { %v6780_v54 = vmul.f32 %v6769_v23, %v6754_v27  ;;  %v6755_v33 = vmul.f32 %v7835_v0, %v9396_v30 }
 0x728   :  { %v6804_v35 = vadd.f32 %v6787_v61, %v6778_v2  ;;  %v6779_v36 = vmul.f32 %v6765_v25, %v6753_v31 }
 0x729   :  { %v6806_v37 = vadd.f32 %v6795_v28, %v6780_v54  ;;  %v6781_v1 = vmul.f32 %v6773_v63, %v6755_v33 }
 0x72a   :  { %v6805_v38 = vadd.f32 %v6791_v32, %v6779_v36  ;;  %vm6808_vm6 = vcmp.gt.f32.partialorder %v6804_v35, 0.0  ;;  %v6812_v39 = vmul.f32 0.3, %v6804_v35 }
 0x72b   :  { %v6807_v40 = vadd.f32 %v6799_v34, %v6781_v1  ;;  %vm6810_vm7 = vcmp.gt.f32.partialorder %v6806_v37, 0.0  ;;  %v6814_v51 = vmul.f32 0.3, %v6806_v37 }
 0x72c   :  { %vm6809_vm8 = vcmp.gt.f32.partialorder %v6805_v38, 0.0  ;;  %v6813_v41 = vmul.f32 0.3, %v6805_v38  ;;  %v6816_v29 = vsel %vm6808_vm6, %v6804_v35, %v6812_v39 }
 0x72d   :  { %vm6811_vm9 = vcmp.gt.f32.partialorder %v6807_v40, 0.0  ;;  %v6815_v53 = vmul.f32 0.3, %v6807_v40  ;;  %v6818_v43 = vsel %vm6810_vm7, %v6806_v37, %v6814_v51  ;;  %v6820_v56 = vpack.c.bf16 %v6816_v29, %v6816_v29 }
 0x72e   :  { %v6817_v42 = vsel %vm6809_vm8, %v6805_v38, %v6813_v41  ;;  %v6822_v46 = vpack.c.bf16 %v6818_v43, %v6818_v43 }
 0x72f   :  { %v6821_v44 = vpack.c.bf16 %v6817_v42, %v6817_v42  ;;  %v6819_v30 = vsel %vm6811_vm9, %v6807_v40, %v6815_v53 }
 0x730   :  { %v6823_v45 = vpack.c.bf16 %v6819_v30, %v6819_v30 }
 0x731   :  { %7119 = vmatprep.mubr.bf16.mxu0 %v6821_v44 }
 0x732   :  { %7159 = vmatprep.mubr.bf16.mxu1 %v6823_v45  ;;  %7120 = vmatmul.mubr.bf16.vlgmr.msra.gmra.mrb[20].mxu0 %v6820_v56 }
 0x733   :  { %7160 = vmatmul.mubr.bf16.vlgmr.msra.gmra.mrb[20].mxu1 %v6822_v46 }
 0x805   :  { %v7509_v47 = vpop.f32.mrb[20].mxu0 }
 0x806   :  { %v7531_v48 = vpop.f32.mrb[20].mxu1  ;;  %v7510_v50 = vpop.f32.mrb[21].mxu0 }
 0x807   :  { %v7511_v52 = vadd.f32 %v7510_v50, %v7509_v47  ;;  %v7532_v3 = vpop.f32.mrb[21].mxu1  ;;  %v7512_v55 = vpop.f32.mrb[22].mxu0 }
 0x808   :  { %v7533_v4 = vadd.f32 %v7532_v3, %v7531_v48  ;;  %v7534_v5 = vpop.f32.mrb[22].mxu1  ;;  %v7513_v6 = vpop.f32.mrb[23].mxu0 }
 0x809   :  { %v7122_v7 = vadd.f32 %v7511_v52, %v7403_v49  ;;  %v7535_v58 = vpop.f32.mrb[23].mxu1 }
 0x80b   :  { %v7162_v8 = vadd.f32 %v7533_v4, %v7122_v7 }
 0x80d   :  { %7167 = vst [vmem:[#allocation14] sm:$0x3] %v7162_v8 }
 0x80e   :  { %7957 = shalt.err (!%p7954_p4)
}
 0x80f   :  { %s7958_s21 = scalar_lea.hbm %s9436_s10, 32 }
 0x810   :  { %p7959_p5 = scmp.ne.s32.totalorder %s9436_s10, %s7958_s21  ;;  %p7962_p6 = scmp.lt.u32.totalorder %s7958_s21, %s9436_s10 }
 0x812   :  { %p7964_p7 = pnand %p7962_p6, %p7959_p5 }
 0x814   :  { %7967 = shalt.err (!%p7964_p7)
}
 0x815   :  { %7177 = dma.vmem_to_hbm [thread:$0]  %s7175_s22, 32, %s9436_s10, [#allocation7]  }
 0x816   :  { %7992 = dma.done.wait [#allocation7], 32  }
 0x817   :  { %7993 = vsyncadd [#allocation7], 4294967264 }
 0x818   :  { %7181 = vsyncpa [#allocation6], 1 }
 0x819   :  { %7182 = vsyncpa [#allocation9], 1 }
 0x81a   :  { %7183 = vsyncpa [#allocation12], 1 }
 0x81b   :  { %7184 = vsyncpa [#allocation7], 1 }
 0x81c   :  { %7185 = vsyncmov [#allocation4] }
 0x81f   :  { %s7186_s8 = vpop.sfrf %7185 }
 0x820   :  { %p7436_p8 = scmp.ne.s32.totalorder %s7186_s8, 0 }
 0x822   :  { %7190 = shalt.err (%p7436_p8)  }

</bundles_post_ra>
